<compile_context>
chip_gen: v7x
topology: tpu7x:2x2x1
jax: 0.10.0
libtpu: 0.0.40
codegen_flags: <defaults>
</compile_context>

<pallas_src>
import functools

import jax
import jax.numpy as jnp
from jax import lax
from jax.experimental import pallas as pl
from jax.experimental.pallas import tpu as pltpu


def _round_up(x, m):
    return ((x + m - 1) // m) * m


def _sigmoid_via_tanh(x):
    # sigmoid(x) == 0.5 * (1 + tanh(x / 2)): one native tanh EUP push per gate
    # instead of exp + reciprocal.
    return 0.5 * (jnp.tanh(0.5 * x) + 1.0)


# --------------------------------------------------------------------------- #
# Fused kernel: all stacked GCN-LSTM layers, t_block timesteps per grid step.
#   refs = (x, A, [wx_l, wh_l, b_l]*L, hseq, hlast, clast, [h_l, c_l]*L)
# --------------------------------------------------------------------------- #
def _gcn_lstm_fused_kernel(*refs, out_features, t_block):
    nl = len(out_features)
    x_ref, a_ref = refs[0], refs[1]
    w_refs = refs[2:2 + 3 * nl]
    hseq_ref, hlast_ref, clast_ref = refs[2 + 3 * nl:5 + 3 * nl]
    state_refs = refs[5 + 3 * nl:]          # h0, c0, h1, c1, ...

    tb = pl.program_id(1)

    @pl.when(tb == 0)
    def _():
        for sr in state_refs:
            sr[...] = jnp.zeros_like(sr)

    # Hoist the (tiny) weight / bias loads out of the unrolled time loop.
    w_vals = [(w_refs[3 * li][...], w_refs[3 * li + 1][...], w_refs[3 * li + 2][...])
              for li in range(nl)]

    def step(tt, carry):
        a_t = a_ref[0, tt]                  # (Np, Np)
        inp = x_ref[0, tt]                  # (Cin_p, Np), layer-0 input
        for li, co in enumerate(out_features):
            wx, wh, bias = w_vals[li]
            h_sc = state_refs[2 * li]
            c_sc = state_refs[2 * li + 1]
            # z = Wx @ (inp @ A) + Wh @ (h @ A) + b
            agg_in = jnp.dot(inp, a_t, preferred_element_type=jnp.float32)
            agg_h = jnp.dot(h_sc[...], a_t, preferred_element_type=jnp.float32)
            z = (jnp.dot(wx, agg_in, preferred_element_type=jnp.float32)
                 + jnp.dot(wh, agg_h, preferred_element_type=jnp.float32)
                 + bias)                    # (4*co, Np)
            i = _sigmoid_via_tanh(z[0 * co:1 * co])
            f = _sigmoid_via_tanh(z[1 * co:2 * co])
            o = _sigmoid_via_tanh(z[2 * co:3 * co])
            g = jnp.tanh(z[3 * co:4 * co])
            c_n = f * c_sc[...] + i * g
            h_n = o * jnp.tanh(c_n)
            h_sc[...] = h_n
            c_sc[...] = c_n
            inp = h_n                       # feeds the next stacked layer
        hseq_ref[0, tt] = inp.astype(hseq_ref.dtype)
        return carry

    lax.fori_loop(0, t_block, step, 0, unroll=True)

    # Only the final time block's state matters for (h_last, c_last).
    @pl.when(tb == pl.num_programs(1) - 1)
    def _():
        hlast_ref[0] = state_refs[2 * (nl - 1)][...].astype(hlast_ref.dtype)
        clast_ref[0] = state_refs[2 * nl - 1][...].astype(clast_ref.dtype)


# --------------------------------------------------------------------------- #
# GCNLSTM forward (num_layers stacked cells, batch_first semantics,
# return_all_layers=False -> only the last layer is returned).
# --------------------------------------------------------------------------- #
def gcn_lstm_forward(nodes_features, adjacency, params, out_features, *,
                     t_block=8):
    nodes_features = nodes_features.astype(jnp.float32)
    adjacency = adjacency.astype(jnp.float32)
    B, T, Cin, N = nodes_features.shape
    nl = len(out_features)

    Np = _round_up(N, 128)                  # lane-dense node dim
    Cin_p = _round_up(Cin, 8)               # sublane-aligned layer-0 channels

    t_block = max(1, min(t_block, T))
    while T % t_block:                      # largest divisor of T not above t_block
        t_block -= 1
    n_tb = T // t_block

    # Zero-pad node (lane) and layer-0 channel (sublane) dims. Padded rows/cols of
    # A are zero, and the bias is masked on padded lanes, so padded lanes stay 0.
    x_pad = jnp.pad(nodes_features,
                    ((0, 0), (0, 0), (0, Cin_p - Cin), (0, Np - N)))
    a_pad = jnp.pad(adjacency, ((0, 0), (0, 0), (0, Np - N), (0, Np - N)))
    lane_mask = (jnp.arange(Np) < N).astype(jnp.float32)

    in_specs = [
        pl.BlockSpec((1, t_block, Cin_p, Np), lambda b, t: (b, t, 0, 0)),   # x
        pl.BlockSpec((1, t_block, Np, Np), lambda b, t: (b, t, 0, 0)),      # A
    ]
    flat_w = []
    prev_c = Cin_p
    for li, cout in enumerate(out_features):
        wx, wh, b = params[li]
        wx = wx.astype(jnp.float32)
        if li == 0 and Cin_p != Cin:
            wx = jnp.pad(wx, ((0, 0), (0, Cin_p - Cin)))
        wh = wh.astype(jnp.float32)
        b_bcast = b.astype(jnp.float32).reshape(4 * cout, 1) * lane_mask[None, :]
        for arr in (wx, wh, b_bcast):
            flat_w.append(arr)
            in_specs.append(pl.BlockSpec(arr.shape, lambda b_, t_: (0, 0)))
        prev_c = cout

    cl = out_features[-1]
    out_shape = (
        jax.ShapeDtypeStruct((B, T, cl, Np), jnp.float32),     # h sequence (last layer)
        jax.ShapeDtypeStruct((B, cl, Np), jnp.float32),        # h last
        jax.ShapeDtypeStruct((B, cl, Np), jnp.float32),        # c last
    )
    out_specs = (
        pl.BlockSpec((1, t_block, cl, Np), lambda b, t: (b, t, 0, 0)),
        pl.BlockSpec((1, cl, Np), lambda b, t: (b, 0, 0)),
        pl.BlockSpec((1, cl, Np), lambda b, t: (b, 0, 0)),
    )
    scratch_shapes = []
    for cout in out_features:
        scratch_shapes += [pltpu.VMEM((cout, Np), jnp.float32),   # h
                           pltpu.VMEM((cout, Np), jnp.float32)]   # c

    # Rough VMEM budget (double-buffered x/A/hseq blocks + weights + state).
    blk_bytes = 4 * t_block * (Cin_p * Np + Np * Np + cl * Np)
    w_bytes = sum(int(a.size) * 4 for a in flat_w)
    state_bytes = sum(2 * c * Np * 4 for c in out_features)
    needed = 2 * blk_bytes + w_bytes + state_bytes + (2 << 20)
    vmem_limit = None
    if needed > (30 << 20):
        # TODO(synk): for very large N / t_block on v7x (64 MiB VMEM) shrink
        #             t_block instead of raising the limit further.
        vmem_limit = int(min(needed, 56 << 20))

    kernel = functools.partial(_gcn_lstm_fused_kernel,
                               out_features=tuple(out_features),
                               t_block=t_block)

    hseq, hlast, clast = pl.pallas_call(
        kernel,
        out_shape=out_shape,
        grid=(B, n_tb),
        in_specs=in_specs,
        out_specs=out_specs,
        scratch_shapes=scratch_shapes,
        compiler_params=pltpu.CompilerParams(
            dimension_semantics=("parallel", "arbitrary"),
            vmem_limit_bytes=vmem_limit),
    )(x_pad, a_pad, *flat_w)

    layer_output = hseq[..., :N]
    h_last = hlast[..., :N]
    c_last = clast[..., :N]
    # return_all_layers = False
    return [layer_output], [(h_last, c_last)]


# --------------------------------------------------------------------------- #
# Pure-JAX reference (for correctness check).
# --------------------------------------------------------------------------- #
def _ref_cell(x_t, h, c, adj_t, wx, wh, b):
    comb = jnp.concatenate([x_t, h], axis=1)             # (B, Cin+Cout, N)
    agg = jnp.einsum('bcn,bnm->bcm', comb, adj_t,
                     precision=jax.lax.Precision.HIGHEST)
    w = jnp.concatenate([wx, wh], axis=1)
    z = jnp.einsum('oc,bcm->bom', w, agg,
                   precision=jax.lax.Precision.HIGHEST) + b[None]
    co = h.shape[1]
    i = jax.nn.sigmoid(z[:, 0 * co:1 * co])
    f = jax.nn.sigmoid(z[:, 1 * co:2 * co])
    o = jax.nn.sigmoid(z[:, 2 * co:3 * co])
    g = jnp.tanh(z[:, 3 * co:4 * co])
    c_next = f * c + i * g
    h_next = o * jnp.tanh(c_next)
    return h_next, c_next


def _ref_forward(nodes_features, adjacency, params, out_features):
    B, T, _, N = nodes_features.shape
    cur = nodes_features
    outs, lasts = [], []
    for li, cout in enumerate(out_features):
        wx, wh, b = params[li]
        h = jnp.zeros((B, cout, N), jnp.float32)
        c = jnp.zeros((B, cout, N), jnp.float32)
        inner = []
        for t in range(T):
            h, c = _ref_cell(cur[:, t], h, c, adjacency[:, t], wx, wh, b)
            inner.append(h)
        cur = jnp.stack(inner, axis=1)
        outs.append(cur)
        lasts.append((h, c))
    return outs[-1:], lasts[-1:]


# --------------------------------------------------------------------------- #
if __name__ == "__main__":
    key = jax.random.PRNGKey(0)
    B, T, N = 2, 8, 16
    in_feature = 4
    out_features = [8, 8]          # num_layers = 2; Cout multiple of 8 (sublane aligned)

    k_x, k_a, k_p = jax.random.split(key, 3)
    nodes_features = jax.random.normal(k_x, (B, T, in_feature, N), jnp.float32)
    adjacency = jax.random.uniform(k_a, (B, T, N, N), jnp.float32)

    # Deterministic parameter init per layer's GCN: W (4*Cout, Cin+Cout), b (4*Cout, 1)
    params = []
    cur_in = in_feature
    kp = k_p
    for cout in out_features:
        kp, kw, kb = jax.random.split(kp, 3)
        w = 0.1 * jax.random.normal(kw, (4 * cout, cur_in + cout), jnp.float32)
        b = 0.1 * jax.random.normal(kb, (4 * cout, 1), jnp.float32)
        params.append((w[:, :cur_in], w[:, cur_in:], b))
        cur_in = cout

    layer_out_list, last_state_list = gcn_lstm_forward(
        nodes_features, adjacency, params, out_features, t_block=8)
    jax.block_until_ready(layer_out_list[-1])

    # Verify against pure-JAX reference.
    ref_out_list, ref_state_list = _ref_forward(
        nodes_features, adjacency, params, out_features)
    assert jnp.allclose(layer_out_list[-1], ref_out_list[-1], atol=2e-4, rtol=2e-4)
    assert jnp.allclose(last_state_list[-1][0], ref_state_list[-1][0], atol=2e-4, rtol=2e-4)
    assert jnp.allclose(last_state_list[-1][1], ref_state_list[-1][1], atol=2e-4, rtol=2e-4)

    print("KERNEL_OK")
</pallas_src>

<mosaic_0001>
module attributes {stable_mosaic.version = 11 : i64} {
  func.func @_gcn_lstm_fused_kernel(%arg0: i32, %arg1: i32, %arg2: memref<1x8x8x128xf32, #tpu.memory_space<vmem>>, %arg3: memref<1x8x128x128xf32, #tpu.memory_space<vmem>>, %arg4: memref<32x8xf32, #tpu.memory_space<vmem>>, %arg5: memref<32x8xf32, #tpu.memory_space<vmem>>, %arg6: memref<32x128xf32, #tpu.memory_space<vmem>>, %arg7: memref<32x8xf32, #tpu.memory_space<vmem>>, %arg8: memref<32x8xf32, #tpu.memory_space<vmem>>, %arg9: memref<32x128xf32, #tpu.memory_space<vmem>>, %arg10: memref<1x8x8x128xf32, #tpu.memory_space<vmem>>, %arg11: memref<1x8x128xf32, #tpu.memory_space<vmem>>, %arg12: memref<1x8x128xf32, #tpu.memory_space<vmem>>, %arg13: memref<8x128xf32, #tpu.memory_space<vmem>>, %arg14: memref<8x128xf32, #tpu.memory_space<vmem>>, %arg15: memref<8x128xf32, #tpu.memory_space<vmem>>, %arg16: memref<8x128xf32, #tpu.memory_space<vmem>>) attributes {dimension_semantics = [#tpu.dimension_semantics<parallel>, #tpu.dimension_semantics<arbitrary>], iteration_bounds = array<i64: 2, 1>, scalar_prefetch = 0 : i64, scratch_operands = 4 : i64, tpu.core_type = #tpu.core_type<tc>, window_params = [{transform_indices = @transform_0, window_bounds = array<i64: 1, 8, 8, 128>}, {transform_indices = @transform_1, window_bounds = array<i64: 1, 8, 128, 128>}, {pipeline_mode = #tpu.pipeline_mode<synchronous>, transform_indices = @transform_2, window_bounds = array<i64: 32, 8>}, {pipeline_mode = #tpu.pipeline_mode<synchronous>, transform_indices = @transform_3, window_bounds = array<i64: 32, 8>}, {pipeline_mode = #tpu.pipeline_mode<synchronous>, transform_indices = @transform_4, window_bounds = array<i64: 32, 128>}, {pipeline_mode = #tpu.pipeline_mode<synchronous>, transform_indices = @transform_5, window_bounds = array<i64: 32, 8>}, {pipeline_mode = #tpu.pipeline_mode<synchronous>, transform_indices = @transform_6, window_bounds = array<i64: 32, 8>}, {pipeline_mode = #tpu.pipeline_mode<synchronous>, transform_indices = @transform_7, window_bounds = array<i64: 32, 128>}, {transform_indices = @transform_8, window_bounds = array<i64: 1, 8, 8, 128>}, {transform_indices = @transform_9, window_bounds = array<i64: 1, 8, 128>}, {transform_indices = @transform_10, window_bounds = array<i64: 1, 8, 128>}]} {
    %c0_i32 = arith.constant 0 : i32
    %0 = arith.cmpi eq, %arg1, %c0_i32 : i32
    %1 = arith.extui %0 : i1 to i32
    %c0_i32_0 = arith.constant 0 : i32
    %2 = arith.cmpi ne, %1, %c0_i32_0 : i32
    scf.if %2 {
      %cst_422 = arith.constant 0.000000e+00 : f32
      %748 = vector.broadcast %cst_422 : f32 to vector<8x128xf32>
      %c0_423 = arith.constant 0 : index
      %c0_424 = arith.constant 0 : index
      %749 = vector.load %arg13[%c0_423, %c0_424] : memref<8x128xf32, #tpu.memory_space<vmem>>, vector<8x128xf32>
      tpu.vector_store %arg13[%c0_423, %c0_424], %748 {strides = array<i32>} : memref<8x128xf32, #tpu.memory_space<vmem>>, vector<8x128xf32>,
      %cst_425 = arith.constant 0.000000e+00 : f32
      %750 = vector.broadcast %cst_425 : f32 to vector<8x128xf32>
      %c0_426 = arith.constant 0 : index
      %c0_427 = arith.constant 0 : index
      %751 = vector.load %arg14[%c0_426, %c0_427] : memref<8x128xf32, #tpu.memory_space<vmem>>, vector<8x128xf32>
      tpu.vector_store %arg14[%c0_426, %c0_427], %750 {strides = array<i32>} : memref<8x128xf32, #tpu.memory_space<vmem>>, vector<8x128xf32>,
      %cst_428 = arith.constant 0.000000e+00 : f32
      %752 = vector.broadcast %cst_428 : f32 to vector<8x128xf32>
      %c0_429 = arith.constant 0 : index
      %c0_430 = arith.constant 0 : index
      %753 = vector.load %arg15[%c0_429, %c0_430] : memref<8x128xf32, #tpu.memory_space<vmem>>, vector<8x128xf32>
      tpu.vector_store %arg15[%c0_429, %c0_430], %752 {strides = array<i32>} : memref<8x128xf32, #tpu.memory_space<vmem>>, vector<8x128xf32>,
      %cst_431 = arith.constant 0.000000e+00 : f32
      %754 = vector.broadcast %cst_431 : f32 to vector<8x128xf32>
      %c0_432 = arith.constant 0 : index
      %c0_433 = arith.constant 0 : index
      %755 = vector.load %arg16[%c0_432, %c0_433] : memref<8x128xf32, #tpu.memory_space<vmem>>, vector<8x128xf32>
      tpu.vector_store %arg16[%c0_432, %c0_433], %754 {strides = array<i32>} : memref<8x128xf32, #tpu.memory_space<vmem>>, vector<8x128xf32>,
    } else {
    }
    %c0 = arith.constant 0 : index
    %c0_1 = arith.constant 0 : index
    %3 = vector.load %arg4[%c0, %c0_1] : memref<32x8xf32, #tpu.memory_space<vmem>>, vector<32x8xf32>
    %c0_2 = arith.constant 0 : index
    %c0_3 = arith.constant 0 : index
    %4 = vector.load %arg5[%c0_2, %c0_3] : memref<32x8xf32, #tpu.memory_space<vmem>>, vector<32x8xf32>
    %c0_4 = arith.constant 0 : index
    %c0_5 = arith.constant 0 : index
    %5 = vector.load %arg6[%c0_4, %c0_5] : memref<32x128xf32, #tpu.memory_space<vmem>>, vector<32x128xf32>
    %c0_6 = arith.constant 0 : index
    %c0_7 = arith.constant 0 : index
    %6 = vector.load %arg7[%c0_6, %c0_7] : memref<32x8xf32, #tpu.memory_space<vmem>>, vector<32x8xf32>
    %c0_8 = arith.constant 0 : index
    %c0_9 = arith.constant 0 : index
    %7 = vector.load %arg8[%c0_8, %c0_9] : memref<32x8xf32, #tpu.memory_space<vmem>>, vector<32x8xf32>
    %c0_10 = arith.constant 0 : index
    %c0_11 = arith.constant 0 : index
    %8 = vector.load %arg9[%c0_10, %c0_11] : memref<32x128xf32, #tpu.memory_space<vmem>>, vector<32x128xf32>
    %c0_i32_12 = arith.constant 0 : i32
    %c0_13 = arith.constant 0 : index
    %9 = arith.index_cast %c0_i32_12 : i32 to index
    %c0_14 = arith.constant 0 : index
    %c0_15 = arith.constant 0 : index
    %10 = vector.load %arg3[%c0_13, %9, %c0_14, %c0_15] : memref<1x8x128x128xf32, #tpu.memory_space<vmem>>, vector<1x1x128x128xf32>
    %11 = vector.shape_cast %10 : vector<1x1x128x128xf32> to vector<128x128xf32>
    %c0_16 = arith.constant 0 : index
    %12 = arith.index_cast %c0_i32_12 : i32 to index
    %c0_17 = arith.constant 0 : index
    %c0_18 = arith.constant 0 : index
    %13 = vector.load %arg2[%c0_16, %12, %c0_17, %c0_18] : memref<1x8x8x128xf32, #tpu.memory_space<vmem>>, vector<1x1x8x128xf32>
    %14 = vector.shape_cast %13 : vector<1x1x8x128xf32> to vector<8x128xf32>
    %cst = arith.constant dense<0.000000e+00> : vector<8x128xf32>
    %15 = tpu.matmul %14, %11, %cst {dimension_numbers = #tpu.dot_dimension_numbers<[1], [0], [0], [1], [0, 0, 1, 1], [], []>} : vector<8x128xf32>, vector<128x128xf32>, vector<8x128xf32> -> vector<8x128xf32>
    %c0_19 = arith.constant 0 : index
    %c0_20 = arith.constant 0 : index
    %16 = vector.load %arg13[%c0_19, %c0_20] : memref<8x128xf32, #tpu.memory_space<vmem>>, vector<8x128xf32>
    %cst_21 = arith.constant dense<0.000000e+00> : vector<8x128xf32>
    %17 = tpu.matmul %16, %11, %cst_21 {dimension_numbers = #tpu.dot_dimension_numbers<[1], [0], [0], [1], [0, 0, 1, 1], [], []>} : vector<8x128xf32>, vector<128x128xf32>, vector<8x128xf32> -> vector<8x128xf32>
    %cst_22 = arith.constant dense<0.000000e+00> : vector<32x128xf32>
    %18 = tpu.matmul %3, %15, %cst_22 {dimension_numbers = #tpu.dot_dimension_numbers<[1], [0], [0], [1], [0, 0, 1, 1], [], []>} : vector<32x8xf32>, vector<8x128xf32>, vector<32x128xf32> -> vector<32x128xf32>
    %cst_23 = arith.constant dense<0.000000e+00> : vector<32x128xf32>
    %19 = tpu.matmul %4, %17, %cst_23 {dimension_numbers = #tpu.dot_dimension_numbers<[1], [0], [0], [1], [0, 0, 1, 1], [], []>} : vector<32x8xf32>, vector<8x128xf32>, vector<32x128xf32> -> vector<32x128xf32>
    %20 = arith.addf %18, %19 : vector<32x128xf32>
    %21 = arith.addf %20, %5 : vector<32x128xf32>
    %22 = vector.extract_strided_slice %21 {offsets = [0, 0], sizes = [8, 128], strides = [1, 1]} : vector<32x128xf32> to vector<8x128xf32>
    %cst_24 = arith.constant 5.000000e-01 : f32
    %23 = vector.broadcast %cst_24 : f32 to vector<8x128xf32>
    %24 = arith.mulf %23, %22 : vector<8x128xf32>
    %25 = math.tanh %24 : vector<8x128xf32>
    %cst_25 = arith.constant 1.000000e+00 : f32
    %26 = vector.broadcast %cst_25 : f32 to vector<8x128xf32>
    %27 = arith.addf %25, %26 : vector<8x128xf32>
    %cst_26 = arith.constant 5.000000e-01 : f32
    %28 = vector.broadcast %cst_26 : f32 to vector<8x128xf32>
    %29 = arith.mulf %28, %27 : vector<8x128xf32>
    %30 = vector.extract_strided_slice %21 {offsets = [8, 0], sizes = [8, 128], strides = [1, 1]} : vector<32x128xf32> to vector<8x128xf32>
    %cst_27 = arith.constant 5.000000e-01 : f32
    %31 = vector.broadcast %cst_27 : f32 to vector<8x128xf32>
    %32 = arith.mulf %31, %30 : vector<8x128xf32>
    %33 = math.tanh %32 : vector<8x128xf32>
    %cst_28 = arith.constant 1.000000e+00 : f32
    %34 = vector.broadcast %cst_28 : f32 to vector<8x128xf32>
    %35 = arith.addf %33, %34 : vector<8x128xf32>
    %cst_29 = arith.constant 5.000000e-01 : f32
    %36 = vector.broadcast %cst_29 : f32 to vector<8x128xf32>
    %37 = arith.mulf %36, %35 : vector<8x128xf32>
    %38 = vector.extract_strided_slice %21 {offsets = [16, 0], sizes = [8, 128], strides = [1, 1]} : vector<32x128xf32> to vector<8x128xf32>
    %cst_30 = arith.constant 5.000000e-01 : f32
    %39 = vector.broadcast %cst_30 : f32 to vector<8x128xf32>
    %40 = arith.mulf %39, %38 : vector<8x128xf32>
    %41 = math.tanh %40 : vector<8x128xf32>
    %cst_31 = arith.constant 1.000000e+00 : f32
    %42 = vector.broadcast %cst_31 : f32 to vector<8x128xf32>
    %43 = arith.addf %41, %42 : vector<8x128xf32>
    %cst_32 = arith.constant 5.000000e-01 : f32
    %44 = vector.broadcast %cst_32 : f32 to vector<8x128xf32>
    %45 = arith.mulf %44, %43 : vector<8x128xf32>
    %46 = vector.extract_strided_slice %21 {offsets = [24, 0], sizes = [8, 128], strides = [1, 1]} : vector<32x128xf32> to vector<8x128xf32>
    %47 = math.tanh %46 : vector<8x128xf32>
    %c0_33 = arith.constant 0 : index
    %c0_34 = arith.constant 0 : index
    %48 = vector.load %arg14[%c0_33, %c0_34] : memref<8x128xf32, #tpu.memory_space<vmem>>, vector<8x128xf32>
    %49 = arith.mulf %37, %48 : vector<8x128xf32>
    %50 = arith.mulf %29, %47 : vector<8x128xf32>
    %51 = arith.addf %49, %50 : vector<8x128xf32>
    %52 = math.tanh %51 : vector<8x128xf32>
    %53 = arith.mulf %45, %52 : vector<8x128xf32>
    %c0_35 = arith.constant 0 : index
    %c0_36 = arith.constant 0 : index
    %54 = vector.load %arg13[%c0_35, %c0_36] : memref<8x128xf32, #tpu.memory_space<vmem>>, vector<8x128xf32>
    tpu.vector_store %arg13[%c0_35, %c0_36], %53 {strides = array<i32>} : memref<8x128xf32, #tpu.memory_space<vmem>>, vector<8x128xf32>,
    %c0_37 = arith.constant 0 : index
    %c0_38 = arith.constant 0 : index
    %55 = vector.load %arg14[%c0_37, %c0_38] : memref<8x128xf32, #tpu.memory_space<vmem>>, vector<8x128xf32>
    tpu.vector_store %arg14[%c0_37, %c0_38], %51 {strides = array<i32>} : memref<8x128xf32, #tpu.memory_space<vmem>>, vector<8x128xf32>,
    %cst_39 = arith.constant dense<0.000000e+00> : vector<8x128xf32>
    %56 = tpu.matmul %53, %11, %cst_39 {dimension_numbers = #tpu.dot_dimension_numbers<[1], [0], [0], [1], [0, 0, 1, 1], [], []>} : vector<8x128xf32>, vector<128x128xf32>, vector<8x128xf32> -> vector<8x128xf32>
    %c0_40 = arith.constant 0 : index
    %c0_41 = arith.constant 0 : index
    %57 = vector.load %arg15[%c0_40, %c0_41] : memref<8x128xf32, #tpu.memory_space<vmem>>, vector<8x128xf32>
    %cst_42 = arith.constant dense<0.000000e+00> : vector<8x128xf32>
    %58 = tpu.matmul %57, %11, %cst_42 {dimension_numbers = #tpu.dot_dimension_numbers<[1], [0], [0], [1], [0, 0, 1, 1], [], []>} : vector<8x128xf32>, vector<128x128xf32>, vector<8x128xf32> -> vector<8x128xf32>
    %cst_43 = arith.constant dense<0.000000e+00> : vector<32x128xf32>
    %59 = tpu.matmul %6, %56, %cst_43 {dimension_numbers = #tpu.dot_dimension_numbers<[1], [0], [0], [1], [0, 0, 1, 1], [], []>} : vector<32x8xf32>, vector<8x128xf32>, vector<32x128xf32> -> vector<32x128xf32>
    %cst_44 = arith.constant dense<0.000000e+00> : vector<32x128xf32>
    %60 = tpu.matmul %7, %58, %cst_44 {dimension_numbers = #tpu.dot_dimension_numbers<[1], [0], [0], [1], [0, 0, 1, 1], [], []>} : vector<32x8xf32>, vector<8x128xf32>, vector<32x128xf32> -> vector<32x128xf32>
    %61 = arith.addf %59, %60 : vector<32x128xf32>
    %62 = arith.addf %61, %8 : vector<32x128xf32>
    %63 = vector.extract_strided_slice %62 {offsets = [0, 0], sizes = [8, 128], strides = [1, 1]} : vector<32x128xf32> to vector<8x128xf32>
    %cst_45 = arith.constant 5.000000e-01 : f32
    %64 = vector.broadcast %cst_45 : f32 to vector<8x128xf32>
    %65 = arith.mulf %64, %63 : vector<8x128xf32>
    %66 = math.tanh %65 : vector<8x128xf32>
    %cst_46 = arith.constant 1.000000e+00 : f32
    %67 = vector.broadcast %cst_46 : f32 to vector<8x128xf32>
    %68 = arith.addf %66, %67 : vector<8x128xf32>
    %cst_47 = arith.constant 5.000000e-01 : f32
    %69 = vector.broadcast %cst_47 : f32 to vector<8x128xf32>
    %70 = arith.mulf %69, %68 : vector<8x128xf32>
    %71 = vector.extract_strided_slice %62 {offsets = [8, 0], sizes = [8, 128], strides = [1, 1]} : vector<32x128xf32> to vector<8x128xf32>
    %cst_48 = arith.constant 5.000000e-01 : f32
    %72 = vector.broadcast %cst_48 : f32 to vector<8x128xf32>
    %73 = arith.mulf %72, %71 : vector<8x128xf32>
    %74 = math.tanh %73 : vector<8x128xf32>
    %cst_49 = arith.constant 1.000000e+00 : f32
    %75 = vector.broadcast %cst_49 : f32 to vector<8x128xf32>
    %76 = arith.addf %74, %75 : vector<8x128xf32>
    %cst_50 = arith.constant 5.000000e-01 : f32
    %77 = vector.broadcast %cst_50 : f32 to vector<8x128xf32>
    %78 = arith.mulf %77, %76 : vector<8x128xf32>
    %79 = vector.extract_strided_slice %62 {offsets = [16, 0], sizes = [8, 128], strides = [1, 1]} : vector<32x128xf32> to vector<8x128xf32>
    %cst_51 = arith.constant 5.000000e-01 : f32
    %80 = vector.broadcast %cst_51 : f32 to vector<8x128xf32>
    %81 = arith.mulf %80, %79 : vector<8x128xf32>
    %82 = math.tanh %81 : vector<8x128xf32>
    %cst_52 = arith.constant 1.000000e+00 : f32
    %83 = vector.broadcast %cst_52 : f32 to vector<8x128xf32>
    %84 = arith.addf %82, %83 : vector<8x128xf32>
    %cst_53 = arith.constant 5.000000e-01 : f32
    %85 = vector.broadcast %cst_53 : f32 to vector<8x128xf32>
    %86 = arith.mulf %85, %84 : vector<8x128xf32>
    %87 = vector.extract_strided_slice %62 {offsets = [24, 0], sizes = [8, 128], strides = [1, 1]} : vector<32x128xf32> to vector<8x128xf32>
    %88 = math.tanh %87 : vector<8x128xf32>
    %c0_54 = arith.constant 0 : index
    %c0_55 = arith.constant 0 : index
    %89 = vector.load %arg16[%c0_54, %c0_55] : memref<8x128xf32, #tpu.memory_space<vmem>>, vector<8x128xf32>
    %90 = arith.mulf %78, %89 : vector<8x128xf32>
    %91 = arith.mulf %70, %88 : vector<8x128xf32>
    %92 = arith.addf %90, %91 : vector<8x128xf32>
    %93 = math.tanh %92 : vector<8x128xf32>
    %94 = arith.mulf %86, %93 : vector<8x128xf32>
    %c0_56 = arith.constant 0 : index
    %c0_57 = arith.constant 0 : index
    %95 = vector.load %arg15[%c0_56, %c0_57] : memref<8x128xf32, #tpu.memory_space<vmem>>, vector<8x128xf32>
    tpu.vector_store %arg15[%c0_56, %c0_57], %94 {strides = array<i32>} : memref<8x128xf32, #tpu.memory_space<vmem>>, vector<8x128xf32>,
    %c0_58 = arith.constant 0 : index
    %c0_59 = arith.constant 0 : index
    %96 = vector.load %arg16[%c0_58, %c0_59] : memref<8x128xf32, #tpu.memory_space<vmem>>, vector<8x128xf32>
    tpu.vector_store %arg16[%c0_58, %c0_59], %92 {strides = array<i32>} : memref<8x128xf32, #tpu.memory_space<vmem>>, vector<8x128xf32>,
    %c0_60 = arith.constant 0 : index
    %97 = arith.index_cast %c0_i32_12 : i32 to index
    %c0_61 = arith.constant 0 : index
    %c0_62 = arith.constant 0 : index
    %98 = vector.load %arg10[%c0_60, %97, %c0_61, %c0_62] : memref<1x8x8x128xf32, #tpu.memory_space<vmem>>, vector<1x1x8x128xf32>
    %99 = vector.shape_cast %98 : vector<1x1x8x128xf32> to vector<8x128xf32>
    %100 = vector.shape_cast %94 : vector<8x128xf32> to vector<1x1x8x128xf32>
    tpu.vector_store %arg10[%c0_60, %97, %c0_61, %c0_62], %100 {strides = array<i32>} : memref<1x8x8x128xf32, #tpu.memory_space<vmem>>, vector<1x1x8x128xf32>,
    %c1_i32 = arith.constant 1 : i32
    %c0_63 = arith.constant 0 : index
    %101 = arith.index_cast %c1_i32 : i32 to index
    %c0_64 = arith.constant 0 : index
    %c0_65 = arith.constant 0 : index
    %102 = vector.load %arg3[%c0_63, %101, %c0_64, %c0_65] : memref<1x8x128x128xf32, #tpu.memory_space<vmem>>, vector<1x1x128x128xf32>
    %103 = vector.shape_cast %102 : vector<1x1x128x128xf32> to vector<128x128xf32>
    %c0_66 = arith.constant 0 : index
    %104 = arith.index_cast %c1_i32 : i32 to index
    %c0_67 = arith.constant 0 : index
    %c0_68 = arith.constant 0 : index
    %105 = vector.load %arg2[%c0_66, %104, %c0_67, %c0_68] : memref<1x8x8x128xf32, #tpu.memory_space<vmem>>, vector<1x1x8x128xf32>
    %106 = vector.shape_cast %105 : vector<1x1x8x128xf32> to vector<8x128xf32>
    %cst_69 = arith.constant dense<0.000000e+00> : vector<8x128xf32>
    %107 = tpu.matmul %106, %103, %cst_69 {dimension_numbers = #tpu.dot_dimension_numbers<[1], [0], [0], [1], [0, 0, 1, 1], [], []>} : vector<8x128xf32>, vector<128x128xf32>, vector<8x128xf32> -> vector<8x128xf32>
    %c0_70 = arith.constant 0 : index
    %c0_71 = arith.constant 0 : index
    %108 = vector.load %arg13[%c0_70, %c0_71] : memref<8x128xf32, #tpu.memory_space<vmem>>, vector<8x128xf32>
    %cst_72 = arith.constant dense<0.000000e+00> : vector<8x128xf32>
    %109 = tpu.matmul %108, %103, %cst_72 {dimension_numbers = #tpu.dot_dimension_numbers<[1], [0], [0], [1], [0, 0, 1, 1], [], []>} : vector<8x128xf32>, vector<128x128xf32>, vector<8x128xf32> -> vector<8x128xf32>
    %cst_73 = arith.constant dense<0.000000e+00> : vector<32x128xf32>
    %110 = tpu.matmul %3, %107, %cst_73 {dimension_numbers = #tpu.dot_dimension_numbers<[1], [0], [0], [1], [0, 0, 1, 1], [], []>} : vector<32x8xf32>, vector<8x128xf32>, vector<32x128xf32> -> vector<32x128xf32>
    %cst_74 = arith.constant dense<0.000000e+00> : vector<32x128xf32>
    %111 = tpu.matmul %4, %109, %cst_74 {dimension_numbers = #tpu.dot_dimension_numbers<[1], [0], [0], [1], [0, 0, 1, 1], [], []>} : vector<32x8xf32>, vector<8x128xf32>, vector<32x128xf32> -> vector<32x128xf32>
    %112 = arith.addf %110, %111 : vector<32x128xf32>
    %113 = arith.addf %112, %5 : vector<32x128xf32>
    %114 = vector.extract_strided_slice %113 {offsets = [0, 0], sizes = [8, 128], strides = [1, 1]} : vector<32x128xf32> to vector<8x128xf32>
    %cst_75 = arith.constant 5.000000e-01 : f32
    %115 = vector.broadcast %cst_75 : f32 to vector<8x128xf32>
    %116 = arith.mulf %115, %114 : vector<8x128xf32>
    %117 = math.tanh %116 : vector<8x128xf32>
    %cst_76 = arith.constant 1.000000e+00 : f32
    %118 = vector.broadcast %cst_76 : f32 to vector<8x128xf32>
    %119 = arith.addf %117, %118 : vector<8x128xf32>
    %cst_77 = arith.constant 5.000000e-01 : f32
    %120 = vector.broadcast %cst_77 : f32 to vector<8x128xf32>
    %121 = arith.mulf %120, %119 : vector<8x128xf32>
    %122 = vector.extract_strided_slice %113 {offsets = [8, 0], sizes = [8, 128], strides = [1, 1]} : vector<32x128xf32> to vector<8x128xf32>
    %cst_78 = arith.constant 5.000000e-01 : f32
    %123 = vector.broadcast %cst_78 : f32 to vector<8x128xf32>
    %124 = arith.mulf %123, %122 : vector<8x128xf32>
    %125 = math.tanh %124 : vector<8x128xf32>
    %cst_79 = arith.constant 1.000000e+00 : f32
    %126 = vector.broadcast %cst_79 : f32 to vector<8x128xf32>
    %127 = arith.addf %125, %126 : vector<8x128xf32>
    %cst_80 = arith.constant 5.000000e-01 : f32
    %128 = vector.broadcast %cst_80 : f32 to vector<8x128xf32>
    %129 = arith.mulf %128, %127 : vector<8x128xf32>
    %130 = vector.extract_strided_slice %113 {offsets = [16, 0], sizes = [8, 128], strides = [1, 1]} : vector<32x128xf32> to vector<8x128xf32>
    %cst_81 = arith.constant 5.000000e-01 : f32
    %131 = vector.broadcast %cst_81 : f32 to vector<8x128xf32>
    %132 = arith.mulf %131, %130 : vector<8x128xf32>
    %133 = math.tanh %132 : vector<8x128xf32>
    %cst_82 = arith.constant 1.000000e+00 : f32
    %134 = vector.broadcast %cst_82 : f32 to vector<8x128xf32>
    %135 = arith.addf %133, %134 : vector<8x128xf32>
    %cst_83 = arith.constant 5.000000e-01 : f32
    %136 = vector.broadcast %cst_83 : f32 to vector<8x128xf32>
    %137 = arith.mulf %136, %135 : vector<8x128xf32>
    %138 = vector.extract_strided_slice %113 {offsets = [24, 0], sizes = [8, 128], strides = [1, 1]} : vector<32x128xf32> to vector<8x128xf32>
    %139 = math.tanh %138 : vector<8x128xf32>
    %c0_84 = arith.constant 0 : index
    %c0_85 = arith.constant 0 : index
    %140 = vector.load %arg14[%c0_84, %c0_85] : memref<8x128xf32, #tpu.memory_space<vmem>>, vector<8x128xf32>
    %141 = arith.mulf %129, %140 : vector<8x128xf32>
    %142 = arith.mulf %121, %139 : vector<8x128xf32>
    %143 = arith.addf %141, %142 : vector<8x128xf32>
    %144 = math.tanh %143 : vector<8x128xf32>
    %145 = arith.mulf %137, %144 : vector<8x128xf32>
    %c0_86 = arith.constant 0 : index
    %c0_87 = arith.constant 0 : index
    %146 = vector.load %arg13[%c0_86, %c0_87] : memref<8x128xf32, #tpu.memory_space<vmem>>, vector<8x128xf32>
    tpu.vector_store %arg13[%c0_86, %c0_87], %145 {strides = array<i32>} : memref<8x128xf32, #tpu.memory_space<vmem>>, vector<8x128xf32>,
    %c0_88 = arith.constant 0 : index
    %c0_89 = arith.constant 0 : index
    %147 = vector.load %arg14[%c0_88, %c0_89] : memref<8x128xf32, #tpu.memory_space<vmem>>, vector<8x128xf32>
    tpu.vector_store %arg14[%c0_88, %c0_89], %143 {strides = array<i32>} : memref<8x128xf32, #tpu.memory_space<vmem>>, vector<8x128xf32>,
    %cst_90 = arith.constant dense<0.000000e+00> : vector<8x128xf32>
    %148 = tpu.matmul %145, %103, %cst_90 {dimension_numbers = #tpu.dot_dimension_numbers<[1], [0], [0], [1], [0, 0, 1, 1], [], []>} : vector<8x128xf32>, vector<128x128xf32>, vector<8x128xf32> -> vector<8x128xf32>
    %c0_91 = arith.constant 0 : index
    %c0_92 = arith.constant 0 : index
    %149 = vector.load %arg15[%c0_91, %c0_92] : memref<8x128xf32, #tpu.memory_space<vmem>>, vector<8x128xf32>
    %cst_93 = arith.constant dense<0.000000e+00> : vector<8x128xf32>
    %150 = tpu.matmul %149, %103, %cst_93 {dimension_numbers = #tpu.dot_dimension_numbers<[1], [0], [0], [1], [0, 0, 1, 1], [], []>} : vector<8x128xf32>, vector<128x128xf32>, vector<8x128xf32> -> vector<8x128xf32>
    %cst_94 = arith.constant dense<0.000000e+00> : vector<32x128xf32>
    %151 = tpu.matmul %6, %148, %cst_94 {dimension_numbers = #tpu.dot_dimension_numbers<[1], [0], [0], [1], [0, 0, 1, 1], [], []>} : vector<32x8xf32>, vector<8x128xf32>, vector<32x128xf32> -> vector<32x128xf32>
    %cst_95 = arith.constant dense<0.000000e+00> : vector<32x128xf32>
    %152 = tpu.matmul %7, %150, %cst_95 {dimension_numbers = #tpu.dot_dimension_numbers<[1], [0], [0], [1], [0, 0, 1, 1], [], []>} : vector<32x8xf32>, vector<8x128xf32>, vector<32x128xf32> -> vector<32x128xf32>
    %153 = arith.addf %151, %152 : vector<32x128xf32>
    %154 = arith.addf %153, %8 : vector<32x128xf32>
    %155 = vector.extract_strided_slice %154 {offsets = [0, 0], sizes = [8, 128], strides = [1, 1]} : vector<32x128xf32> to vector<8x128xf32>
    %cst_96 = arith.constant 5.000000e-01 : f32
    %156 = vector.broadcast %cst_96 : f32 to vector<8x128xf32>
    %157 = arith.mulf %156, %155 : vector<8x128xf32>
    %158 = math.tanh %157 : vector<8x128xf32>
    %cst_97 = arith.constant 1.000000e+00 : f32
    %159 = vector.broadcast %cst_97 : f32 to vector<8x128xf32>
    %160 = arith.addf %158, %159 : vector<8x128xf32>
    %cst_98 = arith.constant 5.000000e-01 : f32
    %161 = vector.broadcast %cst_98 : f32 to vector<8x128xf32>
    %162 = arith.mulf %161, %160 : vector<8x128xf32>
    %163 = vector.extract_strided_slice %154 {offsets = [8, 0], sizes = [8, 128], strides = [1, 1]} : vector<32x128xf32> to vector<8x128xf32>
    %cst_99 = arith.constant 5.000000e-01 : f32
    %164 = vector.broadcast %cst_99 : f32 to vector<8x128xf32>
    %165 = arith.mulf %164, %163 : vector<8x128xf32>
    %166 = math.tanh %165 : vector<8x128xf32>
    %cst_100 = arith.constant 1.000000e+00 : f32
    %167 = vector.broadcast %cst_100 : f32 to vector<8x128xf32>
    %168 = arith.addf %166, %167 : vector<8x128xf32>
    %cst_101 = arith.constant 5.000000e-01 : f32
    %169 = vector.broadcast %cst_101 : f32 to vector<8x128xf32>
    %170 = arith.mulf %169, %168 : vector<8x128xf32>
    %171 = vector.extract_strided_slice %154 {offsets = [16, 0], sizes = [8, 128], strides = [1, 1]} : vector<32x128xf32> to vector<8x128xf32>
    %cst_102 = arith.constant 5.000000e-01 : f32
    %172 = vector.broadcast %cst_102 : f32 to vector<8x128xf32>
    %173 = arith.mulf %172, %171 : vector<8x128xf32>
    %174 = math.tanh %173 : vector<8x128xf32>
    %cst_103 = arith.constant 1.000000e+00 : f32
    %175 = vector.broadcast %cst_103 : f32 to vector<8x128xf32>
    %176 = arith.addf %174, %175 : vector<8x128xf32>
    %cst_104 = arith.constant 5.000000e-01 : f32
    %177 = vector.broadcast %cst_104 : f32 to vector<8x128xf32>
    %178 = arith.mulf %177, %176 : vector<8x128xf32>
    %179 = vector.extract_strided_slice %154 {offsets = [24, 0], sizes = [8, 128], strides = [1, 1]} : vector<32x128xf32> to vector<8x128xf32>
    %180 = math.tanh %179 : vector<8x128xf32>
    %c0_105 = arith.constant 0 : index
    %c0_106 = arith.constant 0 : index
    %181 = vector.load %arg16[%c0_105, %c0_106] : memref<8x128xf32, #tpu.memory_space<vmem>>, vector<8x128xf32>
    %182 = arith.mulf %170, %181 : vector<8x128xf32>
    %183 = arith.mulf %162, %180 : vector<8x128xf32>
    %184 = arith.addf %182, %183 : vector<8x128xf32>
    %185 = math.tanh %184 : vector<8x128xf32>
    %186 = arith.mulf %178, %185 : vector<8x128xf32>
    %c0_107 = arith.constant 0 : index
    %c0_108 = arith.constant 0 : index
    %187 = vector.load %arg15[%c0_107, %c0_108] : memref<8x128xf32, #tpu.memory_space<vmem>>, vector<8x128xf32>
    tpu.vector_store %arg15[%c0_107, %c0_108], %186 {strides = array<i32>} : memref<8x128xf32, #tpu.memory_space<vmem>>, vector<8x128xf32>,
    %c0_109 = arith.constant 0 : index
    %c0_110 = arith.constant 0 : index
    %188 = vector.load %arg16[%c0_109, %c0_110] : memref<8x128xf32, #tpu.memory_space<vmem>>, vector<8x128xf32>
    tpu.vector_store %arg16[%c0_109, %c0_110], %184 {strides = array<i32>} : memref<8x128xf32, #tpu.memory_space<vmem>>, vector<8x128xf32>,
    %c0_111 = arith.constant 0 : index
    %189 = arith.index_cast %c1_i32 : i32 to index
    %c0_112 = arith.constant 0 : index
    %c0_113 = arith.constant 0 : index
    %190 = vector.load %arg10[%c0_111, %189, %c0_112, %c0_113] : memref<1x8x8x128xf32, #tpu.memory_space<vmem>>, vector<1x1x8x128xf32>
    %191 = vector.shape_cast %190 : vector<1x1x8x128xf32> to vector<8x128xf32>
    %192 = vector.shape_cast %186 : vector<8x128xf32> to vector<1x1x8x128xf32>
    tpu.vector_store %arg10[%c0_111, %189, %c0_112, %c0_113], %192 {strides = array<i32>} : memref<1x8x8x128xf32, #tpu.memory_space<vmem>>, vector<1x1x8x128xf32>,
    %c2_i32 = arith.constant 2 : i32
    %c0_114 = arith.constant 0 : index
    %193 = arith.index_cast %c2_i32 : i32 to index
    %c0_115 = arith.constant 0 : index
    %c0_116 = arith.constant 0 : index
    %194 = vector.load %arg3[%c0_114, %193, %c0_115, %c0_116] : memref<1x8x128x128xf32, #tpu.memory_space<vmem>>, vector<1x1x128x128xf32>
    %195 = vector.shape_cast %194 : vector<1x1x128x128xf32> to vector<128x128xf32>
    %c0_117 = arith.constant 0 : index
    %196 = arith.index_cast %c2_i32 : i32 to index
    %c0_118 = arith.constant 0 : index
    %c0_119 = arith.constant 0 : index
    %197 = vector.load %arg2[%c0_117, %196, %c0_118, %c0_119] : memref<1x8x8x128xf32, #tpu.memory_space<vmem>>, vector<1x1x8x128xf32>
    %198 = vector.shape_cast %197 : vector<1x1x8x128xf32> to vector<8x128xf32>
    %cst_120 = arith.constant dense<0.000000e+00> : vector<8x128xf32>
    %199 = tpu.matmul %198, %195, %cst_120 {dimension_numbers = #tpu.dot_dimension_numbers<[1], [0], [0], [1], [0, 0, 1, 1], [], []>} : vector<8x128xf32>, vector<128x128xf32>, vector<8x128xf32> -> vector<8x128xf32>
    %c0_121 = arith.constant 0 : index
    %c0_122 = arith.constant 0 : index
    %200 = vector.load %arg13[%c0_121, %c0_122] : memref<8x128xf32, #tpu.memory_space<vmem>>, vector<8x128xf32>
    %cst_123 = arith.constant dense<0.000000e+00> : vector<8x128xf32>
    %201 = tpu.matmul %200, %195, %cst_123 {dimension_numbers = #tpu.dot_dimension_numbers<[1], [0], [0], [1], [0, 0, 1, 1], [], []>} : vector<8x128xf32>, vector<128x128xf32>, vector<8x128xf32> -> vector<8x128xf32>
    %cst_124 = arith.constant dense<0.000000e+00> : vector<32x128xf32>
    %202 = tpu.matmul %3, %199, %cst_124 {dimension_numbers = #tpu.dot_dimension_numbers<[1], [0], [0], [1], [0, 0, 1, 1], [], []>} : vector<32x8xf32>, vector<8x128xf32>, vector<32x128xf32> -> vector<32x128xf32>
    %cst_125 = arith.constant dense<0.000000e+00> : vector<32x128xf32>
    %203 = tpu.matmul %4, %201, %cst_125 {dimension_numbers = #tpu.dot_dimension_numbers<[1], [0], [0], [1], [0, 0, 1, 1], [], []>} : vector<32x8xf32>, vector<8x128xf32>, vector<32x128xf32> -> vector<32x128xf32>
    %204 = arith.addf %202, %203 : vector<32x128xf32>
    %205 = arith.addf %204, %5 : vector<32x128xf32>
    %206 = vector.extract_strided_slice %205 {offsets = [0, 0], sizes = [8, 128], strides = [1, 1]} : vector<32x128xf32> to vector<8x128xf32>
    %cst_126 = arith.constant 5.000000e-01 : f32
    %207 = vector.broadcast %cst_126 : f32 to vector<8x128xf32>
    %208 = arith.mulf %207, %206 : vector<8x128xf32>
    %209 = math.tanh %208 : vector<8x128xf32>
    %cst_127 = arith.constant 1.000000e+00 : f32
    %210 = vector.broadcast %cst_127 : f32 to vector<8x128xf32>
    %211 = arith.addf %209, %210 : vector<8x128xf32>
    %cst_128 = arith.constant 5.000000e-01 : f32
    %212 = vector.broadcast %cst_128 : f32 to vector<8x128xf32>
    %213 = arith.mulf %212, %211 : vector<8x128xf32>
    %214 = vector.extract_strided_slice %205 {offsets = [8, 0], sizes = [8, 128], strides = [1, 1]} : vector<32x128xf32> to vector<8x128xf32>
    %cst_129 = arith.constant 5.000000e-01 : f32
    %215 = vector.broadcast %cst_129 : f32 to vector<8x128xf32>
    %216 = arith.mulf %215, %214 : vector<8x128xf32>
    %217 = math.tanh %216 : vector<8x128xf32>
    %cst_130 = arith.constant 1.000000e+00 : f32
    %218 = vector.broadcast %cst_130 : f32 to vector<8x128xf32>
    %219 = arith.addf %217, %218 : vector<8x128xf32>
    %cst_131 = arith.constant 5.000000e-01 : f32
    %220 = vector.broadcast %cst_131 : f32 to vector<8x128xf32>
    %221 = arith.mulf %220, %219 : vector<8x128xf32>
    %222 = vector.extract_strided_slice %205 {offsets = [16, 0], sizes = [8, 128], strides = [1, 1]} : vector<32x128xf32> to vector<8x128xf32>
    %cst_132 = arith.constant 5.000000e-01 : f32
    %223 = vector.broadcast %cst_132 : f32 to vector<8x128xf32>
    %224 = arith.mulf %223, %222 : vector<8x128xf32>
    %225 = math.tanh %224 : vector<8x128xf32>
    %cst_133 = arith.constant 1.000000e+00 : f32
    %226 = vector.broadcast %cst_133 : f32 to vector<8x128xf32>
    %227 = arith.addf %225, %226 : vector<8x128xf32>
    %cst_134 = arith.constant 5.000000e-01 : f32
    %228 = vector.broadcast %cst_134 : f32 to vector<8x128xf32>
    %229 = arith.mulf %228, %227 : vector<8x128xf32>
    %230 = vector.extract_strided_slice %205 {offsets = [24, 0], sizes = [8, 128], strides = [1, 1]} : vector<32x128xf32> to vector<8x128xf32>
    %231 = math.tanh %230 : vector<8x128xf32>
    %c0_135 = arith.constant 0 : index
    %c0_136 = arith.constant 0 : index
    %232 = vector.load %arg14[%c0_135, %c0_136] : memref<8x128xf32, #tpu.memory_space<vmem>>, vector<8x128xf32>
    %233 = arith.mulf %221, %232 : vector<8x128xf32>
    %234 = arith.mulf %213, %231 : vector<8x128xf32>
    %235 = arith.addf %233, %234 : vector<8x128xf32>
    %236 = math.tanh %235 : vector<8x128xf32>
    %237 = arith.mulf %229, %236 : vector<8x128xf32>
    %c0_137 = arith.constant 0 : index
    %c0_138 = arith.constant 0 : index
    %238 = vector.load %arg13[%c0_137, %c0_138] : memref<8x128xf32, #tpu.memory_space<vmem>>, vector<8x128xf32>
    tpu.vector_store %arg13[%c0_137, %c0_138], %237 {strides = array<i32>} : memref<8x128xf32, #tpu.memory_space<vmem>>, vector<8x128xf32>,
    %c0_139 = arith.constant 0 : index
    %c0_140 = arith.constant 0 : index
    %239 = vector.load %arg14[%c0_139, %c0_140] : memref<8x128xf32, #tpu.memory_space<vmem>>, vector<8x128xf32>
    tpu.vector_store %arg14[%c0_139, %c0_140], %235 {strides = array<i32>} : memref<8x128xf32, #tpu.memory_space<vmem>>, vector<8x128xf32>,
    %cst_141 = arith.constant dense<0.000000e+00> : vector<8x128xf32>
    %240 = tpu.matmul %237, %195, %cst_141 {dimension_numbers = #tpu.dot_dimension_numbers<[1], [0], [0], [1], [0, 0, 1, 1], [], []>} : vector<8x128xf32>, vector<128x128xf32>, vector<8x128xf32> -> vector<8x128xf32>
    %c0_142 = arith.constant 0 : index
    %c0_143 = arith.constant 0 : index
    %241 = vector.load %arg15[%c0_142, %c0_143] : memref<8x128xf32, #tpu.memory_space<vmem>>, vector<8x128xf32>
    %cst_144 = arith.constant dense<0.000000e+00> : vector<8x128xf32>
    %242 = tpu.matmul %241, %195, %cst_144 {dimension_numbers = #tpu.dot_dimension_numbers<[1], [0], [0], [1], [0, 0, 1, 1], [], []>} : vector<8x128xf32>, vector<128x128xf32>, vector<8x128xf32> -> vector<8x128xf32>
    %cst_145 = arith.constant dense<0.000000e+00> : vector<32x128xf32>
    %243 = tpu.matmul %6, %240, %cst_145 {dimension_numbers = #tpu.dot_dimension_numbers<[1], [0], [0], [1], [0, 0, 1, 1], [], []>} : vector<32x8xf32>, vector<8x128xf32>, vector<32x128xf32> -> vector<32x128xf32>
    %cst_146 = arith.constant dense<0.000000e+00> : vector<32x128xf32>
    %244 = tpu.matmul %7, %242, %cst_146 {dimension_numbers = #tpu.dot_dimension_numbers<[1], [0], [0], [1], [0, 0, 1, 1], [], []>} : vector<32x8xf32>, vector<8x128xf32>, vector<32x128xf32> -> vector<32x128xf32>
    %245 = arith.addf %243, %244 : vector<32x128xf32>
    %246 = arith.addf %245, %8 : vector<32x128xf32>
    %247 = vector.extract_strided_slice %246 {offsets = [0, 0], sizes = [8, 128], strides = [1, 1]} : vector<32x128xf32> to vector<8x128xf32>
    %cst_147 = arith.constant 5.000000e-01 : f32
    %248 = vector.broadcast %cst_147 : f32 to vector<8x128xf32>
    %249 = arith.mulf %248, %247 : vector<8x128xf32>
    %250 = math.tanh %249 : vector<8x128xf32>
    %cst_148 = arith.constant 1.000000e+00 : f32
    %251 = vector.broadcast %cst_148 : f32 to vector<8x128xf32>
    %252 = arith.addf %250, %251 : vector<8x128xf32>
    %cst_149 = arith.constant 5.000000e-01 : f32
    %253 = vector.broadcast %cst_149 : f32 to vector<8x128xf32>
    %254 = arith.mulf %253, %252 : vector<8x128xf32>
    %255 = vector.extract_strided_slice %246 {offsets = [8, 0], sizes = [8, 128], strides = [1, 1]} : vector<32x128xf32> to vector<8x128xf32>
    %cst_150 = arith.constant 5.000000e-01 : f32
    %256 = vector.broadcast %cst_150 : f32 to vector<8x128xf32>
    %257 = arith.mulf %256, %255 : vector<8x128xf32>
    %258 = math.tanh %257 : vector<8x128xf32>
    %cst_151 = arith.constant 1.000000e+00 : f32
    %259 = vector.broadcast %cst_151 : f32 to vector<8x128xf32>
    %260 = arith.addf %258, %259 : vector<8x128xf32>
    %cst_152 = arith.constant 5.000000e-01 : f32
    %261 = vector.broadcast %cst_152 : f32 to vector<8x128xf32>
    %262 = arith.mulf %261, %260 : vector<8x128xf32>
    %263 = vector.extract_strided_slice %246 {offsets = [16, 0], sizes = [8, 128], strides = [1, 1]} : vector<32x128xf32> to vector<8x128xf32>
    %cst_153 = arith.constant 5.000000e-01 : f32
    %264 = vector.broadcast %cst_153 : f32 to vector<8x128xf32>
    %265 = arith.mulf %264, %263 : vector<8x128xf32>
    %266 = math.tanh %265 : vector<8x128xf32>
    %cst_154 = arith.constant 1.000000e+00 : f32
    %267 = vector.broadcast %cst_154 : f32 to vector<8x128xf32>
    %268 = arith.addf %266, %267 : vector<8x128xf32>
    %cst_155 = arith.constant 5.000000e-01 : f32
    %269 = vector.broadcast %cst_155 : f32 to vector<8x128xf32>
    %270 = arith.mulf %269, %268 : vector<8x128xf32>
    %271 = vector.extract_strided_slice %246 {offsets = [24, 0], sizes = [8, 128], strides = [1, 1]} : vector<32x128xf32> to vector<8x128xf32>
    %272 = math.tanh %271 : vector<8x128xf32>
    %c0_156 = arith.constant 0 : index
    %c0_157 = arith.constant 0 : index
    %273 = vector.load %arg16[%c0_156, %c0_157] : memref<8x128xf32, #tpu.memory_space<vmem>>, vector<8x128xf32>
    %274 = arith.mulf %262, %273 : vector<8x128xf32>
    %275 = arith.mulf %254, %272 : vector<8x128xf32>
    %276 = arith.addf %274, %275 : vector<8x128xf32>
    %277 = math.tanh %276 : vector<8x128xf32>
    %278 = arith.mulf %270, %277 : vector<8x128xf32>
    %c0_158 = arith.constant 0 : index
    %c0_159 = arith.constant 0 : index
    %279 = vector.load %arg15[%c0_158, %c0_159] : memref<8x128xf32, #tpu.memory_space<vmem>>, vector<8x128xf32>
    tpu.vector_store %arg15[%c0_158, %c0_159], %278 {strides = array<i32>} : memref<8x128xf32, #tpu.memory_space<vmem>>, vector<8x128xf32>,
    %c0_160 = arith.constant 0 : index
    %c0_161 = arith.constant 0 : index
    %280 = vector.load %arg16[%c0_160, %c0_161] : memref<8x128xf32, #tpu.memory_space<vmem>>, vector<8x128xf32>
    tpu.vector_store %arg16[%c0_160, %c0_161], %276 {strides = array<i32>} : memref<8x128xf32, #tpu.memory_space<vmem>>, vector<8x128xf32>,
    %c0_162 = arith.constant 0 : index
    %281 = arith.index_cast %c2_i32 : i32 to index
    %c0_163 = arith.constant 0 : index
    %c0_164 = arith.constant 0 : index
    %282 = vector.load %arg10[%c0_162, %281, %c0_163, %c0_164] : memref<1x8x8x128xf32, #tpu.memory_space<vmem>>, vector<1x1x8x128xf32>
    %283 = vector.shape_cast %282 : vector<1x1x8x128xf32> to vector<8x128xf32>
    %284 = vector.shape_cast %278 : vector<8x128xf32> to vector<1x1x8x128xf32>
    tpu.vector_store %arg10[%c0_162, %281, %c0_163, %c0_164], %284 {strides = array<i32>} : memref<1x8x8x128xf32, #tpu.memory_space<vmem>>, vector<1x1x8x128xf32>,
    %c3_i32 = arith.constant 3 : i32
    %c0_165 = arith.constant 0 : index
    %285 = arith.index_cast %c3_i32 : i32 to index
    %c0_166 = arith.constant 0 : index
    %c0_167 = arith.constant 0 : index
    %286 = vector.load %arg3[%c0_165, %285, %c0_166, %c0_167] : memref<1x8x128x128xf32, #tpu.memory_space<vmem>>, vector<1x1x128x128xf32>
    %287 = vector.shape_cast %286 : vector<1x1x128x128xf32> to vector<128x128xf32>
    %c0_168 = arith.constant 0 : index
    %288 = arith.index_cast %c3_i32 : i32 to index
    %c0_169 = arith.constant 0 : index
    %c0_170 = arith.constant 0 : index
    %289 = vector.load %arg2[%c0_168, %288, %c0_169, %c0_170] : memref<1x8x8x128xf32, #tpu.memory_space<vmem>>, vector<1x1x8x128xf32>
    %290 = vector.shape_cast %289 : vector<1x1x8x128xf32> to vector<8x128xf32>
    %cst_171 = arith.constant dense<0.000000e+00> : vector<8x128xf32>
    %291 = tpu.matmul %290, %287, %cst_171 {dimension_numbers = #tpu.dot_dimension_numbers<[1], [0], [0], [1], [0, 0, 1, 1], [], []>} : vector<8x128xf32>, vector<128x128xf32>, vector<8x128xf32> -> vector<8x128xf32>
    %c0_172 = arith.constant 0 : index
    %c0_173 = arith.constant 0 : index
    %292 = vector.load %arg13[%c0_172, %c0_173] : memref<8x128xf32, #tpu.memory_space<vmem>>, vector<8x128xf32>
    %cst_174 = arith.constant dense<0.000000e+00> : vector<8x128xf32>
    %293 = tpu.matmul %292, %287, %cst_174 {dimension_numbers = #tpu.dot_dimension_numbers<[1], [0], [0], [1], [0, 0, 1, 1], [], []>} : vector<8x128xf32>, vector<128x128xf32>, vector<8x128xf32> -> vector<8x128xf32>
    %cst_175 = arith.constant dense<0.000000e+00> : vector<32x128xf32>
    %294 = tpu.matmul %3, %291, %cst_175 {dimension_numbers = #tpu.dot_dimension_numbers<[1], [0], [0], [1], [0, 0, 1, 1], [], []>} : vector<32x8xf32>, vector<8x128xf32>, vector<32x128xf32> -> vector<32x128xf32>
    %cst_176 = arith.constant dense<0.000000e+00> : vector<32x128xf32>
    %295 = tpu.matmul %4, %293, %cst_176 {dimension_numbers = #tpu.dot_dimension_numbers<[1], [0], [0], [1], [0, 0, 1, 1], [], []>} : vector<32x8xf32>, vector<8x128xf32>, vector<32x128xf32> -> vector<32x128xf32>
    %296 = arith.addf %294, %295 : vector<32x128xf32>
    %297 = arith.addf %296, %5 : vector<32x128xf32>
    %298 = vector.extract_strided_slice %297 {offsets = [0, 0], sizes = [8, 128], strides = [1, 1]} : vector<32x128xf32> to vector<8x128xf32>
    %cst_177 = arith.constant 5.000000e-01 : f32
    %299 = vector.broadcast %cst_177 : f32 to vector<8x128xf32>
    %300 = arith.mulf %299, %298 : vector<8x128xf32>
    %301 = math.tanh %300 : vector<8x128xf32>
    %cst_178 = arith.constant 1.000000e+00 : f32
    %302 = vector.broadcast %cst_178 : f32 to vector<8x128xf32>
    %303 = arith.addf %301, %302 : vector<8x128xf32>
    %cst_179 = arith.constant 5.000000e-01 : f32
    %304 = vector.broadcast %cst_179 : f32 to vector<8x128xf32>
    %305 = arith.mulf %304, %303 : vector<8x128xf32>
    %306 = vector.extract_strided_slice %297 {offsets = [8, 0], sizes = [8, 128], strides = [1, 1]} : vector<32x128xf32> to vector<8x128xf32>
    %cst_180 = arith.constant 5.000000e-01 : f32
    %307 = vector.broadcast %cst_180 : f32 to vector<8x128xf32>
    %308 = arith.mulf %307, %306 : vector<8x128xf32>
    %309 = math.tanh %308 : vector<8x128xf32>
    %cst_181 = arith.constant 1.000000e+00 : f32
    %310 = vector.broadcast %cst_181 : f32 to vector<8x128xf32>
    %311 = arith.addf %309, %310 : vector<8x128xf32>
    %cst_182 = arith.constant 5.000000e-01 : f32
    %312 = vector.broadcast %cst_182 : f32 to vector<8x128xf32>
    %313 = arith.mulf %312, %311 : vector<8x128xf32>
    %314 = vector.extract_strided_slice %297 {offsets = [16, 0], sizes = [8, 128], strides = [1, 1]} : vector<32x128xf32> to vector<8x128xf32>
    %cst_183 = arith.constant 5.000000e-01 : f32
    %315 = vector.broadcast %cst_183 : f32 to vector<8x128xf32>
    %316 = arith.mulf %315, %314 : vector<8x128xf32>
    %317 = math.tanh %316 : vector<8x128xf32>
    %cst_184 = arith.constant 1.000000e+00 : f32
    %318 = vector.broadcast %cst_184 : f32 to vector<8x128xf32>
    %319 = arith.addf %317, %318 : vector<8x128xf32>
    %cst_185 = arith.constant 5.000000e-01 : f32
    %320 = vector.broadcast %cst_185 : f32 to vector<8x128xf32>
    %321 = arith.mulf %320, %319 : vector<8x128xf32>
    %322 = vector.extract_strided_slice %297 {offsets = [24, 0], sizes = [8, 128], strides = [1, 1]} : vector<32x128xf32> to vector<8x128xf32>
    %323 = math.tanh %322 : vector<8x128xf32>
    %c0_186 = arith.constant 0 : index
    %c0_187 = arith.constant 0 : index
    %324 = vector.load %arg14[%c0_186, %c0_187] : memref<8x128xf32, #tpu.memory_space<vmem>>, vector<8x128xf32>
    %325 = arith.mulf %313, %324 : vector<8x128xf32>
    %326 = arith.mulf %305, %323 : vector<8x128xf32>
    %327 = arith.addf %325, %326 : vector<8x128xf32>
    %328 = math.tanh %327 : vector<8x128xf32>
    %329 = arith.mulf %321, %328 : vector<8x128xf32>
    %c0_188 = arith.constant 0 : index
    %c0_189 = arith.constant 0 : index
    %330 = vector.load %arg13[%c0_188, %c0_189] : memref<8x128xf32, #tpu.memory_space<vmem>>, vector<8x128xf32>
    tpu.vector_store %arg13[%c0_188, %c0_189], %329 {strides = array<i32>} : memref<8x128xf32, #tpu.memory_space<vmem>>, vector<8x128xf32>,
    %c0_190 = arith.constant 0 : index
    %c0_191 = arith.constant 0 : index
    %331 = vector.load %arg14[%c0_190, %c0_191] : memref<8x128xf32, #tpu.memory_space<vmem>>, vector<8x128xf32>
    tpu.vector_store %arg14[%c0_190, %c0_191], %327 {strides = array<i32>} : memref<8x128xf32, #tpu.memory_space<vmem>>, vector<8x128xf32>,
    %cst_192 = arith.constant dense<0.000000e+00> : vector<8x128xf32>
    %332 = tpu.matmul %329, %287, %cst_192 {dimension_numbers = #tpu.dot_dimension_numbers<[1], [0], [0], [1], [0, 0, 1, 1], [], []>} : vector<8x128xf32>, vector<128x128xf32>, vector<8x128xf32> -> vector<8x128xf32>
    %c0_193 = arith.constant 0 : index
    %c0_194 = arith.constant 0 : index
    %333 = vector.load %arg15[%c0_193, %c0_194] : memref<8x128xf32, #tpu.memory_space<vmem>>, vector<8x128xf32>
    %cst_195 = arith.constant dense<0.000000e+00> : vector<8x128xf32>
    %334 = tpu.matmul %333, %287, %cst_195 {dimension_numbers = #tpu.dot_dimension_numbers<[1], [0], [0], [1], [0, 0, 1, 1], [], []>} : vector<8x128xf32>, vector<128x128xf32>, vector<8x128xf32> -> vector<8x128xf32>
    %cst_196 = arith.constant dense<0.000000e+00> : vector<32x128xf32>
    %335 = tpu.matmul %6, %332, %cst_196 {dimension_numbers = #tpu.dot_dimension_numbers<[1], [0], [0], [1], [0, 0, 1, 1], [], []>} : vector<32x8xf32>, vector<8x128xf32>, vector<32x128xf32> -> vector<32x128xf32>
    %cst_197 = arith.constant dense<0.000000e+00> : vector<32x128xf32>
    %336 = tpu.matmul %7, %334, %cst_197 {dimension_numbers = #tpu.dot_dimension_numbers<[1], [0], [0], [1], [0, 0, 1, 1], [], []>} : vector<32x8xf32>, vector<8x128xf32>, vector<32x128xf32> -> vector<32x128xf32>
    %337 = arith.addf %335, %336 : vector<32x128xf32>
    %338 = arith.addf %337, %8 : vector<32x128xf32>
    %339 = vector.extract_strided_slice %338 {offsets = [0, 0], sizes = [8, 128], strides = [1, 1]} : vector<32x128xf32> to vector<8x128xf32>
    %cst_198 = arith.constant 5.000000e-01 : f32
    %340 = vector.broadcast %cst_198 : f32 to vector<8x128xf32>
    %341 = arith.mulf %340, %339 : vector<8x128xf32>
    %342 = math.tanh %341 : vector<8x128xf32>
    %cst_199 = arith.constant 1.000000e+00 : f32
    %343 = vector.broadcast %cst_199 : f32 to vector<8x128xf32>
    %344 = arith.addf %342, %343 : vector<8x128xf32>
    %cst_200 = arith.constant 5.000000e-01 : f32
    %345 = vector.broadcast %cst_200 : f32 to vector<8x128xf32>
    %346 = arith.mulf %345, %344 : vector<8x128xf32>
    %347 = vector.extract_strided_slice %338 {offsets = [8, 0], sizes = [8, 128], strides = [1, 1]} : vector<32x128xf32> to vector<8x128xf32>
    %cst_201 = arith.constant 5.000000e-01 : f32
    %348 = vector.broadcast %cst_201 : f32 to vector<8x128xf32>
    %349 = arith.mulf %348, %347 : vector<8x128xf32>
    %350 = math.tanh %349 : vector<8x128xf32>
    %cst_202 = arith.constant 1.000000e+00 : f32
    %351 = vector.broadcast %cst_202 : f32 to vector<8x128xf32>
    %352 = arith.addf %350, %351 : vector<8x128xf32>
    %cst_203 = arith.constant 5.000000e-01 : f32
    %353 = vector.broadcast %cst_203 : f32 to vector<8x128xf32>
    %354 = arith.mulf %353, %352 : vector<8x128xf32>
    %355 = vector.extract_strided_slice %338 {offsets = [16, 0], sizes = [8, 128], strides = [1, 1]} : vector<32x128xf32> to vector<8x128xf32>
    %cst_204 = arith.constant 5.000000e-01 : f32
    %356 = vector.broadcast %cst_204 : f32 to vector<8x128xf32>
    %357 = arith.mulf %356, %355 : vector<8x128xf32>
    %358 = math.tanh %357 : vector<8x128xf32>
    %cst_205 = arith.constant 1.000000e+00 : f32
    %359 = vector.broadcast %cst_205 : f32 to vector<8x128xf32>
    %360 = arith.addf %358, %359 : vector<8x128xf32>
    %cst_206 = arith.constant 5.000000e-01 : f32
    %361 = vector.broadcast %cst_206 : f32 to vector<8x128xf32>
    %362 = arith.mulf %361, %360 : vector<8x128xf32>
    %363 = vector.extract_strided_slice %338 {offsets = [24, 0], sizes = [8, 128], strides = [1, 1]} : vector<32x128xf32> to vector<8x128xf32>
    %364 = math.tanh %363 : vector<8x128xf32>
    %c0_207 = arith.constant 0 : index
    %c0_208 = arith.constant 0 : index
    %365 = vector.load %arg16[%c0_207, %c0_208] : memref<8x128xf32, #tpu.memory_space<vmem>>, vector<8x128xf32>
    %366 = arith.mulf %354, %365 : vector<8x128xf32>
    %367 = arith.mulf %346, %364 : vector<8x128xf32>
    %368 = arith.addf %366, %367 : vector<8x128xf32>
    %369 = math.tanh %368 : vector<8x128xf32>
    %370 = arith.mulf %362, %369 : vector<8x128xf32>
    %c0_209 = arith.constant 0 : index
    %c0_210 = arith.constant 0 : index
    %371 = vector.load %arg15[%c0_209, %c0_210] : memref<8x128xf32, #tpu.memory_space<vmem>>, vector<8x128xf32>
    tpu.vector_store %arg15[%c0_209, %c0_210], %370 {strides = array<i32>} : memref<8x128xf32, #tpu.memory_space<vmem>>, vector<8x128xf32>,
    %c0_211 = arith.constant 0 : index
    %c0_212 = arith.constant 0 : index
    %372 = vector.load %arg16[%c0_211, %c0_212] : memref<8x128xf32, #tpu.memory_space<vmem>>, vector<8x128xf32>
    tpu.vector_store %arg16[%c0_211, %c0_212], %368 {strides = array<i32>} : memref<8x128xf32, #tpu.memory_space<vmem>>, vector<8x128xf32>,
    %c0_213 = arith.constant 0 : index
    %373 = arith.index_cast %c3_i32 : i32 to index
    %c0_214 = arith.constant 0 : index
    %c0_215 = arith.constant 0 : index
    %374 = vector.load %arg10[%c0_213, %373, %c0_214, %c0_215] : memref<1x8x8x128xf32, #tpu.memory_space<vmem>>, vector<1x1x8x128xf32>
    %375 = vector.shape_cast %374 : vector<1x1x8x128xf32> to vector<8x128xf32>
    %376 = vector.shape_cast %370 : vector<8x128xf32> to vector<1x1x8x128xf32>
    tpu.vector_store %arg10[%c0_213, %373, %c0_214, %c0_215], %376 {strides = array<i32>} : memref<1x8x8x128xf32, #tpu.memory_space<vmem>>, vector<1x1x8x128xf32>,
    %c4_i32 = arith.constant 4 : i32
    %c0_216 = arith.constant 0 : index
    %377 = arith.index_cast %c4_i32 : i32 to index
    %c0_217 = arith.constant 0 : index
    %c0_218 = arith.constant 0 : index
    %378 = vector.load %arg3[%c0_216, %377, %c0_217, %c0_218] : memref<1x8x128x128xf32, #tpu.memory_space<vmem>>, vector<1x1x128x128xf32>
    %379 = vector.shape_cast %378 : vector<1x1x128x128xf32> to vector<128x128xf32>
    %c0_219 = arith.constant 0 : index
    %380 = arith.index_cast %c4_i32 : i32 to index
    %c0_220 = arith.constant 0 : index
    %c0_221 = arith.constant 0 : index
    %381 = vector.load %arg2[%c0_219, %380, %c0_220, %c0_221] : memref<1x8x8x128xf32, #tpu.memory_space<vmem>>, vector<1x1x8x128xf32>
    %382 = vector.shape_cast %381 : vector<1x1x8x128xf32> to vector<8x128xf32>
    %cst_222 = arith.constant dense<0.000000e+00> : vector<8x128xf32>
    %383 = tpu.matmul %382, %379, %cst_222 {dimension_numbers = #tpu.dot_dimension_numbers<[1], [0], [0], [1], [0, 0, 1, 1], [], []>} : vector<8x128xf32>, vector<128x128xf32>, vector<8x128xf32> -> vector<8x128xf32>
    %c0_223 = arith.constant 0 : index
    %c0_224 = arith.constant 0 : index
    %384 = vector.load %arg13[%c0_223, %c0_224] : memref<8x128xf32, #tpu.memory_space<vmem>>, vector<8x128xf32>
    %cst_225 = arith.constant dense<0.000000e+00> : vector<8x128xf32>
    %385 = tpu.matmul %384, %379, %cst_225 {dimension_numbers = #tpu.dot_dimension_numbers<[1], [0], [0], [1], [0, 0, 1, 1], [], []>} : vector<8x128xf32>, vector<128x128xf32>, vector<8x128xf32> -> vector<8x128xf32>
    %cst_226 = arith.constant dense<0.000000e+00> : vector<32x128xf32>
    %386 = tpu.matmul %3, %383, %cst_226 {dimension_numbers = #tpu.dot_dimension_numbers<[1], [0], [0], [1], [0, 0, 1, 1], [], []>} : vector<32x8xf32>, vector<8x128xf32>, vector<32x128xf32> -> vector<32x128xf32>
    %cst_227 = arith.constant dense<0.000000e+00> : vector<32x128xf32>
    %387 = tpu.matmul %4, %385, %cst_227 {dimension_numbers = #tpu.dot_dimension_numbers<[1], [0], [0], [1], [0, 0, 1, 1], [], []>} : vector<32x8xf32>, vector<8x128xf32>, vector<32x128xf32> -> vector<32x128xf32>
    %388 = arith.addf %386, %387 : vector<32x128xf32>
    %389 = arith.addf %388, %5 : vector<32x128xf32>
    %390 = vector.extract_strided_slice %389 {offsets = [0, 0], sizes = [8, 128], strides = [1, 1]} : vector<32x128xf32> to vector<8x128xf32>
    %cst_228 = arith.constant 5.000000e-01 : f32
    %391 = vector.broadcast %cst_228 : f32 to vector<8x128xf32>
    %392 = arith.mulf %391, %390 : vector<8x128xf32>
    %393 = math.tanh %392 : vector<8x128xf32>
    %cst_229 = arith.constant 1.000000e+00 : f32
    %394 = vector.broadcast %cst_229 : f32 to vector<8x128xf32>
    %395 = arith.addf %393, %394 : vector<8x128xf32>
    %cst_230 = arith.constant 5.000000e-01 : f32
    %396 = vector.broadcast %cst_230 : f32 to vector<8x128xf32>
    %397 = arith.mulf %396, %395 : vector<8x128xf32>
    %398 = vector.extract_strided_slice %389 {offsets = [8, 0], sizes = [8, 128], strides = [1, 1]} : vector<32x128xf32> to vector<8x128xf32>
    %cst_231 = arith.constant 5.000000e-01 : f32
    %399 = vector.broadcast %cst_231 : f32 to vector<8x128xf32>
    %400 = arith.mulf %399, %398 : vector<8x128xf32>
    %401 = math.tanh %400 : vector<8x128xf32>
    %cst_232 = arith.constant 1.000000e+00 : f32
    %402 = vector.broadcast %cst_232 : f32 to vector<8x128xf32>
    %403 = arith.addf %401, %402 : vector<8x128xf32>
    %cst_233 = arith.constant 5.000000e-01 : f32
    %404 = vector.broadcast %cst_233 : f32 to vector<8x128xf32>
    %405 = arith.mulf %404, %403 : vector<8x128xf32>
    %406 = vector.extract_strided_slice %389 {offsets = [16, 0], sizes = [8, 128], strides = [1, 1]} : vector<32x128xf32> to vector<8x128xf32>
    %cst_234 = arith.constant 5.000000e-01 : f32
    %407 = vector.broadcast %cst_234 : f32 to vector<8x128xf32>
    %408 = arith.mulf %407, %406 : vector<8x128xf32>
    %409 = math.tanh %408 : vector<8x128xf32>
    %cst_235 = arith.constant 1.000000e+00 : f32
    %410 = vector.broadcast %cst_235 : f32 to vector<8x128xf32>
    %411 = arith.addf %409, %410 : vector<8x128xf32>
    %cst_236 = arith.constant 5.000000e-01 : f32
    %412 = vector.broadcast %cst_236 : f32 to vector<8x128xf32>
    %413 = arith.mulf %412, %411 : vector<8x128xf32>
    %414 = vector.extract_strided_slice %389 {offsets = [24, 0], sizes = [8, 128], strides = [1, 1]} : vector<32x128xf32> to vector<8x128xf32>
    %415 = math.tanh %414 : vector<8x128xf32>
    %c0_237 = arith.constant 0 : index
    %c0_238 = arith.constant 0 : index
    %416 = vector.load %arg14[%c0_237, %c0_238] : memref<8x128xf32, #tpu.memory_space<vmem>>, vector<8x128xf32>
    %417 = arith.mulf %405, %416 : vector<8x128xf32>
    %418 = arith.mulf %397, %415 : vector<8x128xf32>
    %419 = arith.addf %417, %418 : vector<8x128xf32>
    %420 = math.tanh %419 : vector<8x128xf32>
    %421 = arith.mulf %413, %420 : vector<8x128xf32>
    %c0_239 = arith.constant 0 : index
    %c0_240 = arith.constant 0 : index
    %422 = vector.load %arg13[%c0_239, %c0_240] : memref<8x128xf32, #tpu.memory_space<vmem>>, vector<8x128xf32>
    tpu.vector_store %arg13[%c0_239, %c0_240], %421 {strides = array<i32>} : memref<8x128xf32, #tpu.memory_space<vmem>>, vector<8x128xf32>,
    %c0_241 = arith.constant 0 : index
    %c0_242 = arith.constant 0 : index
    %423 = vector.load %arg14[%c0_241, %c0_242] : memref<8x128xf32, #tpu.memory_space<vmem>>, vector<8x128xf32>
    tpu.vector_store %arg14[%c0_241, %c0_242], %419 {strides = array<i32>} : memref<8x128xf32, #tpu.memory_space<vmem>>, vector<8x128xf32>,
    %cst_243 = arith.constant dense<0.000000e+00> : vector<8x128xf32>
    %424 = tpu.matmul %421, %379, %cst_243 {dimension_numbers = #tpu.dot_dimension_numbers<[1], [0], [0], [1], [0, 0, 1, 1], [], []>} : vector<8x128xf32>, vector<128x128xf32>, vector<8x128xf32> -> vector<8x128xf32>
    %c0_244 = arith.constant 0 : index
    %c0_245 = arith.constant 0 : index
    %425 = vector.load %arg15[%c0_244, %c0_245] : memref<8x128xf32, #tpu.memory_space<vmem>>, vector<8x128xf32>
    %cst_246 = arith.constant dense<0.000000e+00> : vector<8x128xf32>
    %426 = tpu.matmul %425, %379, %cst_246 {dimension_numbers = #tpu.dot_dimension_numbers<[1], [0], [0], [1], [0, 0, 1, 1], [], []>} : vector<8x128xf32>, vector<128x128xf32>, vector<8x128xf32> -> vector<8x128xf32>
    %cst_247 = arith.constant dense<0.000000e+00> : vector<32x128xf32>
    %427 = tpu.matmul %6, %424, %cst_247 {dimension_numbers = #tpu.dot_dimension_numbers<[1], [0], [0], [1], [0, 0, 1, 1], [], []>} : vector<32x8xf32>, vector<8x128xf32>, vector<32x128xf32> -> vector<32x128xf32>
    %cst_248 = arith.constant dense<0.000000e+00> : vector<32x128xf32>
    %428 = tpu.matmul %7, %426, %cst_248 {dimension_numbers = #tpu.dot_dimension_numbers<[1], [0], [0], [1], [0, 0, 1, 1], [], []>} : vector<32x8xf32>, vector<8x128xf32>, vector<32x128xf32> -> vector<32x128xf32>
    %429 = arith.addf %427, %428 : vector<32x128xf32>
    %430 = arith.addf %429, %8 : vector<32x128xf32>
    %431 = vector.extract_strided_slice %430 {offsets = [0, 0], sizes = [8, 128], strides = [1, 1]} : vector<32x128xf32> to vector<8x128xf32>
    %cst_249 = arith.constant 5.000000e-01 : f32
    %432 = vector.broadcast %cst_249 : f32 to vector<8x128xf32>
    %433 = arith.mulf %432, %431 : vector<8x128xf32>
    %434 = math.tanh %433 : vector<8x128xf32>
    %cst_250 = arith.constant 1.000000e+00 : f32
    %435 = vector.broadcast %cst_250 : f32 to vector<8x128xf32>
    %436 = arith.addf %434, %435 : vector<8x128xf32>
    %cst_251 = arith.constant 5.000000e-01 : f32
    %437 = vector.broadcast %cst_251 : f32 to vector<8x128xf32>
    %438 = arith.mulf %437, %436 : vector<8x128xf32>
    %439 = vector.extract_strided_slice %430 {offsets = [8, 0], sizes = [8, 128], strides = [1, 1]} : vector<32x128xf32> to vector<8x128xf32>
    %cst_252 = arith.constant 5.000000e-01 : f32
    %440 = vector.broadcast %cst_252 : f32 to vector<8x128xf32>
    %441 = arith.mulf %440, %439 : vector<8x128xf32>
    %442 = math.tanh %441 : vector<8x128xf32>
    %cst_253 = arith.constant 1.000000e+00 : f32
    %443 = vector.broadcast %cst_253 : f32 to vector<8x128xf32>
    %444 = arith.addf %442, %443 : vector<8x128xf32>
    %cst_254 = arith.constant 5.000000e-01 : f32
    %445 = vector.broadcast %cst_254 : f32 to vector<8x128xf32>
    %446 = arith.mulf %445, %444 : vector<8x128xf32>
    %447 = vector.extract_strided_slice %430 {offsets = [16, 0], sizes = [8, 128], strides = [1, 1]} : vector<32x128xf32> to vector<8x128xf32>
    %cst_255 = arith.constant 5.000000e-01 : f32
    %448 = vector.broadcast %cst_255 : f32 to vector<8x128xf32>
    %449 = arith.mulf %448, %447 : vector<8x128xf32>
    %450 = math.tanh %449 : vector<8x128xf32>
    %cst_256 = arith.constant 1.000000e+00 : f32
    %451 = vector.broadcast %cst_256 : f32 to vector<8x128xf32>
    %452 = arith.addf %450, %451 : vector<8x128xf32>
    %cst_257 = arith.constant 5.000000e-01 : f32
    %453 = vector.broadcast %cst_257 : f32 to vector<8x128xf32>
    %454 = arith.mulf %453, %452 : vector<8x128xf32>
    %455 = vector.extract_strided_slice %430 {offsets = [24, 0], sizes = [8, 128], strides = [1, 1]} : vector<32x128xf32> to vector<8x128xf32>
    %456 = math.tanh %455 : vector<8x128xf32>
    %c0_258 = arith.constant 0 : index
    %c0_259 = arith.constant 0 : index
    %457 = vector.load %arg16[%c0_258, %c0_259] : memref<8x128xf32, #tpu.memory_space<vmem>>, vector<8x128xf32>
    %458 = arith.mulf %446, %457 : vector<8x128xf32>
    %459 = arith.mulf %438, %456 : vector<8x128xf32>
    %460 = arith.addf %458, %459 : vector<8x128xf32>
    %461 = math.tanh %460 : vector<8x128xf32>
    %462 = arith.mulf %454, %461 : vector<8x128xf32>
    %c0_260 = arith.constant 0 : index
    %c0_261 = arith.constant 0 : index
    %463 = vector.load %arg15[%c0_260, %c0_261] : memref<8x128xf32, #tpu.memory_space<vmem>>, vector<8x128xf32>
    tpu.vector_store %arg15[%c0_260, %c0_261], %462 {strides = array<i32>} : memref<8x128xf32, #tpu.memory_space<vmem>>, vector<8x128xf32>,
    %c0_262 = arith.constant 0 : index
    %c0_263 = arith.constant 0 : index
    %464 = vector.load %arg16[%c0_262, %c0_263] : memref<8x128xf32, #tpu.memory_space<vmem>>, vector<8x128xf32>
    tpu.vector_store %arg16[%c0_262, %c0_263], %460 {strides = array<i32>} : memref<8x128xf32, #tpu.memory_space<vmem>>, vector<8x128xf32>,
    %c0_264 = arith.constant 0 : index
    %465 = arith.index_cast %c4_i32 : i32 to index
    %c0_265 = arith.constant 0 : index
    %c0_266 = arith.constant 0 : index
    %466 = vector.load %arg10[%c0_264, %465, %c0_265, %c0_266] : memref<1x8x8x128xf32, #tpu.memory_space<vmem>>, vector<1x1x8x128xf32>
    %467 = vector.shape_cast %466 : vector<1x1x8x128xf32> to vector<8x128xf32>
    %468 = vector.shape_cast %462 : vector<8x128xf32> to vector<1x1x8x128xf32>
    tpu.vector_store %arg10[%c0_264, %465, %c0_265, %c0_266], %468 {strides = array<i32>} : memref<1x8x8x128xf32, #tpu.memory_space<vmem>>, vector<1x1x8x128xf32>,
    %c5_i32 = arith.constant 5 : i32
    %c0_267 = arith.constant 0 : index
    %469 = arith.index_cast %c5_i32 : i32 to index
    %c0_268 = arith.constant 0 : index
    %c0_269 = arith.constant 0 : index
    %470 = vector.load %arg3[%c0_267, %469, %c0_268, %c0_269] : memref<1x8x128x128xf32, #tpu.memory_space<vmem>>, vector<1x1x128x128xf32>
    %471 = vector.shape_cast %470 : vector<1x1x128x128xf32> to vector<128x128xf32>
    %c0_270 = arith.constant 0 : index
    %472 = arith.index_cast %c5_i32 : i32 to index
    %c0_271 = arith.constant 0 : index
    %c0_272 = arith.constant 0 : index
    %473 = vector.load %arg2[%c0_270, %472, %c0_271, %c0_272] : memref<1x8x8x128xf32, #tpu.memory_space<vmem>>, vector<1x1x8x128xf32>
    %474 = vector.shape_cast %473 : vector<1x1x8x128xf32> to vector<8x128xf32>
    %cst_273 = arith.constant dense<0.000000e+00> : vector<8x128xf32>
    %475 = tpu.matmul %474, %471, %cst_273 {dimension_numbers = #tpu.dot_dimension_numbers<[1], [0], [0], [1], [0, 0, 1, 1], [], []>} : vector<8x128xf32>, vector<128x128xf32>, vector<8x128xf32> -> vector<8x128xf32>
    %c0_274 = arith.constant 0 : index
    %c0_275 = arith.constant 0 : index
    %476 = vector.load %arg13[%c0_274, %c0_275] : memref<8x128xf32, #tpu.memory_space<vmem>>, vector<8x128xf32>
    %cst_276 = arith.constant dense<0.000000e+00> : vector<8x128xf32>
    %477 = tpu.matmul %476, %471, %cst_276 {dimension_numbers = #tpu.dot_dimension_numbers<[1], [0], [0], [1], [0, 0, 1, 1], [], []>} : vector<8x128xf32>, vector<128x128xf32>, vector<8x128xf32> -> vector<8x128xf32>
    %cst_277 = arith.constant dense<0.000000e+00> : vector<32x128xf32>
    %478 = tpu.matmul %3, %475, %cst_277 {dimension_numbers = #tpu.dot_dimension_numbers<[1], [0], [0], [1], [0, 0, 1, 1], [], []>} : vector<32x8xf32>, vector<8x128xf32>, vector<32x128xf32> -> vector<32x128xf32>
    %cst_278 = arith.constant dense<0.000000e+00> : vector<32x128xf32>
    %479 = tpu.matmul %4, %477, %cst_278 {dimension_numbers = #tpu.dot_dimension_numbers<[1], [0], [0], [1], [0, 0, 1, 1], [], []>} : vector<32x8xf32>, vector<8x128xf32>, vector<32x128xf32> -> vector<32x128xf32>
    %480 = arith.addf %478, %479 : vector<32x128xf32>
    %481 = arith.addf %480, %5 : vector<32x128xf32>
    %482 = vector.extract_strided_slice %481 {offsets = [0, 0], sizes = [8, 128], strides = [1, 1]} : vector<32x128xf32> to vector<8x128xf32>
    %cst_279 = arith.constant 5.000000e-01 : f32
    %483 = vector.broadcast %cst_279 : f32 to vector<8x128xf32>
    %484 = arith.mulf %483, %482 : vector<8x128xf32>
    %485 = math.tanh %484 : vector<8x128xf32>
    %cst_280 = arith.constant 1.000000e+00 : f32
    %486 = vector.broadcast %cst_280 : f32 to vector<8x128xf32>
    %487 = arith.addf %485, %486 : vector<8x128xf32>
    %cst_281 = arith.constant 5.000000e-01 : f32
    %488 = vector.broadcast %cst_281 : f32 to vector<8x128xf32>
    %489 = arith.mulf %488, %487 : vector<8x128xf32>
    %490 = vector.extract_strided_slice %481 {offsets = [8, 0], sizes = [8, 128], strides = [1, 1]} : vector<32x128xf32> to vector<8x128xf32>
    %cst_282 = arith.constant 5.000000e-01 : f32
    %491 = vector.broadcast %cst_282 : f32 to vector<8x128xf32>
    %492 = arith.mulf %491, %490 : vector<8x128xf32>
    %493 = math.tanh %492 : vector<8x128xf32>
    %cst_283 = arith.constant 1.000000e+00 : f32
    %494 = vector.broadcast %cst_283 : f32 to vector<8x128xf32>
    %495 = arith.addf %493, %494 : vector<8x128xf32>
    %cst_284 = arith.constant 5.000000e-01 : f32
    %496 = vector.broadcast %cst_284 : f32 to vector<8x128xf32>
    %497 = arith.mulf %496, %495 : vector<8x128xf32>
    %498 = vector.extract_strided_slice %481 {offsets = [16, 0], sizes = [8, 128], strides = [1, 1]} : vector<32x128xf32> to vector<8x128xf32>
    %cst_285 = arith.constant 5.000000e-01 : f32
    %499 = vector.broadcast %cst_285 : f32 to vector<8x128xf32>
    %500 = arith.mulf %499, %498 : vector<8x128xf32>
    %501 = math.tanh %500 : vector<8x128xf32>
    %cst_286 = arith.constant 1.000000e+00 : f32
    %502 = vector.broadcast %cst_286 : f32 to vector<8x128xf32>
    %503 = arith.addf %501, %502 : vector<8x128xf32>
    %cst_287 = arith.constant 5.000000e-01 : f32
    %504 = vector.broadcast %cst_287 : f32 to vector<8x128xf32>
    %505 = arith.mulf %504, %503 : vector<8x128xf32>
    %506 = vector.extract_strided_slice %481 {offsets = [24, 0], sizes = [8, 128], strides = [1, 1]} : vector<32x128xf32> to vector<8x128xf32>
    %507 = math.tanh %506 : vector<8x128xf32>
    %c0_288 = arith.constant 0 : index
    %c0_289 = arith.constant 0 : index
    %508 = vector.load %arg14[%c0_288, %c0_289] : memref<8x128xf32, #tpu.memory_space<vmem>>, vector<8x128xf32>
    %509 = arith.mulf %497, %508 : vector<8x128xf32>
    %510 = arith.mulf %489, %507 : vector<8x128xf32>
    %511 = arith.addf %509, %510 : vector<8x128xf32>
    %512 = math.tanh %511 : vector<8x128xf32>
    %513 = arith.mulf %505, %512 : vector<8x128xf32>
    %c0_290 = arith.constant 0 : index
    %c0_291 = arith.constant 0 : index
    %514 = vector.load %arg13[%c0_290, %c0_291] : memref<8x128xf32, #tpu.memory_space<vmem>>, vector<8x128xf32>
    tpu.vector_store %arg13[%c0_290, %c0_291], %513 {strides = array<i32>} : memref<8x128xf32, #tpu.memory_space<vmem>>, vector<8x128xf32>,
    %c0_292 = arith.constant 0 : index
    %c0_293 = arith.constant 0 : index
    %515 = vector.load %arg14[%c0_292, %c0_293] : memref<8x128xf32, #tpu.memory_space<vmem>>, vector<8x128xf32>
    tpu.vector_store %arg14[%c0_292, %c0_293], %511 {strides = array<i32>} : memref<8x128xf32, #tpu.memory_space<vmem>>, vector<8x128xf32>,
    %cst_294 = arith.constant dense<0.000000e+00> : vector<8x128xf32>
    %516 = tpu.matmul %513, %471, %cst_294 {dimension_numbers = #tpu.dot_dimension_numbers<[1], [0], [0], [1], [0, 0, 1, 1], [], []>} : vector<8x128xf32>, vector<128x128xf32>, vector<8x128xf32> -> vector<8x128xf32>
    %c0_295 = arith.constant 0 : index
    %c0_296 = arith.constant 0 : index
    %517 = vector.load %arg15[%c0_295, %c0_296] : memref<8x128xf32, #tpu.memory_space<vmem>>, vector<8x128xf32>
    %cst_297 = arith.constant dense<0.000000e+00> : vector<8x128xf32>
    %518 = tpu.matmul %517, %471, %cst_297 {dimension_numbers = #tpu.dot_dimension_numbers<[1], [0], [0], [1], [0, 0, 1, 1], [], []>} : vector<8x128xf32>, vector<128x128xf32>, vector<8x128xf32> -> vector<8x128xf32>
    %cst_298 = arith.constant dense<0.000000e+00> : vector<32x128xf32>
    %519 = tpu.matmul %6, %516, %cst_298 {dimension_numbers = #tpu.dot_dimension_numbers<[1], [0], [0], [1], [0, 0, 1, 1], [], []>} : vector<32x8xf32>, vector<8x128xf32>, vector<32x128xf32> -> vector<32x128xf32>
    %cst_299 = arith.constant dense<0.000000e+00> : vector<32x128xf32>
    %520 = tpu.matmul %7, %518, %cst_299 {dimension_numbers = #tpu.dot_dimension_numbers<[1], [0], [0], [1], [0, 0, 1, 1], [], []>} : vector<32x8xf32>, vector<8x128xf32>, vector<32x128xf32> -> vector<32x128xf32>
    %521 = arith.addf %519, %520 : vector<32x128xf32>
    %522 = arith.addf %521, %8 : vector<32x128xf32>
    %523 = vector.extract_strided_slice %522 {offsets = [0, 0], sizes = [8, 128], strides = [1, 1]} : vector<32x128xf32> to vector<8x128xf32>
    %cst_300 = arith.constant 5.000000e-01 : f32
    %524 = vector.broadcast %cst_300 : f32 to vector<8x128xf32>
    %525 = arith.mulf %524, %523 : vector<8x128xf32>
    %526 = math.tanh %525 : vector<8x128xf32>
    %cst_301 = arith.constant 1.000000e+00 : f32
    %527 = vector.broadcast %cst_301 : f32 to vector<8x128xf32>
    %528 = arith.addf %526, %527 : vector<8x128xf32>
    %cst_302 = arith.constant 5.000000e-01 : f32
    %529 = vector.broadcast %cst_302 : f32 to vector<8x128xf32>
    %530 = arith.mulf %529, %528 : vector<8x128xf32>
    %531 = vector.extract_strided_slice %522 {offsets = [8, 0], sizes = [8, 128], strides = [1, 1]} : vector<32x128xf32> to vector<8x128xf32>
    %cst_303 = arith.constant 5.000000e-01 : f32
    %532 = vector.broadcast %cst_303 : f32 to vector<8x128xf32>
    %533 = arith.mulf %532, %531 : vector<8x128xf32>
    %534 = math.tanh %533 : vector<8x128xf32>
    %cst_304 = arith.constant 1.000000e+00 : f32
    %535 = vector.broadcast %cst_304 : f32 to vector<8x128xf32>
    %536 = arith.addf %534, %535 : vector<8x128xf32>
    %cst_305 = arith.constant 5.000000e-01 : f32
    %537 = vector.broadcast %cst_305 : f32 to vector<8x128xf32>
    %538 = arith.mulf %537, %536 : vector<8x128xf32>
    %539 = vector.extract_strided_slice %522 {offsets = [16, 0], sizes = [8, 128], strides = [1, 1]} : vector<32x128xf32> to vector<8x128xf32>
    %cst_306 = arith.constant 5.000000e-01 : f32
    %540 = vector.broadcast %cst_306 : f32 to vector<8x128xf32>
    %541 = arith.mulf %540, %539 : vector<8x128xf32>
    %542 = math.tanh %541 : vector<8x128xf32>
    %cst_307 = arith.constant 1.000000e+00 : f32
    %543 = vector.broadcast %cst_307 : f32 to vector<8x128xf32>
    %544 = arith.addf %542, %543 : vector<8x128xf32>
    %cst_308 = arith.constant 5.000000e-01 : f32
    %545 = vector.broadcast %cst_308 : f32 to vector<8x128xf32>
    %546 = arith.mulf %545, %544 : vector<8x128xf32>
    %547 = vector.extract_strided_slice %522 {offsets = [24, 0], sizes = [8, 128], strides = [1, 1]} : vector<32x128xf32> to vector<8x128xf32>
    %548 = math.tanh %547 : vector<8x128xf32>
    %c0_309 = arith.constant 0 : index
    %c0_310 = arith.constant 0 : index
    %549 = vector.load %arg16[%c0_309, %c0_310] : memref<8x128xf32, #tpu.memory_space<vmem>>, vector<8x128xf32>
    %550 = arith.mulf %538, %549 : vector<8x128xf32>
    %551 = arith.mulf %530, %548 : vector<8x128xf32>
    %552 = arith.addf %550, %551 : vector<8x128xf32>
    %553 = math.tanh %552 : vector<8x128xf32>
    %554 = arith.mulf %546, %553 : vector<8x128xf32>
    %c0_311 = arith.constant 0 : index
    %c0_312 = arith.constant 0 : index
    %555 = vector.load %arg15[%c0_311, %c0_312] : memref<8x128xf32, #tpu.memory_space<vmem>>, vector<8x128xf32>
    tpu.vector_store %arg15[%c0_311, %c0_312], %554 {strides = array<i32>} : memref<8x128xf32, #tpu.memory_space<vmem>>, vector<8x128xf32>,
    %c0_313 = arith.constant 0 : index
    %c0_314 = arith.constant 0 : index
    %556 = vector.load %arg16[%c0_313, %c0_314] : memref<8x128xf32, #tpu.memory_space<vmem>>, vector<8x128xf32>
    tpu.vector_store %arg16[%c0_313, %c0_314], %552 {strides = array<i32>} : memref<8x128xf32, #tpu.memory_space<vmem>>, vector<8x128xf32>,
    %c0_315 = arith.constant 0 : index
    %557 = arith.index_cast %c5_i32 : i32 to index
    %c0_316 = arith.constant 0 : index
    %c0_317 = arith.constant 0 : index
    %558 = vector.load %arg10[%c0_315, %557, %c0_316, %c0_317] : memref<1x8x8x128xf32, #tpu.memory_space<vmem>>, vector<1x1x8x128xf32>
    %559 = vector.shape_cast %558 : vector<1x1x8x128xf32> to vector<8x128xf32>
    %560 = vector.shape_cast %554 : vector<8x128xf32> to vector<1x1x8x128xf32>
    tpu.vector_store %arg10[%c0_315, %557, %c0_316, %c0_317], %560 {strides = array<i32>} : memref<1x8x8x128xf32, #tpu.memory_space<vmem>>, vector<1x1x8x128xf32>,
    %c6_i32 = arith.constant 6 : i32
    %c0_318 = arith.constant 0 : index
    %561 = arith.index_cast %c6_i32 : i32 to index
    %c0_319 = arith.constant 0 : index
    %c0_320 = arith.constant 0 : index
    %562 = vector.load %arg3[%c0_318, %561, %c0_319, %c0_320] : memref<1x8x128x128xf32, #tpu.memory_space<vmem>>, vector<1x1x128x128xf32>
    %563 = vector.shape_cast %562 : vector<1x1x128x128xf32> to vector<128x128xf32>
    %c0_321 = arith.constant 0 : index
    %564 = arith.index_cast %c6_i32 : i32 to index
    %c0_322 = arith.constant 0 : index
    %c0_323 = arith.constant 0 : index
    %565 = vector.load %arg2[%c0_321, %564, %c0_322, %c0_323] : memref<1x8x8x128xf32, #tpu.memory_space<vmem>>, vector<1x1x8x128xf32>
    %566 = vector.shape_cast %565 : vector<1x1x8x128xf32> to vector<8x128xf32>
    %cst_324 = arith.constant dense<0.000000e+00> : vector<8x128xf32>
    %567 = tpu.matmul %566, %563, %cst_324 {dimension_numbers = #tpu.dot_dimension_numbers<[1], [0], [0], [1], [0, 0, 1, 1], [], []>} : vector<8x128xf32>, vector<128x128xf32>, vector<8x128xf32> -> vector<8x128xf32>
    %c0_325 = arith.constant 0 : index
    %c0_326 = arith.constant 0 : index
    %568 = vector.load %arg13[%c0_325, %c0_326] : memref<8x128xf32, #tpu.memory_space<vmem>>, vector<8x128xf32>
    %cst_327 = arith.constant dense<0.000000e+00> : vector<8x128xf32>
    %569 = tpu.matmul %568, %563, %cst_327 {dimension_numbers = #tpu.dot_dimension_numbers<[1], [0], [0], [1], [0, 0, 1, 1], [], []>} : vector<8x128xf32>, vector<128x128xf32>, vector<8x128xf32> -> vector<8x128xf32>
    %cst_328 = arith.constant dense<0.000000e+00> : vector<32x128xf32>
    %570 = tpu.matmul %3, %567, %cst_328 {dimension_numbers = #tpu.dot_dimension_numbers<[1], [0], [0], [1], [0, 0, 1, 1], [], []>} : vector<32x8xf32>, vector<8x128xf32>, vector<32x128xf32> -> vector<32x128xf32>
    %cst_329 = arith.constant dense<0.000000e+00> : vector<32x128xf32>
    %571 = tpu.matmul %4, %569, %cst_329 {dimension_numbers = #tpu.dot_dimension_numbers<[1], [0], [0], [1], [0, 0, 1, 1], [], []>} : vector<32x8xf32>, vector<8x128xf32>, vector<32x128xf32> -> vector<32x128xf32>
    %572 = arith.addf %570, %571 : vector<32x128xf32>
    %573 = arith.addf %572, %5 : vector<32x128xf32>
    %574 = vector.extract_strided_slice %573 {offsets = [0, 0], sizes = [8, 128], strides = [1, 1]} : vector<32x128xf32> to vector<8x128xf32>
    %cst_330 = arith.constant 5.000000e-01 : f32
    %575 = vector.broadcast %cst_330 : f32 to vector<8x128xf32>
    %576 = arith.mulf %575, %574 : vector<8x128xf32>
    %577 = math.tanh %576 : vector<8x128xf32>
    %cst_331 = arith.constant 1.000000e+00 : f32
    %578 = vector.broadcast %cst_331 : f32 to vector<8x128xf32>
    %579 = arith.addf %577, %578 : vector<8x128xf32>
    %cst_332 = arith.constant 5.000000e-01 : f32
    %580 = vector.broadcast %cst_332 : f32 to vector<8x128xf32>
    %581 = arith.mulf %580, %579 : vector<8x128xf32>
    %582 = vector.extract_strided_slice %573 {offsets = [8, 0], sizes = [8, 128], strides = [1, 1]} : vector<32x128xf32> to vector<8x128xf32>
    %cst_333 = arith.constant 5.000000e-01 : f32
    %583 = vector.broadcast %cst_333 : f32 to vector<8x128xf32>
    %584 = arith.mulf %583, %582 : vector<8x128xf32>
    %585 = math.tanh %584 : vector<8x128xf32>
    %cst_334 = arith.constant 1.000000e+00 : f32
    %586 = vector.broadcast %cst_334 : f32 to vector<8x128xf32>
    %587 = arith.addf %585, %586 : vector<8x128xf32>
    %cst_335 = arith.constant 5.000000e-01 : f32
    %588 = vector.broadcast %cst_335 : f32 to vector<8x128xf32>
    %589 = arith.mulf %588, %587 : vector<8x128xf32>
    %590 = vector.extract_strided_slice %573 {offsets = [16, 0], sizes = [8, 128], strides = [1, 1]} : vector<32x128xf32> to vector<8x128xf32>
    %cst_336 = arith.constant 5.000000e-01 : f32
    %591 = vector.broadcast %cst_336 : f32 to vector<8x128xf32>
    %592 = arith.mulf %591, %590 : vector<8x128xf32>
    %593 = math.tanh %592 : vector<8x128xf32>
    %cst_337 = arith.constant 1.000000e+00 : f32
    %594 = vector.broadcast %cst_337 : f32 to vector<8x128xf32>
    %595 = arith.addf %593, %594 : vector<8x128xf32>
    %cst_338 = arith.constant 5.000000e-01 : f32
    %596 = vector.broadcast %cst_338 : f32 to vector<8x128xf32>
    %597 = arith.mulf %596, %595 : vector<8x128xf32>
    %598 = vector.extract_strided_slice %573 {offsets = [24, 0], sizes = [8, 128], strides = [1, 1]} : vector<32x128xf32> to vector<8x128xf32>
    %599 = math.tanh %598 : vector<8x128xf32>
    %c0_339 = arith.constant 0 : index
    %c0_340 = arith.constant 0 : index
    %600 = vector.load %arg14[%c0_339, %c0_340] : memref<8x128xf32, #tpu.memory_space<vmem>>, vector<8x128xf32>
    %601 = arith.mulf %589, %600 : vector<8x128xf32>
    %602 = arith.mulf %581, %599 : vector<8x128xf32>
    %603 = arith.addf %601, %602 : vector<8x128xf32>
    %604 = math.tanh %603 : vector<8x128xf32>
    %605 = arith.mulf %597, %604 : vector<8x128xf32>
    %c0_341 = arith.constant 0 : index
    %c0_342 = arith.constant 0 : index
    %606 = vector.load %arg13[%c0_341, %c0_342] : memref<8x128xf32, #tpu.memory_space<vmem>>, vector<8x128xf32>
    tpu.vector_store %arg13[%c0_341, %c0_342], %605 {strides = array<i32>} : memref<8x128xf32, #tpu.memory_space<vmem>>, vector<8x128xf32>,
    %c0_343 = arith.constant 0 : index
    %c0_344 = arith.constant 0 : index
    %607 = vector.load %arg14[%c0_343, %c0_344] : memref<8x128xf32, #tpu.memory_space<vmem>>, vector<8x128xf32>
    tpu.vector_store %arg14[%c0_343, %c0_344], %603 {strides = array<i32>} : memref<8x128xf32, #tpu.memory_space<vmem>>, vector<8x128xf32>,
    %cst_345 = arith.constant dense<0.000000e+00> : vector<8x128xf32>
    %608 = tpu.matmul %605, %563, %cst_345 {dimension_numbers = #tpu.dot_dimension_numbers<[1], [0], [0], [1], [0, 0, 1, 1], [], []>} : vector<8x128xf32>, vector<128x128xf32>, vector<8x128xf32> -> vector<8x128xf32>
    %c0_346 = arith.constant 0 : index
    %c0_347 = arith.constant 0 : index
    %609 = vector.load %arg15[%c0_346, %c0_347] : memref<8x128xf32, #tpu.memory_space<vmem>>, vector<8x128xf32>
    %cst_348 = arith.constant dense<0.000000e+00> : vector<8x128xf32>
    %610 = tpu.matmul %609, %563, %cst_348 {dimension_numbers = #tpu.dot_dimension_numbers<[1], [0], [0], [1], [0, 0, 1, 1], [], []>} : vector<8x128xf32>, vector<128x128xf32>, vector<8x128xf32> -> vector<8x128xf32>
    %cst_349 = arith.constant dense<0.000000e+00> : vector<32x128xf32>
    %611 = tpu.matmul %6, %608, %cst_349 {dimension_numbers = #tpu.dot_dimension_numbers<[1], [0], [0], [1], [0, 0, 1, 1], [], []>} : vector<32x8xf32>, vector<8x128xf32>, vector<32x128xf32> -> vector<32x128xf32>
    %cst_350 = arith.constant dense<0.000000e+00> : vector<32x128xf32>
    %612 = tpu.matmul %7, %610, %cst_350 {dimension_numbers = #tpu.dot_dimension_numbers<[1], [0], [0], [1], [0, 0, 1, 1], [], []>} : vector<32x8xf32>, vector<8x128xf32>, vector<32x128xf32> -> vector<32x128xf32>
    %613 = arith.addf %611, %612 : vector<32x128xf32>
    %614 = arith.addf %613, %8 : vector<32x128xf32>
    %615 = vector.extract_strided_slice %614 {offsets = [0, 0], sizes = [8, 128], strides = [1, 1]} : vector<32x128xf32> to vector<8x128xf32>
    %cst_351 = arith.constant 5.000000e-01 : f32
    %616 = vector.broadcast %cst_351 : f32 to vector<8x128xf32>
    %617 = arith.mulf %616, %615 : vector<8x128xf32>
    %618 = math.tanh %617 : vector<8x128xf32>
    %cst_352 = arith.constant 1.000000e+00 : f32
    %619 = vector.broadcast %cst_352 : f32 to vector<8x128xf32>
    %620 = arith.addf %618, %619 : vector<8x128xf32>
    %cst_353 = arith.constant 5.000000e-01 : f32
    %621 = vector.broadcast %cst_353 : f32 to vector<8x128xf32>
    %622 = arith.mulf %621, %620 : vector<8x128xf32>
    %623 = vector.extract_strided_slice %614 {offsets = [8, 0], sizes = [8, 128], strides = [1, 1]} : vector<32x128xf32> to vector<8x128xf32>
    %cst_354 = arith.constant 5.000000e-01 : f32
    %624 = vector.broadcast %cst_354 : f32 to vector<8x128xf32>
    %625 = arith.mulf %624, %623 : vector<8x128xf32>
    %626 = math.tanh %625 : vector<8x128xf32>
    %cst_355 = arith.constant 1.000000e+00 : f32
    %627 = vector.broadcast %cst_355 : f32 to vector<8x128xf32>
    %628 = arith.addf %626, %627 : vector<8x128xf32>
    %cst_356 = arith.constant 5.000000e-01 : f32
    %629 = vector.broadcast %cst_356 : f32 to vector<8x128xf32>
    %630 = arith.mulf %629, %628 : vector<8x128xf32>
    %631 = vector.extract_strided_slice %614 {offsets = [16, 0], sizes = [8, 128], strides = [1, 1]} : vector<32x128xf32> to vector<8x128xf32>
    %cst_357 = arith.constant 5.000000e-01 : f32
    %632 = vector.broadcast %cst_357 : f32 to vector<8x128xf32>
    %633 = arith.mulf %632, %631 : vector<8x128xf32>
    %634 = math.tanh %633 : vector<8x128xf32>
    %cst_358 = arith.constant 1.000000e+00 : f32
    %635 = vector.broadcast %cst_358 : f32 to vector<8x128xf32>
    %636 = arith.addf %634, %635 : vector<8x128xf32>
    %cst_359 = arith.constant 5.000000e-01 : f32
    %637 = vector.broadcast %cst_359 : f32 to vector<8x128xf32>
    %638 = arith.mulf %637, %636 : vector<8x128xf32>
    %639 = vector.extract_strided_slice %614 {offsets = [24, 0], sizes = [8, 128], strides = [1, 1]} : vector<32x128xf32> to vector<8x128xf32>
    %640 = math.tanh %639 : vector<8x128xf32>
    %c0_360 = arith.constant 0 : index
    %c0_361 = arith.constant 0 : index
    %641 = vector.load %arg16[%c0_360, %c0_361] : memref<8x128xf32, #tpu.memory_space<vmem>>, vector<8x128xf32>
    %642 = arith.mulf %630, %641 : vector<8x128xf32>
    %643 = arith.mulf %622, %640 : vector<8x128xf32>
    %644 = arith.addf %642, %643 : vector<8x128xf32>
    %645 = math.tanh %644 : vector<8x128xf32>
    %646 = arith.mulf %638, %645 : vector<8x128xf32>
    %c0_362 = arith.constant 0 : index
    %c0_363 = arith.constant 0 : index
    %647 = vector.load %arg15[%c0_362, %c0_363] : memref<8x128xf32, #tpu.memory_space<vmem>>, vector<8x128xf32>
    tpu.vector_store %arg15[%c0_362, %c0_363], %646 {strides = array<i32>} : memref<8x128xf32, #tpu.memory_space<vmem>>, vector<8x128xf32>,
    %c0_364 = arith.constant 0 : index
    %c0_365 = arith.constant 0 : index
    %648 = vector.load %arg16[%c0_364, %c0_365] : memref<8x128xf32, #tpu.memory_space<vmem>>, vector<8x128xf32>
    tpu.vector_store %arg16[%c0_364, %c0_365], %644 {strides = array<i32>} : memref<8x128xf32, #tpu.memory_space<vmem>>, vector<8x128xf32>,
    %c0_366 = arith.constant 0 : index
    %649 = arith.index_cast %c6_i32 : i32 to index
    %c0_367 = arith.constant 0 : index
    %c0_368 = arith.constant 0 : index
    %650 = vector.load %arg10[%c0_366, %649, %c0_367, %c0_368] : memref<1x8x8x128xf32, #tpu.memory_space<vmem>>, vector<1x1x8x128xf32>
    %651 = vector.shape_cast %650 : vector<1x1x8x128xf32> to vector<8x128xf32>
    %652 = vector.shape_cast %646 : vector<8x128xf32> to vector<1x1x8x128xf32>
    tpu.vector_store %arg10[%c0_366, %649, %c0_367, %c0_368], %652 {strides = array<i32>} : memref<1x8x8x128xf32, #tpu.memory_space<vmem>>, vector<1x1x8x128xf32>,
    %c7_i32 = arith.constant 7 : i32
    %c0_369 = arith.constant 0 : index
    %653 = arith.index_cast %c7_i32 : i32 to index
    %c0_370 = arith.constant 0 : index
    %c0_371 = arith.constant 0 : index
    %654 = vector.load %arg3[%c0_369, %653, %c0_370, %c0_371] : memref<1x8x128x128xf32, #tpu.memory_space<vmem>>, vector<1x1x128x128xf32>
    %655 = vector.shape_cast %654 : vector<1x1x128x128xf32> to vector<128x128xf32>
    %c0_372 = arith.constant 0 : index
    %656 = arith.index_cast %c7_i32 : i32 to index
    %c0_373 = arith.constant 0 : index
    %c0_374 = arith.constant 0 : index
    %657 = vector.load %arg2[%c0_372, %656, %c0_373, %c0_374] : memref<1x8x8x128xf32, #tpu.memory_space<vmem>>, vector<1x1x8x128xf32>
    %658 = vector.shape_cast %657 : vector<1x1x8x128xf32> to vector<8x128xf32>
    %cst_375 = arith.constant dense<0.000000e+00> : vector<8x128xf32>
    %659 = tpu.matmul %658, %655, %cst_375 {dimension_numbers = #tpu.dot_dimension_numbers<[1], [0], [0], [1], [0, 0, 1, 1], [], []>} : vector<8x128xf32>, vector<128x128xf32>, vector<8x128xf32> -> vector<8x128xf32>
    %c0_376 = arith.constant 0 : index
    %c0_377 = arith.constant 0 : index
    %660 = vector.load %arg13[%c0_376, %c0_377] : memref<8x128xf32, #tpu.memory_space<vmem>>, vector<8x128xf32>
    %cst_378 = arith.constant dense<0.000000e+00> : vector<8x128xf32>
    %661 = tpu.matmul %660, %655, %cst_378 {dimension_numbers = #tpu.dot_dimension_numbers<[1], [0], [0], [1], [0, 0, 1, 1], [], []>} : vector<8x128xf32>, vector<128x128xf32>, vector<8x128xf32> -> vector<8x128xf32>
    %cst_379 = arith.constant dense<0.000000e+00> : vector<32x128xf32>
    %662 = tpu.matmul %3, %659, %cst_379 {dimension_numbers = #tpu.dot_dimension_numbers<[1], [0], [0], [1], [0, 0, 1, 1], [], []>} : vector<32x8xf32>, vector<8x128xf32>, vector<32x128xf32> -> vector<32x128xf32>
    %cst_380 = arith.constant dense<0.000000e+00> : vector<32x128xf32>
    %663 = tpu.matmul %4, %661, %cst_380 {dimension_numbers = #tpu.dot_dimension_numbers<[1], [0], [0], [1], [0, 0, 1, 1], [], []>} : vector<32x8xf32>, vector<8x128xf32>, vector<32x128xf32> -> vector<32x128xf32>
    %664 = arith.addf %662, %663 : vector<32x128xf32>
    %665 = arith.addf %664, %5 : vector<32x128xf32>
    %666 = vector.extract_strided_slice %665 {offsets = [0, 0], sizes = [8, 128], strides = [1, 1]} : vector<32x128xf32> to vector<8x128xf32>
    %cst_381 = arith.constant 5.000000e-01 : f32
    %667 = vector.broadcast %cst_381 : f32 to vector<8x128xf32>
    %668 = arith.mulf %667, %666 : vector<8x128xf32>
    %669 = math.tanh %668 : vector<8x128xf32>
    %cst_382 = arith.constant 1.000000e+00 : f32
    %670 = vector.broadcast %cst_382 : f32 to vector<8x128xf32>
    %671 = arith.addf %669, %670 : vector<8x128xf32>
    %cst_383 = arith.constant 5.000000e-01 : f32
    %672 = vector.broadcast %cst_383 : f32 to vector<8x128xf32>
    %673 = arith.mulf %672, %671 : vector<8x128xf32>
    %674 = vector.extract_strided_slice %665 {offsets = [8, 0], sizes = [8, 128], strides = [1, 1]} : vector<32x128xf32> to vector<8x128xf32>
    %cst_384 = arith.constant 5.000000e-01 : f32
    %675 = vector.broadcast %cst_384 : f32 to vector<8x128xf32>
    %676 = arith.mulf %675, %674 : vector<8x128xf32>
    %677 = math.tanh %676 : vector<8x128xf32>
    %cst_385 = arith.constant 1.000000e+00 : f32
    %678 = vector.broadcast %cst_385 : f32 to vector<8x128xf32>
    %679 = arith.addf %677, %678 : vector<8x128xf32>
    %cst_386 = arith.constant 5.000000e-01 : f32
    %680 = vector.broadcast %cst_386 : f32 to vector<8x128xf32>
    %681 = arith.mulf %680, %679 : vector<8x128xf32>
    %682 = vector.extract_strided_slice %665 {offsets = [16, 0], sizes = [8, 128], strides = [1, 1]} : vector<32x128xf32> to vector<8x128xf32>
    %cst_387 = arith.constant 5.000000e-01 : f32
    %683 = vector.broadcast %cst_387 : f32 to vector<8x128xf32>
    %684 = arith.mulf %683, %682 : vector<8x128xf32>
    %685 = math.tanh %684 : vector<8x128xf32>
    %cst_388 = arith.constant 1.000000e+00 : f32
    %686 = vector.broadcast %cst_388 : f32 to vector<8x128xf32>
    %687 = arith.addf %685, %686 : vector<8x128xf32>
    %cst_389 = arith.constant 5.000000e-01 : f32
    %688 = vector.broadcast %cst_389 : f32 to vector<8x128xf32>
    %689 = arith.mulf %688, %687 : vector<8x128xf32>
    %690 = vector.extract_strided_slice %665 {offsets = [24, 0], sizes = [8, 128], strides = [1, 1]} : vector<32x128xf32> to vector<8x128xf32>
    %691 = math.tanh %690 : vector<8x128xf32>
    %c0_390 = arith.constant 0 : index
    %c0_391 = arith.constant 0 : index
    %692 = vector.load %arg14[%c0_390, %c0_391] : memref<8x128xf32, #tpu.memory_space<vmem>>, vector<8x128xf32>
    %693 = arith.mulf %681, %692 : vector<8x128xf32>
    %694 = arith.mulf %673, %691 : vector<8x128xf32>
    %695 = arith.addf %693, %694 : vector<8x128xf32>
    %696 = math.tanh %695 : vector<8x128xf32>
    %697 = arith.mulf %689, %696 : vector<8x128xf32>
    %c0_392 = arith.constant 0 : index
    %c0_393 = arith.constant 0 : index
    %698 = vector.load %arg13[%c0_392, %c0_393] : memref<8x128xf32, #tpu.memory_space<vmem>>, vector<8x128xf32>
    tpu.vector_store %arg13[%c0_392, %c0_393], %697 {strides = array<i32>} : memref<8x128xf32, #tpu.memory_space<vmem>>, vector<8x128xf32>,
    %c0_394 = arith.constant 0 : index
    %c0_395 = arith.constant 0 : index
    %699 = vector.load %arg14[%c0_394, %c0_395] : memref<8x128xf32, #tpu.memory_space<vmem>>, vector<8x128xf32>
    tpu.vector_store %arg14[%c0_394, %c0_395], %695 {strides = array<i32>} : memref<8x128xf32, #tpu.memory_space<vmem>>, vector<8x128xf32>,
    %cst_396 = arith.constant dense<0.000000e+00> : vector<8x128xf32>
    %700 = tpu.matmul %697, %655, %cst_396 {dimension_numbers = #tpu.dot_dimension_numbers<[1], [0], [0], [1], [0, 0, 1, 1], [], []>} : vector<8x128xf32>, vector<128x128xf32>, vector<8x128xf32> -> vector<8x128xf32>
    %c0_397 = arith.constant 0 : index
    %c0_398 = arith.constant 0 : index
    %701 = vector.load %arg15[%c0_397, %c0_398] : memref<8x128xf32, #tpu.memory_space<vmem>>, vector<8x128xf32>
    %cst_399 = arith.constant dense<0.000000e+00> : vector<8x128xf32>
    %702 = tpu.matmul %701, %655, %cst_399 {dimension_numbers = #tpu.dot_dimension_numbers<[1], [0], [0], [1], [0, 0, 1, 1], [], []>} : vector<8x128xf32>, vector<128x128xf32>, vector<8x128xf32> -> vector<8x128xf32>
    %cst_400 = arith.constant dense<0.000000e+00> : vector<32x128xf32>
    %703 = tpu.matmul %6, %700, %cst_400 {dimension_numbers = #tpu.dot_dimension_numbers<[1], [0], [0], [1], [0, 0, 1, 1], [], []>} : vector<32x8xf32>, vector<8x128xf32>, vector<32x128xf32> -> vector<32x128xf32>
    %cst_401 = arith.constant dense<0.000000e+00> : vector<32x128xf32>
    %704 = tpu.matmul %7, %702, %cst_401 {dimension_numbers = #tpu.dot_dimension_numbers<[1], [0], [0], [1], [0, 0, 1, 1], [], []>} : vector<32x8xf32>, vector<8x128xf32>, vector<32x128xf32> -> vector<32x128xf32>
    %705 = arith.addf %703, %704 : vector<32x128xf32>
    %706 = arith.addf %705, %8 : vector<32x128xf32>
    %707 = vector.extract_strided_slice %706 {offsets = [0, 0], sizes = [8, 128], strides = [1, 1]} : vector<32x128xf32> to vector<8x128xf32>
    %cst_402 = arith.constant 5.000000e-01 : f32
    %708 = vector.broadcast %cst_402 : f32 to vector<8x128xf32>
    %709 = arith.mulf %708, %707 : vector<8x128xf32>
    %710 = math.tanh %709 : vector<8x128xf32>
    %cst_403 = arith.constant 1.000000e+00 : f32
    %711 = vector.broadcast %cst_403 : f32 to vector<8x128xf32>
    %712 = arith.addf %710, %711 : vector<8x128xf32>
    %cst_404 = arith.constant 5.000000e-01 : f32
    %713 = vector.broadcast %cst_404 : f32 to vector<8x128xf32>
    %714 = arith.mulf %713, %712 : vector<8x128xf32>
    %715 = vector.extract_strided_slice %706 {offsets = [8, 0], sizes = [8, 128], strides = [1, 1]} : vector<32x128xf32> to vector<8x128xf32>
    %cst_405 = arith.constant 5.000000e-01 : f32
    %716 = vector.broadcast %cst_405 : f32 to vector<8x128xf32>
    %717 = arith.mulf %716, %715 : vector<8x128xf32>
    %718 = math.tanh %717 : vector<8x128xf32>
    %cst_406 = arith.constant 1.000000e+00 : f32
    %719 = vector.broadcast %cst_406 : f32 to vector<8x128xf32>
    %720 = arith.addf %718, %719 : vector<8x128xf32>
    %cst_407 = arith.constant 5.000000e-01 : f32
    %721 = vector.broadcast %cst_407 : f32 to vector<8x128xf32>
    %722 = arith.mulf %721, %720 : vector<8x128xf32>
    %723 = vector.extract_strided_slice %706 {offsets = [16, 0], sizes = [8, 128], strides = [1, 1]} : vector<32x128xf32> to vector<8x128xf32>
    %cst_408 = arith.constant 5.000000e-01 : f32
    %724 = vector.broadcast %cst_408 : f32 to vector<8x128xf32>
    %725 = arith.mulf %724, %723 : vector<8x128xf32>
    %726 = math.tanh %725 : vector<8x128xf32>
    %cst_409 = arith.constant 1.000000e+00 : f32
    %727 = vector.broadcast %cst_409 : f32 to vector<8x128xf32>
    %728 = arith.addf %726, %727 : vector<8x128xf32>
    %cst_410 = arith.constant 5.000000e-01 : f32
    %729 = vector.broadcast %cst_410 : f32 to vector<8x128xf32>
    %730 = arith.mulf %729, %728 : vector<8x128xf32>
    %731 = vector.extract_strided_slice %706 {offsets = [24, 0], sizes = [8, 128], strides = [1, 1]} : vector<32x128xf32> to vector<8x128xf32>
    %732 = math.tanh %731 : vector<8x128xf32>
    %c0_411 = arith.constant 0 : index
    %c0_412 = arith.constant 0 : index
    %733 = vector.load %arg16[%c0_411, %c0_412] : memref<8x128xf32, #tpu.memory_space<vmem>>, vector<8x128xf32>
    %734 = arith.mulf %722, %733 : vector<8x128xf32>
    %735 = arith.mulf %714, %732 : vector<8x128xf32>
    %736 = arith.addf %734, %735 : vector<8x128xf32>
    %737 = math.tanh %736 : vector<8x128xf32>
    %738 = arith.mulf %730, %737 : vector<8x128xf32>
    %c0_413 = arith.constant 0 : index
    %c0_414 = arith.constant 0 : index
    %739 = vector.load %arg15[%c0_413, %c0_414] : memref<8x128xf32, #tpu.memory_space<vmem>>, vector<8x128xf32>
    tpu.vector_store %arg15[%c0_413, %c0_414], %738 {strides = array<i32>} : memref<8x128xf32, #tpu.memory_space<vmem>>, vector<8x128xf32>,
    %c0_415 = arith.constant 0 : index
    %c0_416 = arith.constant 0 : index
    %740 = vector.load %arg16[%c0_415, %c0_416] : memref<8x128xf32, #tpu.memory_space<vmem>>, vector<8x128xf32>
    tpu.vector_store %arg16[%c0_415, %c0_416], %736 {strides = array<i32>} : memref<8x128xf32, #tpu.memory_space<vmem>>, vector<8x128xf32>,
    %c0_417 = arith.constant 0 : index
    %741 = arith.index_cast %c7_i32 : i32 to index
    %c0_418 = arith.constant 0 : index
    %c0_419 = arith.constant 0 : index
    %742 = vector.load %arg10[%c0_417, %741, %c0_418, %c0_419] : memref<1x8x8x128xf32, #tpu.memory_space<vmem>>, vector<1x1x8x128xf32>
    %743 = vector.shape_cast %742 : vector<1x1x8x128xf32> to vector<8x128xf32>
    %744 = vector.shape_cast %738 : vector<8x128xf32> to vector<1x1x8x128xf32>
    tpu.vector_store %arg10[%c0_417, %741, %c0_418, %c0_419], %744 {strides = array<i32>} : memref<1x8x8x128xf32, #tpu.memory_space<vmem>>, vector<1x1x8x128xf32>,
    %c8_i32 = arith.constant 8 : i32
    %c0_i32_420 = arith.constant 0 : i32
    %745 = arith.cmpi eq, %arg1, %c0_i32_420 : i32
    %746 = arith.extui %745 : i1 to i32
    %c0_i32_421 = arith.constant 0 : i32
    %747 = arith.cmpi ne, %746, %c0_i32_421 : i32
    scf.if %747 {
      %c0_422 = arith.constant 0 : index
      %c0_423 = arith.constant 0 : index
      %748 = vector.load %arg15[%c0_422, %c0_423] : memref<8x128xf32, #tpu.memory_space<vmem>>, vector<8x128xf32>
      %c0_424 = arith.constant 0 : index
      %c0_425 = arith.constant 0 : index
      %c0_426 = arith.constant 0 : index
      %749 = vector.load %arg11[%c0_424, %c0_425, %c0_426] : memref<1x8x128xf32, #tpu.memory_space<vmem>>, vector<1x8x128xf32>
      %750 = vector.shape_cast %749 : vector<1x8x128xf32> to vector<8x128xf32>
      %751 = vector.shape_cast %748 : vector<8x128xf32> to vector<1x8x128xf32>
      tpu.vector_store %arg11[%c0_424, %c0_425, %c0_426], %751 {strides = array<i32>} : memref<1x8x128xf32, #tpu.memory_space<vmem>>, vector<1x8x128xf32>,
      %c0_427 = arith.constant 0 : index
      %c0_428 = arith.constant 0 : index
      %752 = vector.load %arg16[%c0_427, %c0_428] : memref<8x128xf32, #tpu.memory_space<vmem>>, vector<8x128xf32>
      %c0_429 = arith.constant 0 : index
      %c0_430 = arith.constant 0 : index
      %c0_431 = arith.constant 0 : index
      %753 = vector.load %arg12[%c0_429, %c0_430, %c0_431] : memref<1x8x128xf32, #tpu.memory_space<vmem>>, vector<1x8x128xf32>
      %754 = vector.shape_cast %753 : vector<1x8x128xf32> to vector<8x128xf32>
      %755 = vector.shape_cast %752 : vector<8x128xf32> to vector<1x8x128xf32>
      tpu.vector_store %arg12[%c0_429, %c0_430, %c0_431], %755 {strides = array<i32>} : memref<1x8x128xf32, #tpu.memory_space<vmem>>, vector<1x8x128xf32>,
    } else {
    }
    return
  }
  func.func @transform_0(%arg0: i32, %arg1: i32) -> (i32, i32, i32, i32) {
    %c0_i32 = arith.constant 0 : i32
    %c0_i32_0 = arith.constant 0 : i32
    %c0_i32_1 = arith.constant 0 : i32
    return %arg0, %arg1, %c0_i32, %c0_i32_0 : i32, i32, i32, i32
  }
  func.func @transform_1(%arg0: i32, %arg1: i32) -> (i32, i32, i32, i32) {
    %c0_i32 = arith.constant 0 : i32
    %c0_i32_0 = arith.constant 0 : i32
    %c0_i32_1 = arith.constant 0 : i32
    return %arg0, %arg1, %c0_i32, %c0_i32_0 : i32, i32, i32, i32
  }
  func.func @transform_2(%arg0: i32, %arg1: i32) -> (i32, i32) {
    %c0_i32 = arith.constant 0 : i32
    %c0_i32_0 = arith.constant 0 : i32
    %c0_i32_1 = arith.constant 0 : i32
    return %c0_i32, %c0_i32_0 : i32, i32
  }
  func.func @transform_3(%arg0: i32, %arg1: i32) -> (i32, i32) {
    %c0_i32 = arith.constant 0 : i32
    %c0_i32_0 = arith.constant 0 : i32
    %c0_i32_1 = arith.constant 0 : i32
    return %c0_i32, %c0_i32_0 : i32, i32
  }
  func.func @transform_4(%arg0: i32, %arg1: i32) -> (i32, i32) {
    %c0_i32 = arith.constant 0 : i32
    %c0_i32_0 = arith.constant 0 : i32
    %c0_i32_1 = arith.constant 0 : i32
    return %c0_i32, %c0_i32_0 : i32, i32
  }
  func.func @transform_5(%arg0: i32, %arg1: i32) -> (i32, i32) {
    %c0_i32 = arith.constant 0 : i32
    %c0_i32_0 = arith.constant 0 : i32
    %c0_i32_1 = arith.constant 0 : i32
    return %c0_i32, %c0_i32_0 : i32, i32
  }
  func.func @transform_6(%arg0: i32, %arg1: i32) -> (i32, i32) {
    %c0_i32 = arith.constant 0 : i32
    %c0_i32_0 = arith.constant 0 : i32
    %c0_i32_1 = arith.constant 0 : i32
    return %c0_i32, %c0_i32_0 : i32, i32
  }
  func.func @transform_7(%arg0: i32, %arg1: i32) -> (i32, i32) {
    %c0_i32 = arith.constant 0 : i32
    %c0_i32_0 = arith.constant 0 : i32
    %c0_i32_1 = arith.constant 0 : i32
    return %c0_i32, %c0_i32_0 : i32, i32
  }
  func.func @transform_8(%arg0: i32, %arg1: i32) -> (i32, i32, i32, i32) {
    %c0_i32 = arith.constant 0 : i32
    %c0_i32_0 = arith.constant 0 : i32
    %c0_i32_1 = arith.constant 0 : i32
    return %arg0, %arg1, %c0_i32, %c0_i32_0 : i32, i32, i32, i32
  }
  func.func @transform_9(%arg0: i32, %arg1: i32) -> (i32, i32, i32) {
    %c0_i32 = arith.constant 0 : i32
    %c0_i32_0 = arith.constant 0 : i32
    %c0_i32_1 = arith.constant 0 : i32
    return %arg0, %c0_i32, %c0_i32_0 : i32, i32, i32
  }
  func.func @transform_10(%arg0: i32, %arg1: i32) -> (i32, i32, i32) {
    %c0_i32 = arith.constant 0 : i32
    %c0_i32_0 = arith.constant 0 : i32
    %c0_i32_1 = arith.constant 0 : i32
    return %arg0, %c0_i32, %c0_i32_0 : i32, i32, i32
  }
}

</mosaic_0001>

<bundles_post_ra>
// kernel: tpu_custom_call.1
= control target key start
LH: loop header
LB: loop body
LE: loop exit
PB: predicated region body
PF: predicated region fallthrough
CT: control target
= control target key end

     0   :  { %s11969_s0 = inlined_call_operand.vmem [shape: f32[2,8,8,128], index: 0, kind: input, shape index: {}]   ;;  %s11970_s1 = inlined_call_operand.hbm [shape: f32[2,8,128,128], index: 1, kind: input, shape index: {}]   ;;  %s11971_s2 = inlined_call_operand.vmem [shape: f32[32,8], index: 2, kind: input, shape index: {}]   ;;  %s11972_s3 = inlined_call_operand.vmem [shape: f32[32,8], index: 3, kind: input, shape index: {}]   ;;  %s11973_s4 = inlined_call_operand.vmem [shape: f32[32,128], index: 4, kind: input, shape index: {}]   ;;  %s11974_s5 = inlined_call_operand.vmem [shape: f32[32,8], index: 5, kind: input, shape index: {}]   ;;  %s11975_s6 = inlined_call_operand.vmem [shape: f32[32,8], index: 6, kind: input, shape index: {}]   ;;  %s11976_s7 = inlined_call_operand.hbm [shape: f32[32,128], index: 7, kind: input, shape index: {}]   ;;  %s11977_s8 = inlined_call_operand.hbm [shape: f32[2,8,8,128], index: 8, kind: output, shape index: {0}]   ;;  %s11978_s9 = inlined_call_operand.hbm [shape: f32[2,8,128], index: 9, kind: output, shape index: {1}]   ;;  %s11979_s10 = inlined_call_operand.hbm [shape: f32[2,8,128], index: 10, kind: output, shape index: {2}]  }
   0x1   :  { %11989 = sst [smem:[#allocation21_spill]] %s11969_s0 }
   0x2   :  { %11990 = sst [smem:[#allocation22_spill]] %s11970_s1 }
   0x3   :  { %11991 = sst [smem:[#allocation23_spill]] %s11971_s2 }
   0x4   :  { %11992 = sst [smem:[#allocation24_spill]] %s11972_s3 }
   0x5   :  { %11993 = sst [smem:[#allocation25_spill]] %s11976_s7 }
   0x6   :  { %11994 = sst [smem:[#allocation26_spill]] %s11979_s10 }
   0x7   :  { %16 = vsyncpa [#allocation7], 0 }
   0x8   :  { %18 = vsyncpa [#allocation7 + $0x1], 0 }
   0x9   :  { %19 = vsyncpa [#allocation10], 0 }
   0xa   :  { %20 = vsyncpa [#allocation8], 0 }
   0xb   :  { %22 = vsyncpa [#allocation8 + $0x1], 0 }
   0xc   :  { %23 = vsyncpa [#allocation13], 0 }
   0xd   :  { %25 = vsyncpa [#allocation13 + $0x1], 0  ;;  %s10090_s13 = smov 0   ;;  %s10092_s14 = smov 0  }
   0xe   :  { %s10094_s15 = smov 0   ;;  %s10096_s16 = smov 0  }
   0xf   :  { %s10098_s17 = smov 0   ;;  %s10100_s18 = smov 0  }
  0x10 LB: > { %11995 = sst [smem:[#allocation19_spill]] %s10001_s13  ;;  %s10121_s19 = sadd.s32 4294967295, %s10021_s18   ;;  %s10021_s18 = sphi %s10100_s18, %s31_s18   ;;  %s10017_s17 = sphi %s10098_s17, %s12026_s17   ;;  %s10013_s16 = sphi %s10096_s16, %s12025_s16   ;;  %s10009_s15 = sphi %s10094_s15, %s12024_s15   ;;  %s10005_s14 = sphi %s10092_s14, %s12023_s14   ;;  %s10001_s13 = sphi %s10090_s13, %s12022_s13  }
  0x11   : > { %s11980_s20 = sadd.s32 4294967294, %s10021_s18   ;;  %p93_p0 = scmp.ne.s32.totalorder %s10005_s14, %s10001_s13 }
  0x12   : > { %p11982_p1 = scmp.eq.s32.totalorder %s10121_s19, 0  ;;  %p251_p3 = scmp.eq.s32.totalorder %s11980_s20, 1 }
  0x13   : > { %p6327_p5 = scmp.ge.s32.totalorder %s10021_s18, 1  ;;  %p310_p7 = scmp.lt.s32.totalorder %s10021_s18, 3 }
  0x14   : > { %p10132_p4 = por %p11982_p1, %p93_p0  ;;  %p10137_p6 = por %p251_p3, %p93_p0 }
  0x15   : > { %p10142_p8 = pnand %p6327_p5, %p310_p7  ;;  %s10023_s24 = smov [#allocation9]  }
  0x16   : > { %s11996_s21 = scalar_select %p10132_p4, 1, 0 }
  0x17   : > { %s11997_s22 = scalar_select %p10137_p6, 1, 0 }
  0x18   : > { %s11999_s23 = scalar_select %p10142_p8, 1, 0 }
  0x19   : > { %11998 = sst [smem:[#allocation20_spill]] %s11997_s22  ;;  %s337_s25 = sshll.u32 %s10023_s24, 4  ;;  %s338_s25 = int_to_ptr.vmem [resolvable:$true] %s337_s25 }
  0x1a   : > { %p9531_p9 = pneg %p10142_p8  ;;  %s43_s27 = sadd.s32 1, %s10017_s17 }
  0x1b   : > { %s12001_s7 = sld [smem:[#allocation25_spill]] }
  0x1c   : > { %p10151_p11 = pnand %p9531_p9, %p11982_p1 }
  0x1e   : > { %p9819_p13 = pneg %p10151_p11 }
  0x21   : > { %s9817_s30 = scalar_lea.hbm %s12001_s7, 512 }
  0x22   : > { %p9818_p12 = scmp.ne.s32.totalorder %s12001_s7, %s9817_s30  ;;  %p9824_p5 = scmp.lt.u32.totalorder %s9817_s30, %s12001_s7 }
  0x24   : > { %p9820_p0 = pnand %p9819_p13, %p9818_p12 }
  0x26   : > { %p9821_p3 = pneg %p9820_p0 }
  0x28   : > { %p9826_p7 = pnand %p9824_p5, %p9821_p3 }
  0x2a   : > { %9829 = shalt.err (!%p9826_p7)
}
  0x2b   : > { %s9830_s22 = scalar_lea.vmem %s338_s25, 512  ;;  %p9838_p2 = scmp.lt.s32.totalorder %s338_s25, %s338_s25 }
  0x2c   : > { %p9831_p9 = scmp.ne.s32.totalorder %s338_s25, %s9830_s22  ;;  %p9839_p6 = scmp.lt.s32.totalorder %s9830_s22, %s9830_s22 }
  0x2e   : > { %p9833_p10 = pnand %p9831_p9, %p9819_p13  ;;  %p9840_p4 = por %p9839_p6, %p9838_p2 }
  0x30   : > { %p9834_p1 = pneg %p9833_p10 }
  0x32   : > { %p9841_p8 = pnand %p9840_p4, %p9834_p1 }
  0x34   : > { %9844 = shalt.err (!%p9841_p8)
}
  0x35   : > { %s11985_s28 = smov 128   ;;  %s11986_s20 = smov 8  }
  0x36   : > { %9534 = dma.hbm_to_vmem [thread:$0]  (!%p10151_p11), %s12001_s7, 512, %s338_s25, [#allocation10], %s11985_s28, %s11985_s28, %s11986_s20  }
  0x37   : > { %p45_p1 = scmp.ge.s32.totalorder %s43_s27, 2  ;;  %s80_s30 = sadd.s32 1, %s10009_s15 }
  0x38   : > { %p87_p2 = scmp.ne.s32.totalorder %s10009_s15, %s10005_s14  ;;  %p88_p4 = scmp.eq.s32.totalorder %s10021_s18, 0 }
  0x39   : > { %s12028_s27 = smov (%p45_p1, %s43_s27), 0  ;;  %p12003_p8 = scmp.eq.s32.totalorder %s10121_s19, 1 }
  0x3a   : > { %p10181_p6 = por %p88_p4, %p87_p2  ;;  %s75_s12 = ssub.s32 %s10017_s17, %s12028_s27 }
  0x3b   : > { %p10187_p10 = por %p12003_p8, %p87_p2  ;;  %p9550_p12 = scmp.lt.s32.totalorder %s10021_s18, 2 }
  0x3c   : > { %p78_p11 = scmp.eq.s32.totalorder %s75_s12, 0  ;;  %s364_s25 = sand.u32 1, %s10009_s15  }
  0x3d   : > { %s6330_s24 = sshll.u32 %s364_s25, 10  ;;  %s6604_s29 = sshll.u32 %s10017_s17, 14 }
  0x3e   : > { %s10196_s22 = scalar_select %p78_p11, %s10009_s15, %s80_s30  }
  0x3f   : > { %s12005_s1 = sld [smem:[#allocation22_spill]]  ;;  %s368_s13 = scalar_lea.vmem [#allocation6], %s6330_s24 }
  0x40   : > { %s378_s10 = sshll.u32 %s368_s13, 4  ;;  %p10208_p13 = pnand %p9550_p12, %p10181_p6  ;;  %s10204_s10 = int_to_ptr.vmem [resolvable:$true] %s378_s10 }
  0x41   : > { %s10212_s30 = scalar_lea.sflag [#allocation7], %s364_s25 }
  0x42   : > { %p9847_p3 = pneg %p10208_p13 }
  0x45   : > { %s10202_s7 = scalar_lea.hbm %s12005_s1, %s6604_s29  ;;  %s9850_s11 = scalar_lea.hbm %s12005_s1, 32768 }
  0x46   : > { %s9845_s28 = scalar_lea.hbm %s10202_s7, 16384  ;;  %p9851_p9 = scmp.lt.u32.totalorder %s10202_s7, %s12005_s1 }
  0x47   : > { %p9846_p0 = scmp.ne.s32.totalorder %s10202_s7, %s9845_s28  ;;  %p9852_p1 = scmp.lt.u32.totalorder %s9850_s11, %s9845_s28 }
  0x48   : > { %p9854_p4 = scmp.lt.u32.totalorder %s9845_s28, %s10202_s7 }
  0x49   : > { %p9848_p5 = pnand %p9847_p3, %p9846_p0  ;;  %p9853_p2 = por %p9852_p1, %p9851_p9 }
  0x4b   : > { %p9849_p7 = pneg %p9848_p5  ;;  %p9855_p6 = por %p9854_p4, %p9853_p2 }
  0x4d   : > { %p9856_p8 = pnand %p9855_p6, %p9849_p7 }
  0x4f   : > { %9859 = shalt.err (!%p9856_p8)
}
  0x50   : > { %s9860_s25 = scalar_lea.vmem %s10204_s10, 16384  ;;  %s10026_s13 = smov [#allocation6]  }
  0x51   : > { %p9861_p12 = scmp.ne.s32.totalorder %s10204_s10, %s9860_s25  ;;  %s9865_s20 = sshll.u32 %s10026_s13, 4  ;;  %s9866_s20 = int_to_ptr.vmem [resolvable:$false] %s9865_s20 }
  0x52   : > { %s9867_s24 = scalar_lea.vmem %s9866_s20, 32768  ;;  %p9868_p5 = scmp.lt.s32.totalorder %s10204_s10, %s9866_s20 }
  0x53   : > { %p9863_p11 = pnand %p9861_p12, %p9847_p3  ;;  %p9869_p9 = scmp.lt.s32.totalorder %s9867_s24, %s9860_s25 }
  0x55   : > { %p9864_p0 = pneg %p9863_p11  ;;  %p9870_p1 = por %p9869_p9, %p9868_p5 }
  0x57   : > { %p9871_p2 = pnand %p9870_p1, %p9864_p0 }
  0x59   : > { %9874 = shalt.err (!%p9871_p2)
}
  0x5a   : > { %s12007_s28 = smov 8   ;;  %s12008_s11 = smov 128  }
  0x5b   : > { %9538 = dma.hbm_to_vmem [thread:$0]  (!%p10208_p13), %s10202_s7, 16384, %s10204_s10, %s10212_s30, %s12008_s11, %s12008_s11, %s12007_s28  }
  0x5c   : > { %p12009_p3 = scmp.ne.s32.totalorder %s11999_s23, 0 }
  0x5d   : > { %s10246_s29 = sand.u32 (!%p12009_p3), 1, %s10005_s14   ;;  %p12010_p7 = scmp.ne.s32.totalorder (!%p12009_p3), %s11996_s21, 0 }
  0x5e   : > { %390 = sbr.rel (%p12009_p3) target bundleno = 6152 (0x1808), region = 52  ;;  %s6334_s25 = sshll.u32 (!%p12009_p3), %s10246_s29, 10 }
  0x5f   : > { %s393_s13 = scalar_lea.sflag (!%p12009_p3), [#allocation7], %s10246_s29  ;;  %s10250_s20 = scalar_lea.vmem (!%p12009_p3), [#allocation6], %s6334_s25 }
  0x65   : > { %9984 = dma.done.wait (%p12010_p7), %s393_s13, 16384  }
  0x66   : > { %9986 = vsyncadd (%p12010_p7), %s393_s13, 4294950912  ;;  %p12011_p13 = scmp.eq.s32.totalorder %s10121_s19, 0 }
  0x68   : > { %9988 = dma.done.wait (%p12011_p13), [#allocation10], 512   ;;  %p12012_p4 = pmov %p12011_p13 }
  0x69   : > { %v10027_v0 = vmov 0.0|0.0   ;;  %vm10028_vm0 = vmmov 0   ;;  %v10029_v1 = vmov 0.0   ;;  %v500_v2 = vld [vmem:[%s10250_s20] sm:$0xff]  ;;  %v501_v3 = vld [vmem:[%s10250_s20 + $0x8] sm:$0xff]  ;;  %v502_v4 = vld [vmem:[%s10250_s20 + $0x10] sm:$0xff] }
  0x6a   : > { %9990 = vsyncadd (%p12012_p4), [#allocation10], 4294966784  ;;  %8711 = vmatprep.subr.bf16.mxu1 %v10027_v0  ;;  %8687 = vmatprep.subr.bf16.mxu0 %v10027_v0  ;;  %v10269_v5 = vpack.c.bf16 %v501_v3, %v500_v2  ;;  %v503_v6 = vld [vmem:[%s10250_s20 + $0x18] sm:$0xff]  ;;  %v504_v8 = vld [vmem:[%s10250_s20 + $0x20] sm:$0xff]  ;;  %p457_p6 = scmp.lt.s32.totalorder %s10013_s16, 1  ;;  %s12013_s0 = sld [smem:[#allocation21_spill]] }
  0x6b   : > { %7378 = vmatprep.mubr.msk.f32.mxu1 %vm10028_vm0, %v10029_v1  ;;  %7343 = vmatprep.mubr.msk.f32.mxu0 %vm10028_vm0, %v10029_v1  ;;  %v10273_v7 = vpack.c.bf16 %v503_v6, %v502_v4  ;;  %v505_v9 = vld [vmem:[%s10250_s20 + $0x28] sm:$0xff]  ;;  %v506_v11 = vld [vmem:[%s10250_s20 + $0x30] sm:$0xff]  ;;  %v507_v12 = vld [vmem:[%s10250_s20 + $0x38] sm:$0xff]  ;;  %s12014_s3 = sld [smem:[#allocation24_spill]]  ;;  %vm658_vm1 = vcmask 64512   ;;  %s12015_s2 = sld [smem:[#allocation23_spill]] }
  0x6c   : > { %8713 = vmatpush3.bf16.msra.mxu1 %v10269_v5  ;;  %8689 = vmatpush3.bf16.msra.mxu0 %v10269_v5  ;;  %v10281_v10 = vpack.c.bf16 %v505_v9, %v504_v8  ;;  %v10289_v13 = vpack.c.bf16 %v507_v12, %v506_v11  ;;  %v508_v14 = vld [vmem:[%s10250_s20 + $0x40] sm:$0xff]  ;;  %v509_v15 = vld [vmem:[%s10250_s20 + $0x48] sm:$0xff]  ;;  %v510_v17 = vld [vmem:[%s10250_s20 + $0x50] sm:$0xff]  ;;  %s458_s7 = scalar_select %p457_p6, %s10013_s16, 1 }
  0x6d   : > { %8714 = vmatprep.subr.bf16.mxu1 %v10027_v0  ;;  %8690 = vmatprep.subr.bf16.mxu0 %v10027_v0  ;;  %v10297_v16 = vpack.c.bf16 %v509_v15, %v508_v14  ;;  %v511_v18 = vld [vmem:[%s10250_s20 + $0x58] sm:$0xff]  ;;  %v512_v20 = vld [vmem:[%s10250_s20 + $0x60] sm:$0xff]  ;;  %v513_v21 = vld [vmem:[%s10250_s20 + $0x68] sm:$0xff]  ;;  %s6336_s30 = sshll.u32 %s10246_s29, 6  ;;  %s6337_s21 = sshll.u32 %s10246_s29, 3 }
  0x6e   : > { %v10306_v19 = vpack.c.bf16 %v511_v18, %v510_v17  ;;  %v10315_v22 = vpack.c.bf16 %v513_v21, %v512_v20  ;;  %v514_v23 = vld [vmem:[%s10250_s20 + $0x70] sm:$0xff]  ;;  %v515_v24 = vld [vmem:[%s10250_s20 + $0x78] sm:$0xff]  ;;  %s6605_s10 = sshll.u32 %s458_s7, 6  ;;  %v10436_v39 = vld [vmem:[%s11973_s4 + $0x8] sm:$0xff]  ;;  %s10627_s24 = scalar_lea.vmem [#allocation11], %s6336_s30 }
  0x6f   : > { %v10323_v25 = vpack.c.bf16 %v515_v24, %v514_v23  ;;  %v10441_v40 = vld [vmem:[%s11973_s4] sm:$0xff]  ;;  %v10448_v46 = vld [vmem:[%s11973_s4 + $0x18] sm:$0xff]  ;;  %v10454_v51 = vld [vmem:[%s11973_s4 + $0x10] sm:$0xff]  ;;  %s455_s23 = scalar_lea.vmem [#allocation14], %s6337_s21  ;;  %s6102_s30 = sand.u32 1, %s10121_s19  }
  0x70   : > { %8716 = vmatpush3.bf16.msra.mxu1 %v10273_v7  ;;  %8692 = vmatpush3.bf16.msra.mxu0 %v10273_v7  ;;  %s10331_s12 = scalar_lea.vmem %s12013_s0, %s6605_s10  ;;  %v10465_v9 = vld [vmem:[%s11975_s6] sm:$0xff]  ;;  %v10478_v11 = vld [vmem:[%s11975_s6 + $0x10] sm:$0xff]  ;;  %v10487_v12 = vld [vmem:[%s11975_s6 + $0x18] sm:$0xff]  ;;  %s6600_s28 = sshll.u32 %s10013_s16, 7 }
  0x71   : > { %8717 = vmatprep.subr.bf16.mxu1 %v10027_v0  ;;  %8693 = vmatprep.subr.bf16.mxu0 %v10027_v0  ;;  %v516_v26 = vld [vmem:[%s10331_s12] sm:$0xff]  ;;  %v10365_v29 = vld [vmem:[%s12014_s3 + $0x8] sm:$0xff]  ;;  %v10370_v32 = vld [vmem:[%s12014_s3 + $0x10] sm:$0xff]  ;;  %s448_s11 = scalar_lea.vmem [#allocation12], %s6337_s21  ;;  %s6606_s13 = sshll.u32 %s10013_s16, 10 }
  0x72   : > { %v10358_v27 = vld [vmem:[%s12014_s3] sm:$0xff]  ;;  %v10379_v34 = vld [vmem:[%s12014_s3 + $0x18] sm:$0xff]  ;;  %v10394_v36 = vld [vmem:[%s12015_s2 + $0x8] sm:$0xff]  ;;  %s6139_s25 = sshll.u32 %s448_s11, 4  ;;  %s11855_s10 = scalar_lea.hbm %s11978_s9, %s6600_s28  ;;  %s11857_s25 = int_to_ptr.vmem [resolvable:$true] %s6139_s25 }
  0x73   : > { %v10384_v35 = vld [vmem:[%s12015_s2] sm:$0xff]  ;;  %v10399_v37 = vld [vmem:[%s12015_s2 + $0x10] sm:$0xff]  ;;  %v10408_v38 = vld [vmem:[%s12015_s2 + $0x18] sm:$0xff]  ;;  %s6152_s0 = sshll.u32 %s455_s23, 4  ;;  %s11862_s16 = scalar_lea.hbm %s11977_s8, %s6606_s13  ;;  %s11872_s0 = int_to_ptr.vmem [resolvable:$true] %s6152_s0 }
  0x74   : > { %8719 = vmatpush3.bf16.msra.mxu1 %v10281_v10  ;;  %8695 = vmatpush3.bf16.msra.mxu0 %v10281_v10  ;;  %v6357_v14 = vld [vmem:[%s10250_s20 + $0x80] sm:$0xff]  ;;  %v6358_v15 = vld [vmem:[%s10250_s20 + $0x88] sm:$0xff]  ;;  %v6359_v17 = vld [vmem:[%s10250_s20 + $0x90] sm:$0xff]  ;;  %s12016_s7 = sld [smem:[#allocation26_spill]]  ;;  %s10030_s1 = smov [#allocation12]  }
  0x75   : > { %8720 = vmatprep.subr.bf16.mxu1 %v10027_v0  ;;  %8696 = vmatprep.subr.bf16.mxu0 %v10027_v0  ;;  %v6360_v18 = vld [vmem:[%s10250_s20 + $0x98] sm:$0xff]  ;;  %v6361_v20 = vld [vmem:[%s10250_s20 + $0xa0] sm:$0xff]  ;;  %v6362_v21 = vld [vmem:[%s10250_s20 + $0xa8] sm:$0xff]  ;;  %s9879_s13 = sshll.u32 %s10030_s1, 4  ;;  %s9880_s13 = int_to_ptr.vmem [resolvable:$false] %s9879_s13 }
  0x76   : > { %v6363_v23 = vld [vmem:[%s10250_s20 + $0xb0] sm:$0xff]  ;;  %v6364_v24 = vld [vmem:[%s10250_s20 + $0xb8] sm:$0xff]  ;;  %s9881_s19 = scalar_lea.vmem %s9880_s13, 256  ;;  %p9882_p0 = scmp.lt.s32.totalorder %s11857_s25, %s9880_s13 }
  0x78   : > { %8722 = vmatpush3.bf16.msra.mxu1 %v10289_v13  ;;  %8698 = vmatpush3.bf16.msra.mxu0 %v10289_v13 }
  0x79   : > { %8723 = vmatprep.subr.bf16.mxu1 %v10027_v0  ;;  %8699 = vmatprep.subr.bf16.mxu0 %v10027_v0 }
  0x7c   : > { %8725 = vmatpush3.bf16.msra.mxu1 %v10297_v16  ;;  %8701 = vmatpush3.bf16.msra.mxu0 %v10297_v16 }
  0x7d   : > { %8726 = vmatprep.subr.bf16.mxu1 %v10027_v0  ;;  %8702 = vmatprep.subr.bf16.mxu0 %v10027_v0 }
  0x80   : > { %8728 = vmatpush3.bf16.msra.mxu1 %v10306_v19  ;;  %8704 = vmatpush3.bf16.msra.mxu0 %v10306_v19 }
  0x81   : > { %8729 = vmatprep.subr.bf16.mxu1 %v10027_v0  ;;  %8705 = vmatprep.subr.bf16.mxu0 %v10027_v0 }
  0x84   : > { %8731 = vmatpush3.bf16.msra.mxu1 %v10315_v22  ;;  %8707 = vmatpush3.bf16.msra.mxu0 %v10315_v22 }
  0x85   : > { %8732 = vmatprep.subr.bf16.mxu1 %v10027_v0  ;;  %8708 = vmatprep.subr.bf16.mxu0 %v10027_v0 }
  0x88   : > { %8734 = vmatpush3.bf16.msra.mxu1 %v10323_v25  ;;  %8710 = vmatpush3.bf16.msra.mxu0 %v10323_v25 }
  0x89   : > { %8735 = vmatprep.subr.bf16.mxu1 %v10027_v0 }
  0x8b   : > { %7379 = vmatmul.mubr.f32.vlgmr.msra.gmra.mrb[0].mxu1 %v10029_v1  ;;  %7344 = vmatmul.mubr.f32.vlgmr.msra.gmra.mrb[0].mxu0 %v516_v26  ;;  %v6365_v26 = vld [vmem:[%s10250_s20 + $0xc0] sm:$0xff] }
  0x8c   : > { %8737 = vmatpush3.bf16.msra.mxu1 %v10269_v5  ;;  %7429 = vmatprep.mubr.msk.f32.mxu1 %vm10028_vm0, %v10029_v1 }
  0x8d   : > { %8738 = vmatprep.subr.bf16.mxu1 %v10027_v0  ;;  %7383 = vmatprep.mubr.msk.f32.mxu0 %vm658_vm1, %v10358_v27 }
  0x90   : > { %8740 = vmatpush3.bf16.msra.mxu1 %v10273_v7 }
  0x91   : > { %8741 = vmatprep.subr.bf16.mxu1 %v10027_v0 }
  0x94   : > { %8743 = vmatpush3.bf16.msra.mxu1 %v10281_v10 }
  0x95   : > { %8744 = vmatprep.subr.bf16.mxu1 %v10027_v0 }
  0x98   : > { %8746 = vmatpush3.bf16.msra.mxu1 %v10289_v13 }
  0x99   : > { %8747 = vmatprep.subr.bf16.mxu1 %v10027_v0 }
  0x9c   : > { %8749 = vmatpush3.bf16.msra.mxu1 %v10297_v16 }
  0x9d   : > { %8750 = vmatprep.subr.bf16.mxu1 %v10027_v0 }
  0xa0   : > { %8752 = vmatpush3.bf16.msra.mxu1 %v10306_v19 }
  0xa1   : > { %8753 = vmatprep.subr.bf16.mxu1 %v10027_v0 }
  0xa4   : > { %8755 = vmatpush3.bf16.msra.mxu1 %v10315_v22 }
  0xa5   : > { %8756 = vmatprep.subr.bf16.mxu1 %v10027_v0 }
  0xa8   : > { %8758 = vmatpush3.bf16.msra.mxu1 %v10323_v25 }
 0x15e   : > { %v654_v28 = vpop.f32.mrb[0].mxu1  ;;  %v583_v30 = vpop.f32.mrb[0].mxu0 }
 0x15f   : > { %v7380_v31 = vpop.f32.mrb[1].mxu1  ;;  %7381 = vmatprep.subr.mxu0 %v654_v28  ;;  %v7345_v33 = vpop.f32.mrb[1].mxu0 }
 0x160   : > { %7382 = vmatpush3.msra.mxu0 %v654_v28  ;;  %v6366_v28 = vld [vmem:[%s10250_s20 + $0xc8] sm:$0xff]  ;;  %v6367_v31 = vld [vmem:[%s10250_s20 + $0xd0] sm:$0xff]  ;;  %v6368_v33 = vld [vmem:[%s10250_s20 + $0xd8] sm:$0xff] }
 0x161   : > { %7384 = vmatmul.mubr.msk.f32.vlgmr.msra.gmra.mrb[2].mxu0 %vm658_vm1, %v10365_v29  ;;  %7389 = vmatprep.subr.mxu0 %v583_v30 }
 0x162   : > { %7386 = vmatprep.mubr.msk.f32.mxu0 %vm658_vm1, %v10370_v32  ;;  %7390 = vmatpush3.msra.mxu0 %v583_v30  ;;  %v10524_v30 = vpack.c.bf16 %v6366_v28, %v6365_v26 }
 0x163   : > { %8759 = vmatprep.subr.bf16.mxu0 %v10027_v0 }
 0x165   : > { %7387 = vmatmul.mubr.msk.f32.gmra.mrb[4].mxu0 %vm658_vm1, %v10379_v34 }
 0x166   : > { %7391 = vmatprep.mubr.msk.f32.mxu0 %vm658_vm1, %v10384_v35 }
 0x169   : > { %7392 = vmatmul.mubr.msk.f32.vlgmr.msra.gmra.mrb[2].mxu0 %vm658_vm1, %v10394_v36 }
 0x16a   : > { %7394 = vmatprep.mubr.msk.f32.mxu0 %vm658_vm1, %v10399_v37  ;;  %8761 = vmatpush3.bf16.msra.mxu0 %v10269_v5 }
 0x16b   : > { %8762 = vmatprep.subr.bf16.mxu0 %v10027_v0 }
 0x16d   : > { %7395 = vmatmul.mubr.msk.f32.gmra.mrb[4].mxu0 %vm658_vm1, %v10408_v38 }
 0x16e   : > { %8764 = vmatpush3.bf16.msra.mxu0 %v10273_v7  ;;  %7464 = vmatprep.mubr.msk.f32.mxu0 %vm10028_vm0, %v10029_v1 }
 0x16f   : > { %8765 = vmatprep.subr.bf16.mxu0 %v10027_v0 }
 0x172   : > { %8767 = vmatpush3.bf16.msra.mxu0 %v10281_v10  ;;  %v10473_v10 = vld [vmem:[%s11975_s6 + $0x8] sm:$0xff] }
 0x173   : > { %8768 = vmatprep.subr.bf16.mxu0 %v10027_v0 }
 0x176   : > { %8770 = vmatpush3.bf16.msra.mxu0 %v10289_v13  ;;  %v10494_v13 = vld [vmem:[%s11974_s5] sm:$0xff] }
 0x177   : > { %8771 = vmatprep.subr.bf16.mxu0 %v10027_v0 }
 0x17a   : > { %8773 = vmatpush3.bf16.msra.mxu0 %v10297_v16  ;;  %v10500_v16 = vpack.c.bf16 %v6358_v15, %v6357_v14  ;;  %v10615_v14 = vld [vmem:[#allocation9 + $0x10] sm:$0xff] }
 0x17b   : > { %8774 = vmatprep.subr.bf16.mxu0 %v10027_v0 }
 0x17e   : > { %8776 = vmatpush3.bf16.msra.mxu0 %v10306_v19  ;;  %v10506_v19 = vpack.c.bf16 %v6360_v18, %v6359_v17 }
 0x17f   : > { %8777 = vmatprep.subr.bf16.mxu0 %v10027_v0 }
 0x182   : > { %8779 = vmatpush3.bf16.msra.mxu0 %v10315_v22  ;;  %v10512_v22 = vpack.c.bf16 %v6362_v21, %v6361_v20 }
 0x183   : > { %8780 = vmatprep.subr.bf16.mxu0 %v10027_v0 }
 0x186   : > { %8782 = vmatpush3.bf16.msra.mxu0 %v10323_v25  ;;  %v10518_v25 = vpack.c.bf16 %v6364_v24, %v6363_v23 }
 0x187   : > { %8783 = vmatprep.subr.bf16.mxu0 %v10027_v0 }
 0x189   : > { %7465 = vmatmul.mubr.f32.vlgmr.msra.gmra.mrb[6].mxu0 %v10029_v1 }
 0x18a   : > { %7515 = vmatprep.mubr.msk.f32.mxu0 %vm10028_vm0, %v10029_v1  ;;  %8785 = vmatpush3.bf16.msra.mxu0 %v10500_v16 }
 0x18b   : > { %8786 = vmatprep.subr.bf16.mxu0 %v10027_v0 }
 0x18e   : > { %8788 = vmatpush3.bf16.msra.mxu0 %v10506_v19 }
 0x18f   : > { %8789 = vmatprep.subr.bf16.mxu0 %v10027_v0 }
 0x192   : > { %8791 = vmatpush3.bf16.msra.mxu0 %v10512_v22 }
 0x193   : > { %8792 = vmatprep.subr.bf16.mxu0 %v10027_v0 }
 0x196   : > { %8794 = vmatpush3.bf16.msra.mxu0 %v10518_v25 }
 0x197   : > { %8795 = vmatprep.subr.bf16.mxu0 %v10027_v0 }
 0x19a   : > { %8797 = vmatpush3.bf16.msra.mxu0 %v10524_v30 }
 0x19b   : > { %8798 = vmatprep.subr.bf16.mxu0 %v10027_v0 }
 0x23c   : > { %v7393_v41 = vpop.f32.mrb[2].mxu0 }
 0x23d   : > { %v854_v42 = vadd.f32 %v7393_v41, %v10436_v39  ;;  %v834_v43 = vpop.f32.mrb[3].mxu0  ;;  %v10530_v41 = vpack.c.bf16 %v6368_v33, %v6367_v31 }
 0x23e   : > { %v853_v44 = vadd.f32 %v834_v43, %v10441_v40  ;;  %v6370_v43 = vld [vmem:[%s10250_s20 + $0xe8] sm:$0xff] }
 0x23f   : > { %v861_v45 = vmul.f32 0.5, %v854_v42  ;;  %8800 = vmatpush3.bf16.msra.mxu0 %v10530_v41  ;;  %v6369_v42 = vld [vmem:[%s10250_s20 + $0xe0] sm:$0xff] }
 0x240   : > { %v857_v47 = vmul.f32 0.5, %v853_v44  ;;  %v7396_v48 = vpop.f32.mrb[4].mxu0  ;;  %8801 = vmatprep.subr.bf16.mxu0 %v10027_v0  ;;  %v10536_v44 = vpack.c.bf16 %v6370_v43, %v6369_v42 }
 0x241   : > { %9609 = vtanh.f32 %v861_v45  ;;  %v844_v49 = vpop.f32.mrb[5].mxu0  ;;  %v856_v50 = vadd.f32 %v7396_v48, %v10448_v46  ;;  %v6371_v45 = vld [vmem:[%s10250_s20 + $0xf0] sm:$0xff] }
 0x242   : > { %9611 = vtanh.f32 %v857_v47  ;;  %v855_v52 = vadd.f32 %v844_v49, %v10454_v51  ;;  %v6372_v47 = vld [vmem:[%s10250_s20 + $0xf8] sm:$0xff]  ;;  %v6373_v49 = vld [vmem:[%s10331_s12 + $0x8] sm:$0xff] }
 0x243   : > { %9613 = vtanh.f32 %v856_v50  ;;  %8803 = vmatpush3.bf16.msra.mxu0 %v10536_v44  ;;  %v10542_v48 = vpack.c.bf16 %v6372_v47, %v6371_v45 }
 0x244   : > { %v865_v53 = vmul.f32 0.5, %v855_v52  ;;  %8804 = vmatprep.subr.bf16.mxu0 %v10027_v0  ;;  %v10551_v52 = vld [vmem:[%s11974_s5 + $0x8] sm:$0xff] }
 0x246   : > { %9615 = vtanh.f32 %v865_v53 }
 0x247   : > { %8806 = vmatpush3.bf16.msra.mxu0 %v10542_v48 }
 0x24a   : > { %7516 = vmatmul.mubr.f32.vlgmr.msra.gmra.mrb[8].mxu0 %v6373_v49 }
 0x24b   : > { %v9610_v54 = vpop.eup %9609  ;;  %7555 = vmatprep.mubr.msk.f32.mxu0 %vm658_vm1, %v10358_v27 }
 0x24c   : > { %v9612_v55 = vpop.eup %9611  ;;  %v863_v56 = vadd.f32 1.0, %v9610_v54  ;;  %v10556_v54 = vld [vmem:[%s11974_s5 + $0x10] sm:$0xff] }
 0x24d   : > { %v859_v57 = vadd.f32 1.0, %v9612_v55  ;;  %v9614_v60 = vpop.eup %9613  ;;  %v10567_v55 = vld [vmem:[%s11974_s5 + $0x18] sm:$0xff] }
 0x24e   : > { %v864_v58 = vmul.f32 0.5, %v863_v56 }
 0x24f   : > { %v860_v59 = vmul.f32 0.5, %v859_v57 }
 0x250   : > { %v871_v61 = vmul.f32 0.0, %v864_v58  ;;  %v9616_v2 = vpop.eup %9615  ;;  %v10606_v58 = vld [vmem:[#allocation9 + $0x8] sm:$0xff] }
 0x251   : > { %v872_v62 = vmul.f32 %v9614_v60, %v860_v59  ;;  %v867_v3 = vadd.f32 1.0, %v9616_v2  ;;  %v10608_v59 = vld [vmem:[#allocation9] sm:$0xff] }
 0x253   : > { %v10457_v63 = vadd.f32 %v872_v62, %v871_v61  ;;  %v868_v6 = vmul.f32 0.5, %v867_v3 }
 0x255   : > { %9617 = vtanh.f32 %v10457_v63 }
 0x25c   : > { %v1015_v4 = vpop.f32.mrb[6].mxu0 }
 0x25d   : > { %v7466_v5 = vpop.f32.mrb[7].mxu0  ;;  %7467 = vmatprep.subr.mxu1 %v1015_v4 }
 0x25f   : > { %v9618_v7 = vpop.eup %9617 }
 0x260   : > { %v10460_v8 = vmul.f32 %v9618_v7, %v868_v6 }
 0x262   : > { %7430 = vmatmul.mubr.f32.vlgmr.msra.gmra.mrb[2].mxu1 %v10460_v8 }
 0x263   : > { %7468 = vmatpush3.msra.mxu1 %v1015_v4  ;;  %7469 = vmatprep.mubr.msk.f32.mxu1 %vm658_vm1, %v10465_v9  ;;  %v10612_v4 = vld [vmem:[#allocation9 + $0x18] sm:$0xff] }
 0x266   : > { %7470 = vmatmul.mubr.msk.f32.vlgmr.msra.gmra.mrb[4].mxu1 %vm658_vm1, %v10473_v10 }
 0x267   : > { %7472 = vmatprep.mubr.msk.f32.mxu1 %vm658_vm1, %v10478_v11 }
 0x26a   : > { %7473 = vmatmul.mubr.msk.f32.gmra.mrb[6].mxu1 %vm658_vm1, %v10487_v12 }
 0x26b   : > { %7477 = vmatprep.mubr.msk.f32.mxu1 %vm658_vm1, %v10494_v13 }
 0x31d   : > { %v1324_v56 = vpop.f32.mrb[8].mxu0 }
 0x31e   : > { %v7517_v57 = vpop.f32.mrb[9].mxu0 }
 0x335   : > { %v944_v50 = vpop.f32.mrb[2].mxu1 }
 0x336   : > { %v7431_v53 = vpop.f32.mrb[3].mxu1  ;;  %7475 = vmatprep.subr.mxu1 %v944_v50 }
 0x337   : > { %7476 = vmatpush3.msra.mxu1 %v944_v50 }
 0x338   : > { %7478 = vmatmul.mubr.msk.f32.vlgmr.msra.gmra.mrb[4].mxu1 %vm658_vm1, %v10551_v52  ;;  %8807 = vmatprep.subr.bf16.mxu1 %v10027_v0 }
 0x339   : > { %8809 = vmatpush3.bf16.msra.mxu1 %v10500_v16  ;;  %7480 = vmatprep.mubr.msk.f32.mxu1 %vm658_vm1, %v10556_v54 }
 0x33a   : > { %8810 = vmatprep.subr.bf16.mxu1 %v10027_v0 }
 0x33c   : > { %7481 = vmatmul.mubr.msk.f32.gmra.mrb[6].mxu1 %vm658_vm1, %v10567_v55 }
 0x33d   : > { %8812 = vmatpush3.bf16.msra.mxu1 %v10506_v19  ;;  %7550 = vmatprep.mubr.msk.f32.mxu1 %vm10028_vm0, %v10029_v1 }
 0x33e   : > { %8813 = vmatprep.subr.bf16.mxu1 %v10027_v0 }
 0x341   : > { %8815 = vmatpush3.bf16.msra.mxu1 %v10512_v22 }
 0x342   : > { %8816 = vmatprep.subr.bf16.mxu1 %v10027_v0 }
 0x345   : > { %8818 = vmatpush3.bf16.msra.mxu1 %v10518_v25 }
 0x346   : > { %8819 = vmatprep.subr.bf16.mxu1 %v10027_v0 }
 0x349   : > { %8821 = vmatpush3.bf16.msra.mxu1 %v10524_v30 }
 0x34a   : > { %8822 = vmatprep.subr.bf16.mxu1 %v10027_v0 }
 0x34d   : > { %8824 = vmatpush3.bf16.msra.mxu1 %v10530_v41 }
 0x34e   : > { %8825 = vmatprep.subr.bf16.mxu1 %v10027_v0 }
 0x351   : > { %8827 = vmatpush3.bf16.msra.mxu1 %v10536_v44 }
 0x352   : > { %8828 = vmatprep.subr.bf16.mxu1 %v10027_v0 }
 0x355   : > { %8830 = vmatpush3.bf16.msra.mxu1 %v10542_v48 }
 0x356   : > { %8831 = vmatprep.subr.bf16.mxu1 %v10027_v0 }
 0x358   : > { %7551 = vmatmul.mubr.f32.vlgmr.msra.gmra.mrb[8].mxu1 %v10460_v8 }
 0x359   : > { %8833 = vmatpush3.bf16.msra.mxu1 %v10500_v16  ;;  %7601 = vmatprep.mubr.msk.f32.mxu1 %vm10028_vm0, %v10029_v1 }
 0x35a   : > { %8834 = vmatprep.subr.bf16.mxu1 %v10027_v0 }
 0x35d   : > { %8836 = vmatpush3.bf16.msra.mxu1 %v10506_v19 }
 0x35e   : > { %8837 = vmatprep.subr.bf16.mxu1 %v10027_v0 }
 0x361   : > { %8839 = vmatpush3.bf16.msra.mxu1 %v10512_v22 }
 0x362   : > { %8840 = vmatprep.subr.bf16.mxu1 %v10027_v0 }
 0x365   : > { %8842 = vmatpush3.bf16.msra.mxu1 %v10518_v25 }
 0x366   : > { %8843 = vmatprep.subr.bf16.mxu1 %v10027_v0 }
 0x369   : > { %8845 = vmatpush3.bf16.msra.mxu1 %v10524_v30 }
 0x36a   : > { %8846 = vmatprep.subr.bf16.mxu1 %v10027_v0 }
 0x36d   : > { %8848 = vmatpush3.bf16.msra.mxu1 %v10530_v41 }
 0x36e   : > { %8849 = vmatprep.subr.bf16.mxu1 %v10027_v0 }
 0x371   : > { %8851 = vmatpush3.bf16.msra.mxu1 %v10536_v44 }
 0x372   : > { %8852 = vmatprep.subr.bf16.mxu1 %v10027_v0 }
 0x375   : > { %8854 = vmatpush3.bf16.msra.mxu1 %v10542_v48 }
 0x40b   : > { %v7479_v60 = vpop.f32.mrb[4].mxu1 }
 0x40c   : > { %v1214_v61 = vadd.f32 %v7479_v60, %v10606_v58  ;;  %v1194_v62 = vpop.f32.mrb[5].mxu1 }
 0x40d   : > { %v1213_v2 = vadd.f32 %v1194_v62, %v10608_v59 }
 0x40e   : > { %v1221_v3 = vmul.f32 0.5, %v1214_v61 }
 0x40f   : > { %v1217_v5 = vmul.f32 0.5, %v1213_v2  ;;  %v7482_v6 = vpop.f32.mrb[6].mxu1 }
 0x410   : > { %9619 = vtanh.f32 %v1221_v3  ;;  %v1204_v7 = vpop.f32.mrb[7].mxu1  ;;  %v1216_v8 = vadd.f32 %v7482_v6, %v10612_v4 }
 0x411   : > { %9621 = vtanh.f32 %v1217_v5  ;;  %v1215_v15 = vadd.f32 %v1204_v7, %v10615_v14 }
 0x412   : > { %9623 = vtanh.f32 %v1216_v8 }
 0x413   : > { %v1225_v17 = vmul.f32 0.5, %v1215_v15 }
 0x415   : > { %9625 = vtanh.f32 %v1225_v17 }
 0x41a   : > { %v9620_v18 = vpop.eup %9619 }
 0x41b   : > { %v9622_v20 = vpop.eup %9621  ;;  %v1223_v21 = vadd.f32 1.0, %v9620_v18 }
 0x41c   : > { %v1219_v23 = vadd.f32 1.0, %v9622_v20  ;;  %v9624_v28 = vpop.eup %9623 }
 0x41d   : > { %v1224_v24 = vmul.f32 0.5, %v1223_v21 }
 0x41e   : > { %v1220_v26 = vmul.f32 0.5, %v1219_v23 }
 0x41f   : > { %v1231_v31 = vmul.f32 0.0, %v1224_v24  ;;  %v9626_v43 = vpop.eup %9625 }
 0x420   : > { %v1232_v33 = vmul.f32 %v9624_v28, %v1220_v26  ;;  %v1227_v45 = vadd.f32 1.0, %v9626_v43 }
 0x422   : > { %v10618_v42 = vadd.f32 %v1232_v33, %v1231_v31  ;;  %v1228_v50 = vmul.f32 0.5, %v1227_v45  ;;  %v6392_v33 = vld [vmem:[%s10250_s20 + $0x108] sm:$0xff]  ;;  %v6393_v45 = vld [vmem:[%s10250_s20 + $0x110] sm:$0xff] }
 0x424   : > { %9627 = vtanh.f32 %v10618_v42 }
 0x42b   : > { %v1395_v47 = vpop.f32.mrb[8].mxu1 }
 0x42c   : > { %v7552_v49 = vpop.f32.mrb[9].mxu1  ;;  %7553 = vmatprep.subr.mxu0 %v1395_v47 }
 0x42d   : > { %7554 = vmatpush3.msra.mxu0 %v1395_v47  ;;  %v6394_v47 = vld [vmem:[%s10250_s20 + $0x118] sm:$0xff] }
 0x42e   : > { %v9628_v53 = vpop.eup %9627  ;;  %7556 = vmatmul.mubr.msk.f32.vlgmr.msra.gmra.mrb[10].mxu0 %vm658_vm1, %v10365_v29  ;;  %7561 = vmatprep.subr.mxu0 %v1324_v56  ;;  %v10689_v49 = vpack.c.bf16 %v6394_v47, %v6393_v45 }
 0x42f   : > { %v1235_v57 = vmul.f32 %v9628_v53, %v1228_v50  ;;  %7558 = vmatprep.mubr.msk.f32.mxu0 %vm658_vm1, %v10370_v32  ;;  %7562 = vmatpush3.msra.mxu0 %v1324_v56  ;;  %v6395_v50 = vld [vmem:[%s10250_s20 + $0x120] sm:$0xff]  ;;  %v6396_v53 = vld [vmem:[%s10250_s20 + $0x128] sm:$0xff] }
 0x430   : > { %8855 = vmatprep.subr.bf16.mxu0 %v10027_v0 }
 0x431   : > { %1238 = vst [vmem:[%s10627_s24] sm:$0xff] %v1235_v57 }
 0x432   : > { %7559 = vmatmul.mubr.msk.f32.gmra.mrb[12].mxu0 %vm658_vm1, %v10379_v34 }
 0x433   : > { %7563 = vmatprep.mubr.msk.f32.mxu0 %vm658_vm1, %v10384_v35 }
 0x436   : > { %7564 = vmatmul.mubr.msk.f32.vlgmr.msra.gmra.mrb[10].mxu0 %vm658_vm1, %v10394_v36 }
 0x437   : > { %8857 = vmatpush3.bf16.msra.mxu0 %v10500_v16  ;;  %7566 = vmatprep.mubr.msk.f32.mxu0 %vm658_vm1, %v10399_v37 }
 0x438   : > { %8858 = vmatprep.subr.bf16.mxu0 %v10027_v0 }
 0x43a   : > { %7567 = vmatmul.mubr.msk.f32.gmra.mrb[12].mxu0 %vm658_vm1, %v10408_v38 }
 0x43b   : > { %8860 = vmatpush3.bf16.msra.mxu0 %v10506_v19  ;;  %7636 = vmatprep.mubr.msk.f32.mxu0 %vm10028_vm0, %v10029_v1 }
 0x43c   : > { %8861 = vmatprep.subr.bf16.mxu0 %v10027_v0 }
 0x43f   : > { %8863 = vmatpush3.bf16.msra.mxu0 %v10512_v22 }
 0x440   : > { %8864 = vmatprep.subr.bf16.mxu0 %v10027_v0 }
 0x443   : > { %8866 = vmatpush3.bf16.msra.mxu0 %v10518_v25 }
 0x444   : > { %8867 = vmatprep.subr.bf16.mxu0 %v10027_v0 }
 0x447   : > { %8869 = vmatpush3.bf16.msra.mxu0 %v10524_v30 }
 0x448   : > { %8870 = vmatprep.subr.bf16.mxu0 %v10027_v0 }
 0x44b   : > { %8872 = vmatpush3.bf16.msra.mxu0 %v10530_v41 }
 0x44c   : > { %8873 = vmatprep.subr.bf16.mxu0 %v10027_v0 }
 0x44f   : > { %8875 = vmatpush3.bf16.msra.mxu0 %v10536_v44 }
 0x450   : > { %8876 = vmatprep.subr.bf16.mxu0 %v10027_v0 }
 0x453   : > { %8878 = vmatpush3.bf16.msra.mxu0 %v10542_v48 }
 0x454   : > { %8879 = vmatprep.subr.bf16.mxu0 %v10027_v0 }
 0x456   : > { %7637 = vmatmul.mubr.f32.vlgmr.msra.gmra.mrb[14].mxu0 %v1235_v57  ;;  %v10695_v57 = vpack.c.bf16 %v6396_v53, %v6395_v50 }
 0x457   : > { %7687 = vmatprep.mubr.msk.f32.mxu0 %vm10028_vm0, %v10029_v1 }
 0x509   : > { %v7565_v16 = vpop.f32.mrb[10].mxu0 }
 0x50a   : > { %v1570_v19 = vadd.f32 %v7565_v16, %v10436_v39  ;;  %v1550_v22 = vpop.f32.mrb[11].mxu0  ;;  %v6397_v16 = vld [vmem:[%s10250_s20 + $0x130] sm:$0xff] }
 0x50b   : > { %v1569_v25 = vadd.f32 %v1550_v22, %v10441_v40 }
 0x50c   : > { %v1577_v30 = vmul.f32 0.5, %v1570_v19  ;;  %v6398_v19 = vld [vmem:[%s10250_s20 + $0x138] sm:$0xff] }
 0x50d   : > { %v1573_v41 = vmul.f32 0.5, %v1569_v25  ;;  %v7568_v56 = vpop.f32.mrb[12].mxu0  ;;  %v10701_v22 = vpack.c.bf16 %v6398_v19, %v6397_v16  ;;  %v6399_v25 = vld [vmem:[%s10250_s20 + $0x140] sm:$0xff] }
 0x50e   : > { %9629 = vtanh.f32 %v1577_v30  ;;  %v1560_v44 = vpop.f32.mrb[13].mxu0  ;;  %v1572_v48 = vadd.f32 %v7568_v56, %v10448_v46  ;;  %v6400_v30 = vld [vmem:[%s10250_s20 + $0x148] sm:$0xff]  ;;  %v6401_v56 = vld [vmem:[%s10250_s20 + $0x150] sm:$0xff] }
 0x50f   : > { %9631 = vtanh.f32 %v1573_v41  ;;  %v1571_v60 = vadd.f32 %v1560_v44, %v10454_v51  ;;  %v10707_v41 = vpack.c.bf16 %v6400_v30, %v6399_v25  ;;  %v6402_v44 = vld [vmem:[%s10250_s20 + $0x158] sm:$0xff] }
 0x510   : > { %9633 = vtanh.f32 %v1572_v48  ;;  %v10713_v48 = vpack.c.bf16 %v6402_v44, %v6401_v56 }
 0x511   : > { %v1581_v61 = vmul.f32 0.5, %v1571_v60  ;;  %v6403_v60 = vld [vmem:[%s10250_s20 + $0x160] sm:$0xff] }
 0x513   : > { %9635 = vtanh.f32 %v1581_v61  ;;  %v6404_v61 = vld [vmem:[%s10250_s20 + $0x168] sm:$0xff] }
 0x518   : > { %v9630_v62 = vpop.eup %9629 }
 0x519   : > { %v9632_v2 = vpop.eup %9631  ;;  %v1579_v3 = vadd.f32 1.0, %v9630_v62  ;;  %v10719_v62 = vpack.c.bf16 %v6404_v61, %v6403_v60 }
 0x51a   : > { %v1575_v5 = vadd.f32 1.0, %v9632_v2  ;;  %v9634_v8 = vpop.eup %9633  ;;  %v6405_v2 = vld [vmem:[%s10250_s20 + $0x170] sm:$0xff] }
 0x51b   : > { %v1580_v6 = vmul.f32 0.5, %v1579_v3  ;;  %v6406_v3 = vld [vmem:[%s10250_s20 + $0x178] sm:$0xff] }
 0x51c   : > { %v1576_v7 = vmul.f32 0.5, %v1575_v5  ;;  %v10725_v5 = vpack.c.bf16 %v6406_v3, %v6405_v2 }
 0x51d   : > { %v1587_v15 = vmul.f32 %v1580_v6, %v10457_v63  ;;  %v9636_v20 = vpop.eup %9635  ;;  %v6391_v63 = vld [vmem:[%s10250_s20 + $0x100] sm:$0xff]  ;;  %v6407_v6 = vld [vmem:[%s10331_s12 + $0x10] sm:$0xff] }
 0x51e   : > { %v1588_v17 = vmul.f32 %v9634_v8, %v1576_v7  ;;  %v1583_v21 = vadd.f32 1.0, %v9636_v20  ;;  %v10683_v43 = vpack.c.bf16 %v6392_v33, %v6391_v63 }
 0x520   : > { %v10665_v18 = vadd.f32 %v1588_v17, %v1587_v15  ;;  %v1584_v26 = vmul.f32 0.5, %v1583_v21  ;;  %8881 = vmatpush3.bf16.msra.mxu0 %v10683_v43 }
 0x521   : > { %8882 = vmatprep.subr.bf16.mxu0 %v10027_v0 }
 0x522   : > { %9637 = vtanh.f32 %v10665_v18 }
 0x524   : > { %8884 = vmatpush3.bf16.msra.mxu0 %v10689_v49 }
 0x525   : > { %8885 = vmatprep.subr.bf16.mxu0 %v10027_v0 }
 0x528   : > { %8887 = vmatpush3.bf16.msra.mxu0 %v10695_v57 }
 0x529   : > { %v1731_v23 = vpop.f32.mrb[14].mxu0  ;;  %8888 = vmatprep.subr.bf16.mxu0 %v10027_v0 }
 0x52a   : > { %v7638_v24 = vpop.f32.mrb[15].mxu0  ;;  %7639 = vmatprep.subr.mxu1 %v1731_v23 }
 0x52c   : > { %v9638_v28 = vpop.eup %9637  ;;  %8890 = vmatpush3.bf16.msra.mxu0 %v10701_v22 }
 0x52d   : > { %v10668_v31 = vmul.f32 %v9638_v28, %v1584_v26  ;;  %8891 = vmatprep.subr.bf16.mxu0 %v10027_v0 }
 0x52f   : > { %7602 = vmatmul.mubr.f32.vlgmr.msra.gmra.mrb[10].mxu1 %v10668_v31 }
 0x530   : > { %7640 = vmatpush3.msra.mxu1 %v1731_v23  ;;  %7641 = vmatprep.mubr.msk.f32.mxu1 %vm658_vm1, %v10465_v9 }
 0x531   : > { %8893 = vmatpush3.bf16.msra.mxu0 %v10707_v41 }
 0x532   : > { %8894 = vmatprep.subr.bf16.mxu0 %v10027_v0 }
 0x533   : > { %7642 = vmatmul.mubr.msk.f32.vlgmr.msra.gmra.mrb[12].mxu1 %vm658_vm1, %v10473_v10 }
 0x534   : > { %7644 = vmatprep.mubr.msk.f32.mxu1 %vm658_vm1, %v10478_v11 }
 0x535   : > { %8896 = vmatpush3.bf16.msra.mxu0 %v10713_v48 }
 0x536   : > { %8897 = vmatprep.subr.bf16.mxu0 %v10027_v0 }
 0x537   : > { %7645 = vmatmul.mubr.msk.f32.gmra.mrb[14].mxu1 %vm658_vm1, %v10487_v12 }
 0x538   : > { %7649 = vmatprep.mubr.msk.f32.mxu1 %vm658_vm1, %v10494_v13 }
 0x539   : > { %8899 = vmatpush3.bf16.msra.mxu0 %v10719_v62 }
 0x53a   : > { %8900 = vmatprep.subr.bf16.mxu0 %v10027_v0 }
 0x53d   : > { %8902 = vmatpush3.bf16.msra.mxu0 %v10725_v5 }
 0x540   : > { %7688 = vmatmul.mubr.f32.vlgmr.msra.gmra.mrb[16].mxu0 %v6407_v6 }
 0x541   : > { %7727 = vmatprep.mubr.msk.f32.mxu0 %vm658_vm1, %v10358_v27 }
 0x602   : > { %v1660_v7 = vpop.f32.mrb[10].mxu1 }
 0x603   : > { %v7603_v8 = vpop.f32.mrb[11].mxu1  ;;  %7647 = vmatprep.subr.mxu1 %v1660_v7 }
 0x604   : > { %7648 = vmatpush3.msra.mxu1 %v1660_v7 }
 0x605   : > { %7650 = vmatmul.mubr.msk.f32.vlgmr.msra.gmra.mrb[12].mxu1 %vm658_vm1, %v10551_v52  ;;  %8903 = vmatprep.subr.bf16.mxu1 %v10027_v0 }
 0x606   : > { %8905 = vmatpush3.bf16.msra.mxu1 %v10683_v43  ;;  %7652 = vmatprep.mubr.msk.f32.mxu1 %vm658_vm1, %v10556_v54 }
 0x607   : > { %8906 = vmatprep.subr.bf16.mxu1 %v10027_v0 }
 0x609   : > { %7653 = vmatmul.mubr.msk.f32.gmra.mrb[14].mxu1 %vm658_vm1, %v10567_v55 }
 0x60a   : > { %8908 = vmatpush3.bf16.msra.mxu1 %v10689_v49  ;;  %7722 = vmatprep.mubr.msk.f32.mxu1 %vm10028_vm0, %v10029_v1 }
 0x60b   : > { %8909 = vmatprep.subr.bf16.mxu1 %v10027_v0 }
 0x60e   : > { %8911 = vmatpush3.bf16.msra.mxu1 %v10695_v57 }
 0x60f   : > { %8912 = vmatprep.subr.bf16.mxu1 %v10027_v0 }
 0x612   : > { %8914 = vmatpush3.bf16.msra.mxu1 %v10701_v22 }
 0x613   : > { %8915 = vmatprep.subr.bf16.mxu1 %v10027_v0  ;;  %v2017_v27 = vpop.f32.mrb[16].mxu0 }
 0x614   : > { %v7689_v15 = vpop.f32.mrb[17].mxu0 }
 0x616   : > { %8917 = vmatpush3.bf16.msra.mxu1 %v10707_v41 }
 0x617   : > { %8918 = vmatprep.subr.bf16.mxu1 %v10027_v0 }
 0x61a   : > { %8920 = vmatpush3.bf16.msra.mxu1 %v10713_v48 }
 0x61b   : > { %8921 = vmatprep.subr.bf16.mxu1 %v10027_v0 }
 0x61e   : > { %8923 = vmatpush3.bf16.msra.mxu1 %v10719_v62 }
 0x61f   : > { %8924 = vmatprep.subr.bf16.mxu1 %v10027_v0 }
 0x622   : > { %8926 = vmatpush3.bf16.msra.mxu1 %v10725_v5 }
 0x623   : > { %8927 = vmatprep.subr.bf16.mxu1 %v10027_v0 }
 0x625   : > { %7723 = vmatmul.mubr.f32.vlgmr.msra.gmra.mrb[16].mxu1 %v10668_v31 }
 0x626   : > { %8929 = vmatpush3.bf16.msra.mxu1 %v10683_v43  ;;  %7773 = vmatprep.mubr.msk.f32.mxu1 %vm10028_vm0, %v10029_v1 }
 0x627   : > { %8930 = vmatprep.subr.bf16.mxu1 %v10027_v0 }
 0x62a   : > { %8932 = vmatpush3.bf16.msra.mxu1 %v10689_v49 }
 0x62b   : > { %8933 = vmatprep.subr.bf16.mxu1 %v10027_v0 }
 0x62e   : > { %8935 = vmatpush3.bf16.msra.mxu1 %v10695_v57 }
 0x62f   : > { %8936 = vmatprep.subr.bf16.mxu1 %v10027_v0 }
 0x632   : > { %8938 = vmatpush3.bf16.msra.mxu1 %v10701_v22 }
 0x633   : > { %8939 = vmatprep.subr.bf16.mxu1 %v10027_v0 }
 0x636   : > { %8941 = vmatpush3.bf16.msra.mxu1 %v10707_v41 }
 0x637   : > { %8942 = vmatprep.subr.bf16.mxu1 %v10027_v0 }
 0x63a   : > { %8944 = vmatpush3.bf16.msra.mxu1 %v10713_v48 }
 0x63b   : > { %8945 = vmatprep.subr.bf16.mxu1 %v10027_v0 }
 0x63e   : > { %8947 = vmatpush3.bf16.msra.mxu1 %v10719_v62 }
 0x63f   : > { %8948 = vmatprep.subr.bf16.mxu1 %v10027_v0 }
 0x642   : > { %8950 = vmatpush3.bf16.msra.mxu1 %v10725_v5 }
 0x6d8   : > { %v7651_v17 = vpop.f32.mrb[12].mxu1 }
 0x6d9   : > { %v1906_v20 = vadd.f32 %v7651_v17, %v10606_v58  ;;  %v1886_v21 = vpop.f32.mrb[13].mxu1 }
 0x6da   : > { %v1905_v23 = vadd.f32 %v1886_v21, %v10608_v59 }
 0x6db   : > { %v1913_v24 = vmul.f32 0.5, %v1906_v20 }
 0x6dc   : > { %v1909_v26 = vmul.f32 0.5, %v1905_v23  ;;  %v7654_v28 = vpop.f32.mrb[14].mxu1 }
 0x6dd   : > { %9639 = vtanh.f32 %v1913_v24  ;;  %v1896_v31 = vpop.f32.mrb[15].mxu1  ;;  %v1908_v63 = vadd.f32 %v7654_v28, %v10612_v4 }
 0x6de   : > { %9641 = vtanh.f32 %v1909_v26  ;;  %v1907_v33 = vadd.f32 %v1896_v31, %v10615_v14  ;;  %v6426_v31 = vld [vmem:[%s10250_s20 + $0x188] sm:$0xff] }
 0x6df   : > { %9643 = vtanh.f32 %v1908_v63 }
 0x6e0   : > { %v1917_v45 = vmul.f32 0.5, %v1907_v33  ;;  %v6430_v33 = vld [vmem:[%s10250_s20 + $0x1a8] sm:$0xff] }
 0x6e2   : > { %9645 = vtanh.f32 %v1917_v45  ;;  %v6431_v45 = vld [vmem:[%s10250_s20 + $0x1b0] sm:$0xff] }
 0x6e7   : > { %v9640_v47 = vpop.eup %9639 }
 0x6e8   : > { %v9642_v50 = vpop.eup %9641  ;;  %v1915_v53 = vadd.f32 1.0, %v9640_v47  ;;  %v6432_v47 = vld [vmem:[%s10250_s20 + $0x1b8] sm:$0xff] }
 0x6e9   : > { %v1911_v16 = vadd.f32 1.0, %v9642_v50  ;;  %v9644_v30 = vpop.eup %9643  ;;  %v10859_v50 = vpack.c.bf16 %v6432_v47, %v6431_v45 }
 0x6ea   : > { %v1916_v19 = vmul.f32 0.5, %v1915_v53  ;;  %v6433_v53 = vld [vmem:[%s10250_s20 + $0x1c0] sm:$0xff] }
 0x6eb   : > { %v1912_v25 = vmul.f32 0.5, %v1911_v16  ;;  %v6434_v16 = vld [vmem:[%s10250_s20 + $0x1c8] sm:$0xff] }
 0x6ec   : > { %v1923_v56 = vmul.f32 %v1916_v19, %v10618_v42  ;;  %v9646_v61 = vpop.eup %9645  ;;  %v10865_v19 = vpack.c.bf16 %v6434_v16, %v6433_v53 }
 0x6ed   : > { %v1924_v44 = vmul.f32 %v9644_v30, %v1912_v25  ;;  %v1919_v2 = vadd.f32 1.0, %v9646_v61  ;;  %v6435_v25 = vld [vmem:[%s10250_s20 + $0x1d0] sm:$0xff]  ;;  %v6436_v30 = vld [vmem:[%s10250_s20 + $0x1d8] sm:$0xff]  ;;  %v6438_v61 = vld [vmem:[%s10250_s20 + $0x1e8] sm:$0xff] }
 0x6ef   : > { %v10779_v60 = vadd.f32 %v1924_v44, %v1923_v56  ;;  %v1920_v7 = vmul.f32 0.5, %v1919_v2  ;;  %v10871_v56 = vpack.c.bf16 %v6436_v30, %v6435_v25  ;;  %v6437_v44 = vld [vmem:[%s10250_s20 + $0x1e0] sm:$0xff]  ;;  %v11037_v30 = vld [vmem:[%s11973_s4 + $0x10] sm:$0xff] }
 0x6f0   : > { %v10877_v2 = vpack.c.bf16 %v6438_v61, %v6437_v44 }
 0x6f1   : > { %9647 = vtanh.f32 %v10779_v60 }
 0x6f8   : > { %v2088_v3 = vpop.f32.mrb[16].mxu1 }
 0x6f9   : > { %v7724_v6 = vpop.f32.mrb[17].mxu1  ;;  %7725 = vmatprep.subr.mxu0 %v2088_v3 }
 0x6fa   : > { %7726 = vmatpush3.msra.mxu0 %v2088_v3  ;;  %v6439_v3 = vld [vmem:[%s10250_s20 + $0x1f0] sm:$0xff]  ;;  %v6440_v6 = vld [vmem:[%s10250_s20 + $0x1f8] sm:$0xff] }
 0x6fb   : > { %v9648_v8 = vpop.eup %9647  ;;  %7728 = vmatmul.mubr.msk.f32.vlgmr.msra.gmra.mrb[18].mxu0 %vm658_vm1, %v10365_v29  ;;  %7733 = vmatprep.subr.mxu0 %v2017_v27 }
 0x6fc   : > { %v1927_v15 = vmul.f32 %v9648_v8, %v1920_v7  ;;  %7730 = vmatprep.mubr.msk.f32.mxu0 %vm658_vm1, %v10370_v32  ;;  %7734 = vmatpush3.msra.mxu0 %v2017_v27  ;;  %v10883_v7 = vpack.c.bf16 %v6440_v6, %v6439_v3  ;;  %v6441_v8 = vld [vmem:[%s10331_s12 + $0x18] sm:$0xff] }
 0x6fd   : > { %8951 = vmatprep.subr.bf16.mxu0 %v10027_v0 }
 0x6fe   : > { %6390 = vst [vmem:[%s10627_s24 + $0x8] sm:$0xff] %v1927_v15 }
 0x6ff   : > { %7731 = vmatmul.mubr.msk.f32.gmra.mrb[20].mxu0 %vm658_vm1, %v10379_v34 }
 0x700   : > { %7735 = vmatprep.mubr.msk.f32.mxu0 %vm658_vm1, %v10384_v35 }
 0x703   : > { %7736 = vmatmul.mubr.msk.f32.vlgmr.msra.gmra.mrb[18].mxu0 %vm658_vm1, %v10394_v36 }
 0x704   : > { %8953 = vmatpush3.bf16.msra.mxu0 %v10683_v43  ;;  %7738 = vmatprep.mubr.msk.f32.mxu0 %vm658_vm1, %v10399_v37 }
 0x705   : > { %8954 = vmatprep.subr.bf16.mxu0 %v10027_v0 }
 0x707   : > { %7739 = vmatmul.mubr.msk.f32.gmra.mrb[20].mxu0 %vm658_vm1, %v10408_v38 }
 0x708   : > { %8956 = vmatpush3.bf16.msra.mxu0 %v10689_v49  ;;  %7808 = vmatprep.mubr.msk.f32.mxu0 %vm10028_vm0, %v10029_v1 }
 0x709   : > { %8957 = vmatprep.subr.bf16.mxu0 %v10027_v0 }
 0x70c   : > { %8959 = vmatpush3.bf16.msra.mxu0 %v10695_v57 }
 0x70d   : > { %8960 = vmatprep.subr.bf16.mxu0 %v10027_v0 }
 0x710   : > { %8962 = vmatpush3.bf16.msra.mxu0 %v10701_v22 }
 0x711   : > { %8963 = vmatprep.subr.bf16.mxu0 %v10027_v0 }
 0x714   : > { %8965 = vmatpush3.bf16.msra.mxu0 %v10707_v41 }
 0x715   : > { %8966 = vmatprep.subr.bf16.mxu0 %v10027_v0 }
 0x718   : > { %8968 = vmatpush3.bf16.msra.mxu0 %v10713_v48 }
 0x719   : > { %8969 = vmatprep.subr.bf16.mxu0 %v10027_v0 }
 0x71c   : > { %8971 = vmatpush3.bf16.msra.mxu0 %v10719_v62 }
 0x71d   : > { %8972 = vmatprep.subr.bf16.mxu0 %v10027_v0 }
 0x720   : > { %8974 = vmatpush3.bf16.msra.mxu0 %v10725_v5 }
 0x721   : > { %8975 = vmatprep.subr.bf16.mxu0 %v10027_v0 }
 0x723   : > { %7809 = vmatmul.mubr.f32.vlgmr.msra.gmra.mrb[22].mxu0 %v1927_v15  ;;  %v10890_v15 = vld [vmem:[%s12014_s3] sm:$0xff] }
 0x724   : > { %7859 = vmatprep.mubr.msk.f32.mxu0 %vm10028_vm0, %v10029_v1 }
 0x7d6   : > { %v7737_v29 = vpop.f32.mrb[18].mxu0 }
 0x7d7   : > { %v2263_v32 = vadd.f32 %v7737_v29, %v10436_v39  ;;  %v2243_v34 = vpop.f32.mrb[19].mxu0 }
 0x7d8   : > { %v2262_v35 = vadd.f32 %v2243_v34, %v10441_v40 }
 0x7d9   : > { %v2270_v36 = vmul.f32 0.5, %v2263_v32 }
 0x7da   : > { %v2266_v37 = vmul.f32 0.5, %v2262_v35  ;;  %v7740_v38 = vpop.f32.mrb[20].mxu0 }
 0x7db   : > { %9649 = vtanh.f32 %v2270_v36  ;;  %v2253_v42 = vpop.f32.mrb[21].mxu0  ;;  %v2265_v43 = vadd.f32 %v7740_v38, %v10448_v46 }
 0x7dc   : > { %9651 = vtanh.f32 %v2266_v37  ;;  %v2264_v49 = vadd.f32 %v2253_v42, %v10454_v51 }
 0x7dd   : > { %9653 = vtanh.f32 %v2265_v43 }
 0x7de   : > { %v2274_v57 = vmul.f32 0.5, %v2264_v49 }
 0x7e0   : > { %9655 = vtanh.f32 %v2274_v57 }
 0x7e5   : > { %v9650_v22 = vpop.eup %9649 }
 0x7e6   : > { %v9652_v41 = vpop.eup %9651  ;;  %v2272_v48 = vadd.f32 1.0, %v9650_v22 }
 0x7e7   : > { %v2268_v62 = vadd.f32 1.0, %v9652_v41  ;;  %v9654_v40 = vpop.eup %9653 }
 0x7e8   : > { %v2273_v39 = vmul.f32 0.5, %v2272_v48 }
 0x7e9   : > { %v2269_v5 = vmul.f32 0.5, %v2268_v62 }
 0x7ea   : > { %v2280_v27 = vmul.f32 %v2273_v39, %v10665_v18  ;;  %v9656_v46 = vpop.eup %9655  ;;  %v6425_v18 = vld [vmem:[%s10250_s20 + $0x180] sm:$0xff] }
 0x7eb   : > { %v2281_v17 = vmul.f32 %v9654_v40, %v2269_v5  ;;  %v2276_v51 = vadd.f32 1.0, %v9656_v46  ;;  %v10841_v63 = vpack.c.bf16 %v6426_v31, %v6425_v18  ;;  %v10971_v18 = vld [vmem:[%s12015_s2] sm:$0xff]  ;;  %v10978_v31 = vld [vmem:[%s12015_s2 + $0x8] sm:$0xff] }
 0x7ed   : > { %v10823_v20 = vadd.f32 %v2281_v17, %v2280_v27  ;;  %v2277_v24 = vmul.f32 0.5, %v2276_v51  ;;  %8977 = vmatpush3.bf16.msra.mxu0 %v10841_v63 }
 0x7ee   : > { %8978 = vmatprep.subr.bf16.mxu0 %v10027_v0 }
 0x7ef   : > { %9657 = vtanh.f32 %v10823_v20 }
 0x7f6   : > { %v2424_v21 = vpop.f32.mrb[22].mxu0 }
 0x7f7   : > { %v7810_v23 = vpop.f32.mrb[23].mxu0  ;;  %7811 = vmatprep.subr.mxu1 %v2424_v21 }
 0x7f9   : > { %v9658_v26 = vpop.eup %9657 }
 0x7fa   : > { %v10826_v28 = vmul.f32 %v9658_v26, %v2277_v24  ;;  %v10948_v24 = vld [vmem:[%s12014_s3 + $0x8] sm:$0xff]  ;;  %v10955_v26 = vld [vmem:[%s12014_s3 + $0x10] sm:$0xff] }
 0x7fc   : > { %7774 = vmatmul.mubr.f32.vlgmr.msra.gmra.mrb[18].mxu1 %v10826_v28 }
 0x7fd   : > { %7812 = vmatpush3.msra.mxu1 %v2424_v21  ;;  %7813 = vmatprep.mubr.msk.f32.mxu1 %vm658_vm1, %v10465_v9  ;;  %v6427_v9 = vld [vmem:[%s10250_s20 + $0x190] sm:$0xff] }
 0x800   : > { %7814 = vmatmul.mubr.msk.f32.vlgmr.msra.gmra.mrb[20].mxu1 %vm658_vm1, %v10473_v10  ;;  %v6428_v10 = vld [vmem:[%s10250_s20 + $0x198] sm:$0xff] }
 0x801   : > { %7816 = vmatprep.mubr.msk.f32.mxu1 %vm658_vm1, %v10478_v11  ;;  %v10847_v11 = vpack.c.bf16 %v6428_v10, %v6427_v9  ;;  %v10986_v9 = vld [vmem:[%s12015_s2 + $0x10] sm:$0xff]  ;;  %v10994_v10 = vld [vmem:[%s12015_s2 + $0x18] sm:$0xff] }
 0x803   : > { %8980 = vmatpush3.bf16.msra.mxu0 %v10847_v11 }
 0x804   : > { %7817 = vmatmul.mubr.msk.f32.gmra.mrb[22].mxu1 %vm658_vm1, %v10487_v12  ;;  %v6429_v12 = vld [vmem:[%s10250_s20 + $0x1a0] sm:$0xff]  ;;  %8981 = vmatprep.subr.bf16.mxu0 %v10027_v0 }
 0x805   : > { %7821 = vmatprep.mubr.msk.f32.mxu1 %vm658_vm1, %v10494_v13  ;;  %v10853_v13 = vpack.c.bf16 %v6430_v33, %v6429_v12 }
 0x807   : > { %8983 = vmatpush3.bf16.msra.mxu0 %v10853_v13 }
 0x808   : > { %8984 = vmatprep.subr.bf16.mxu0 %v10027_v0 }
 0x80b   : > { %8986 = vmatpush3.bf16.msra.mxu0 %v10859_v50 }
 0x80c   : > { %8987 = vmatprep.subr.bf16.mxu0 %v10027_v0 }
 0x80f   : > { %8989 = vmatpush3.bf16.msra.mxu0 %v10865_v19 }
 0x810   : > { %8990 = vmatprep.subr.bf16.mxu0 %v10027_v0 }
 0x813   : > { %8992 = vmatpush3.bf16.msra.mxu0 %v10871_v56 }
 0x814   : > { %8993 = vmatprep.subr.bf16.mxu0 %v10027_v0 }
 0x817   : > { %8995 = vmatpush3.bf16.msra.mxu0 %v10877_v2 }
 0x818   : > { %8996 = vmatprep.subr.bf16.mxu0 %v10027_v0 }
 0x81b   : > { %8998 = vmatpush3.bf16.msra.mxu0 %v10883_v7 }
 0x81e   : > { %7860 = vmatmul.mubr.f32.vlgmr.msra.gmra.mrb[24].mxu0 %v6441_v8 }
 0x81f   : > { %7899 = vmatprep.mubr.msk.f32.mxu0 %vm658_vm1, %v10890_v15 }
 0x8cf   : > { %v2353_v29 = vpop.f32.mrb[18].mxu1 }
 0x8d0   : > { %v7775_v32 = vpop.f32.mrb[19].mxu1  ;;  %7819 = vmatprep.subr.mxu1 %v2353_v29 }
 0x8d1   : > { %7820 = vmatpush3.msra.mxu1 %v2353_v29 }
 0x8d2   : > { %7822 = vmatmul.mubr.msk.f32.vlgmr.msra.gmra.mrb[20].mxu1 %vm658_vm1, %v10551_v52  ;;  %8999 = vmatprep.subr.bf16.mxu1 %v10027_v0 }
 0x8d3   : > { %9001 = vmatpush3.bf16.msra.mxu1 %v10841_v63  ;;  %7824 = vmatprep.mubr.msk.f32.mxu1 %vm658_vm1, %v10556_v54 }
 0x8d4   : > { %9002 = vmatprep.subr.bf16.mxu1 %v10027_v0 }
 0x8d6   : > { %7825 = vmatmul.mubr.msk.f32.gmra.mrb[22].mxu1 %vm658_vm1, %v10567_v55 }
 0x8d7   : > { %9004 = vmatpush3.bf16.msra.mxu1 %v10847_v11  ;;  %7894 = vmatprep.mubr.msk.f32.mxu1 %vm10028_vm0, %v10029_v1 }
 0x8d8   : > { %9005 = vmatprep.subr.bf16.mxu1 %v10027_v0 }
 0x8db   : > { %9007 = vmatpush3.bf16.msra.mxu1 %v10853_v13 }
 0x8dc   : > { %9008 = vmatprep.subr.bf16.mxu1 %v10027_v0 }
 0x8df   : > { %9010 = vmatpush3.bf16.msra.mxu1 %v10859_v50 }
 0x8e0   : > { %9011 = vmatprep.subr.bf16.mxu1 %v10027_v0 }
 0x8e3   : > { %9013 = vmatpush3.bf16.msra.mxu1 %v10865_v19 }
 0x8e4   : > { %9014 = vmatprep.subr.bf16.mxu1 %v10027_v0 }
 0x8e7   : > { %9016 = vmatpush3.bf16.msra.mxu1 %v10871_v56 }
 0x8e8   : > { %9017 = vmatprep.subr.bf16.mxu1 %v10027_v0 }
 0x8eb   : > { %9019 = vmatpush3.bf16.msra.mxu1 %v10877_v2 }
 0x8ec   : > { %9020 = vmatprep.subr.bf16.mxu1 %v10027_v0 }
 0x8ef   : > { %9022 = vmatpush3.bf16.msra.mxu1 %v10883_v7 }
 0x8f0   : > { %9023 = vmatprep.subr.bf16.mxu1 %v10027_v0 }
 0x8f1   : > { %v2710_v52 = vpop.f32.mrb[24].mxu0 }
 0x8f2   : > { %7895 = vmatmul.mubr.f32.vlgmr.msra.gmra.mrb[24].mxu1 %v10826_v28  ;;  %v7861_v54 = vpop.f32.mrb[25].mxu0  ;;  %v10964_v28 = vld [vmem:[%s12014_s3 + $0x18] sm:$0xff] }
 0x8f3   : > { %9025 = vmatpush3.bf16.msra.mxu1 %v10841_v63  ;;  %7945 = vmatprep.mubr.msk.f32.mxu1 %vm10028_vm0, %v10029_v1 }
 0x8f4   : > { %9026 = vmatprep.subr.bf16.mxu1 %v10027_v0 }
 0x8f7   : > { %9028 = vmatpush3.bf16.msra.mxu1 %v10847_v11 }
 0x8f8   : > { %9029 = vmatprep.subr.bf16.mxu1 %v10027_v0 }
 0x8fb   : > { %9031 = vmatpush3.bf16.msra.mxu1 %v10853_v13 }
 0x8fc   : > { %9032 = vmatprep.subr.bf16.mxu1 %v10027_v0 }
 0x8ff   : > { %9034 = vmatpush3.bf16.msra.mxu1 %v10859_v50 }
 0x900   : > { %9035 = vmatprep.subr.bf16.mxu1 %v10027_v0 }
 0x903   : > { %9037 = vmatpush3.bf16.msra.mxu1 %v10865_v19 }
 0x904   : > { %9038 = vmatprep.subr.bf16.mxu1 %v10027_v0 }
 0x907   : > { %9040 = vmatpush3.bf16.msra.mxu1 %v10871_v56 }
 0x908   : > { %9041 = vmatprep.subr.bf16.mxu1 %v10027_v0 }
 0x90b   : > { %9043 = vmatpush3.bf16.msra.mxu1 %v10877_v2 }
 0x90c   : > { %9044 = vmatprep.subr.bf16.mxu1 %v10027_v0 }
 0x90f   : > { %9046 = vmatpush3.bf16.msra.mxu1 %v10883_v7 }
 0x9a5   : > { %v7823_v55 = vpop.f32.mrb[20].mxu1 }
 0x9a6   : > { %v2599_v34 = vadd.f32 %v7823_v55, %v10606_v58  ;;  %v2579_v35 = vpop.f32.mrb[21].mxu1 }
 0x9a7   : > { %v2598_v36 = vadd.f32 %v2579_v35, %v10608_v59 }
 0x9a8   : > { %v2606_v37 = vmul.f32 0.5, %v2599_v34 }
 0x9a9   : > { %v2602_v38 = vmul.f32 0.5, %v2598_v36  ;;  %v7826_v42 = vpop.f32.mrb[22].mxu1 }
 0x9aa   : > { %9659 = vtanh.f32 %v2606_v37  ;;  %v2589_v43 = vpop.f32.mrb[23].mxu1  ;;  %v2601_v49 = vadd.f32 %v7826_v42, %v10612_v4 }
 0x9ab   : > { %9661 = vtanh.f32 %v2602_v38  ;;  %v2600_v57 = vadd.f32 %v2589_v43, %v10615_v14  ;;  %v11057_v43 = vld [vmem:[%s11975_s6 + $0x8] sm:$0xff] }
 0x9ac   : > { %9663 = vtanh.f32 %v2601_v49  ;;  %v11064_v49 = vld [vmem:[%s11975_s6 + $0x10] sm:$0xff] }
 0x9ad   : > { %v2610_v22 = vmul.f32 0.5, %v2600_v57  ;;  %v11071_v57 = vld [vmem:[%s11975_s6 + $0x18] sm:$0xff] }
 0x9af   : > { %9665 = vtanh.f32 %v2610_v22  ;;  %v11078_v22 = vld [vmem:[%s11974_s5] sm:$0xff] }
 0x9b4   : > { %v9660_v41 = vpop.eup %9659 }
 0x9b5   : > { %v9662_v48 = vpop.eup %9661  ;;  %v2608_v62 = vadd.f32 1.0, %v9660_v41  ;;  %v6459_v41 = vld [vmem:[%s10250_s20 + $0x200] sm:$0xff] }
 0x9b6   : > { %v2604_v39 = vadd.f32 1.0, %v9662_v48  ;;  %v9664_v59 = vpop.eup %9663  ;;  %v6460_v48 = vld [vmem:[%s10250_s20 + $0x208] sm:$0xff] }
 0x9b7   : > { %v2609_v58 = vmul.f32 0.5, %v2608_v62  ;;  %v11084_v62 = vpack.c.bf16 %v6460_v48, %v6459_v41  ;;  %v11199_v48 = vld [vmem:[#allocation9 + $0x10] sm:$0xff] }
 0x9b8   : > { %v2605_v5 = vmul.f32 0.5, %v2604_v39  ;;  %v6461_v39 = vld [vmem:[%s10250_s20 + $0x210] sm:$0xff] }
 0x9b9   : > { %v2616_v40 = vmul.f32 %v2609_v58, %v10779_v60  ;;  %v9666_v4 = vpop.eup %9665  ;;  %v6462_v58 = vld [vmem:[%s10250_s20 + $0x218] sm:$0xff] }
 0x9ba   : > { %v2617_v27 = vmul.f32 %v9664_v59, %v2605_v5  ;;  %v2612_v14 = vadd.f32 1.0, %v9666_v4  ;;  %v11090_v5 = vpack.c.bf16 %v6462_v58, %v6461_v39  ;;  %v6463_v59 = vld [vmem:[%s10250_s20 + $0x220] sm:$0xff]  ;;  %v6465_v4 = vld [vmem:[%s10250_s20 + $0x230] sm:$0xff] }
 0x9bc   : > { %v10942_v17 = vadd.f32 %v2617_v27, %v2616_v40  ;;  %v2613_v21 = vmul.f32 0.5, %v2612_v14  ;;  %v6464_v40 = vld [vmem:[%s10250_s20 + $0x228] sm:$0xff]  ;;  %v6466_v14 = vld [vmem:[%s10250_s20 + $0x238] sm:$0xff] }
 0x9bd   : > { %v11096_v27 = vpack.c.bf16 %v6464_v40, %v6463_v59 }
 0x9be   : > { %9667 = vtanh.f32 %v10942_v17 }
 0x9c5   : > { %v2781_v46 = vpop.f32.mrb[24].mxu1 }
 0x9c6   : > { %v7896_v51 = vpop.f32.mrb[25].mxu1  ;;  %7897 = vmatprep.subr.mxu0 %v2781_v46 }
 0x9c7   : > { %7898 = vmatpush3.msra.mxu0 %v2781_v46  ;;  %v11102_v46 = vpack.c.bf16 %v6466_v14, %v6465_v4  ;;  %v6467_v51 = vld [vmem:[%s10250_s20 + $0x240] sm:$0xff] }
 0x9c8   : > { %v9668_v23 = vpop.eup %9667  ;;  %7900 = vmatmul.mubr.msk.f32.vlgmr.msra.gmra.mrb[26].mxu0 %vm658_vm1, %v10948_v24  ;;  %7905 = vmatprep.subr.mxu0 %v2710_v52 }
 0x9c9   : > { %v2620_v60 = vmul.f32 %v9668_v23, %v2613_v21  ;;  %7902 = vmatprep.mubr.msk.f32.mxu0 %vm658_vm1, %v10955_v26  ;;  %7906 = vmatpush3.msra.mxu0 %v2710_v52  ;;  %v6468_v21 = vld [vmem:[%s10250_s20 + $0x248] sm:$0xff] }
 0x9ca   : > { %9047 = vmatprep.subr.bf16.mxu0 %v10027_v0  ;;  %v11108_v23 = vpack.c.bf16 %v6468_v21, %v6467_v51 }
 0x9cb   : > { %6424 = vst [vmem:[%s10627_s24 + $0x10] sm:$0xff] %v2620_v60 }
 0x9cc   : > { %7903 = vmatmul.mubr.msk.f32.gmra.mrb[28].mxu0 %vm658_vm1, %v10964_v28 }
 0x9cd   : > { %7907 = vmatprep.mubr.msk.f32.mxu0 %vm658_vm1, %v10971_v18 }
 0x9d0   : > { %7908 = vmatmul.mubr.msk.f32.vlgmr.msra.gmra.mrb[26].mxu0 %vm658_vm1, %v10978_v31 }
 0x9d1   : > { %9049 = vmatpush3.bf16.msra.mxu0 %v10841_v63  ;;  %7910 = vmatprep.mubr.msk.f32.mxu0 %vm658_vm1, %v10986_v9 }
 0x9d2   : > { %9050 = vmatprep.subr.bf16.mxu0 %v10027_v0 }
 0x9d4   : > { %7911 = vmatmul.mubr.msk.f32.gmra.mrb[28].mxu0 %vm658_vm1, %v10994_v10 }
 0x9d5   : > { %9052 = vmatpush3.bf16.msra.mxu0 %v10847_v11  ;;  %7980 = vmatprep.mubr.msk.f32.mxu0 %vm10028_vm0, %v10029_v1  ;;  %v11019_v11 = vld [vmem:[%s11973_s4 + $0x8] sm:$0xff] }
 0x9d6   : > { %9053 = vmatprep.subr.bf16.mxu0 %v10027_v0 }
 0x9d9   : > { %9055 = vmatpush3.bf16.msra.mxu0 %v10853_v13  ;;  %v11025_v13 = vld [vmem:[%s11973_s4] sm:$0xff] }
 0x9da   : > { %9056 = vmatprep.subr.bf16.mxu0 %v10027_v0 }
 0x9dd   : > { %9058 = vmatpush3.bf16.msra.mxu0 %v10859_v50 }
 0x9de   : > { %9059 = vmatprep.subr.bf16.mxu0 %v10027_v0 }
 0x9e1   : > { %9061 = vmatpush3.bf16.msra.mxu0 %v10865_v19  ;;  %v11031_v19 = vld [vmem:[%s11973_s4 + $0x18] sm:$0xff] }
 0x9e2   : > { %9062 = vmatprep.subr.bf16.mxu0 %v10027_v0 }
 0x9e5   : > { %9064 = vmatpush3.bf16.msra.mxu0 %v10871_v56 }
 0x9e6   : > { %9065 = vmatprep.subr.bf16.mxu0 %v10027_v0 }
 0x9e9   : > { %9067 = vmatpush3.bf16.msra.mxu0 %v10877_v2 }
 0x9ea   : > { %9068 = vmatprep.subr.bf16.mxu0 %v10027_v0 }
 0x9ed   : > { %9070 = vmatpush3.bf16.msra.mxu0 %v10883_v7 }
 0x9ee   : > { %9071 = vmatprep.subr.bf16.mxu0 %v10027_v0 }
 0x9f0   : > { %7981 = vmatmul.mubr.f32.vlgmr.msra.gmra.mrb[30].mxu0 %v2620_v60  ;;  %v6469_v60 = vld [vmem:[%s10250_s20 + $0x250] sm:$0xff] }
 0x9f1   : > { %8031 = vmatprep.mubr.msk.f32.mxu0 %vm10028_vm0, %v10029_v1  ;;  %9073 = vmatpush3.bf16.msra.mxu0 %v11084_v62 }
 0x9f2   : > { %9074 = vmatprep.subr.bf16.mxu0 %v10027_v0 }
 0x9f5   : > { %9076 = vmatpush3.bf16.msra.mxu0 %v11090_v5 }
 0x9f6   : > { %9077 = vmatprep.subr.bf16.mxu0 %v10027_v0 }
 0x9f9   : > { %9079 = vmatpush3.bf16.msra.mxu0 %v11096_v27 }
 0x9fa   : > { %9080 = vmatprep.subr.bf16.mxu0 %v10027_v0 }
 0x9fd   : > { %9082 = vmatpush3.bf16.msra.mxu0 %v11102_v46 }
 0x9fe   : > { %9083 = vmatprep.subr.bf16.mxu0 %v10027_v0 }
 0xa01   : > { %9085 = vmatpush3.bf16.msra.mxu0 %v11108_v23 }
 0xa02   : > { %9086 = vmatprep.subr.bf16.mxu0 %v10027_v0 }
 0xaa3   : > { %v7909_v63 = vpop.f32.mrb[26].mxu0 }
 0xaa4   : > { %v2956_v12 = vadd.f32 %v11019_v11, %v7909_v63  ;;  %v2936_v33 = vpop.f32.mrb[27].mxu0  ;;  %v6470_v63 = vld [vmem:[%s10250_s20 + $0x258] sm:$0xff] }
 0xaa5   : > { %v2955_v45 = vadd.f32 %v11025_v13, %v2936_v33  ;;  %v6471_v33 = vld [vmem:[%s10250_s20 + $0x260] sm:$0xff] }
 0xaa6   : > { %v2963_v47 = vmul.f32 0.5, %v2956_v12  ;;  %v11114_v12 = vpack.c.bf16 %v6470_v63, %v6469_v60 }
 0xaa7   : > { %v2959_v50 = vmul.f32 0.5, %v2955_v45  ;;  %v7912_v53 = vpop.f32.mrb[28].mxu0  ;;  %v6472_v45 = vld [vmem:[%s10250_s20 + $0x268] sm:$0xff] }
 0xaa8   : > { %9669 = vtanh.f32 %v2963_v47  ;;  %v2946_v16 = vpop.f32.mrb[29].mxu0  ;;  %v2958_v25 = vadd.f32 %v11031_v19, %v7912_v53  ;;  %9088 = vmatpush3.bf16.msra.mxu0 %v11114_v12  ;;  %v11120_v47 = vpack.c.bf16 %v6472_v45, %v6471_v33  ;;  %v6474_v53 = vld [vmem:[%s10250_s20 + $0x278] sm:$0xff] }
 0xaa9   : > { %9671 = vtanh.f32 %v2959_v50  ;;  %v2957_v56 = vadd.f32 %v11037_v30, %v2946_v16  ;;  %9089 = vmatprep.subr.bf16.mxu0 %v10027_v0  ;;  %v6473_v50 = vld [vmem:[%s10250_s20 + $0x270] sm:$0xff] }
 0xaaa   : > { %9673 = vtanh.f32 %v2958_v25  ;;  %v11126_v16 = vpack.c.bf16 %v6474_v53, %v6473_v50  ;;  %v6475_v25 = vld [vmem:[%s10331_s12 + $0x20] sm:$0xff] }
 0xaab   : > { %v2967_v44 = vmul.f32 0.5, %v2957_v56 }
 0xaac   : > { %9091 = vmatpush3.bf16.msra.mxu0 %v11120_v47 }
 0xaad   : > { %9675 = vtanh.f32 %v2967_v44  ;;  %9092 = vmatprep.subr.bf16.mxu0 %v10027_v0 }
 0xab0   : > { %9094 = vmatpush3.bf16.msra.mxu0 %v11126_v16 }
 0xab2   : > { %v9670_v61 = vpop.eup %9669 }
 0xab3   : > { %v9672_v2 = vpop.eup %9671  ;;  %v2965_v3 = vadd.f32 1.0, %v9670_v61  ;;  %8032 = vmatmul.mubr.f32.vlgmr.msra.gmra.mrb[32].mxu0 %v6475_v25  ;;  %v11135_v61 = vld [vmem:[%s11974_s5 + $0x8] sm:$0xff] }
 0xab4   : > { %v2961_v6 = vadd.f32 1.0, %v9672_v2  ;;  %v9674_v29 = vpop.eup %9673  ;;  %8071 = vmatprep.mubr.msk.f32.mxu0 %vm658_vm1, %v10890_v15  ;;  %v11144_v2 = vld [vmem:[%s11974_s5 + $0x10] sm:$0xff] }
 0xab5   : > { %v2966_v7 = vmul.f32 0.5, %v2965_v3  ;;  %v11152_v3 = vld [vmem:[%s11974_s5 + $0x18] sm:$0xff] }
 0xab6   : > { %v2962_v8 = vmul.f32 0.5, %v2961_v6 }
 0xab7   : > { %v2973_v32 = vmul.f32 %v2966_v7, %v10823_v20  ;;  %v9676_v55 = vpop.eup %9675  ;;  %v11050_v20 = vld [vmem:[%s11975_s6] sm:$0xff] }
 0xab8   : > { %v2974_v52 = vmul.f32 %v9674_v29, %v2962_v8  ;;  %v2969_v34 = vadd.f32 1.0, %v9676_v55  ;;  %v11190_v29 = vld [vmem:[#allocation9 + $0x8] sm:$0xff]  ;;  %v11193_v55 = vld [vmem:[#allocation9] sm:$0xff] }
 0xaba   : > { %v11041_v54 = vadd.f32 %v2974_v52, %v2973_v32  ;;  %v2970_v37 = vmul.f32 0.5, %v2969_v34 }
 0xabc   : > { %9677 = vtanh.f32 %v11041_v54 }
 0xac3   : > { %v3117_v35 = vpop.f32.mrb[30].mxu0 }
 0xac4   : > { %v7982_v36 = vpop.f32.mrb[31].mxu0  ;;  %7983 = vmatprep.subr.mxu1 %v3117_v35 }
 0xac6   : > { %v9678_v38 = vpop.eup %9677 }
 0xac7   : > { %v11044_v42 = vmul.f32 %v9678_v38, %v2970_v37 }
 0xac9   : > { %7946 = vmatmul.mubr.f32.vlgmr.msra.gmra.mrb[26].mxu1 %v11044_v42 }
 0xaca   : > { %7984 = vmatpush3.msra.mxu1 %v3117_v35  ;;  %7985 = vmatprep.mubr.msk.f32.mxu1 %vm658_vm1, %v11050_v20 }
 0xacd   : > { %7986 = vmatmul.mubr.msk.f32.vlgmr.msra.gmra.mrb[28].mxu1 %vm658_vm1, %v11057_v43 }
 0xace   : > { %7988 = vmatprep.mubr.msk.f32.mxu1 %vm658_vm1, %v11064_v49 }
 0xad1   : > { %7989 = vmatmul.mubr.msk.f32.gmra.mrb[30].mxu1 %vm658_vm1, %v11071_v57 }
 0xad2   : > { %7993 = vmatprep.mubr.msk.f32.mxu1 %vm658_vm1, %v11078_v22 }
 0xb86   : > { %v3403_v6 = vpop.f32.mrb[32].mxu0 }
 0xb87   : > { %v8033_v7 = vpop.f32.mrb[33].mxu0 }
 0xb9c   : > { %v3046_v56 = vpop.f32.mrb[26].mxu1 }
 0xb9d   : > { %v7947_v44 = vpop.f32.mrb[27].mxu1  ;;  %7991 = vmatprep.subr.mxu1 %v3046_v56 }
 0xb9e   : > { %7992 = vmatpush3.msra.mxu1 %v3046_v56 }
 0xb9f   : > { %7994 = vmatmul.mubr.msk.f32.vlgmr.msra.gmra.mrb[28].mxu1 %vm658_vm1, %v11135_v61  ;;  %9095 = vmatprep.subr.bf16.mxu1 %v10027_v0 }
 0xba0   : > { %9097 = vmatpush3.bf16.msra.mxu1 %v11084_v62  ;;  %7996 = vmatprep.mubr.msk.f32.mxu1 %vm658_vm1, %v11144_v2 }
 0xba1   : > { %9098 = vmatprep.subr.bf16.mxu1 %v10027_v0 }
 0xba3   : > { %7997 = vmatmul.mubr.msk.f32.gmra.mrb[30].mxu1 %vm658_vm1, %v11152_v3 }
 0xba4   : > { %9100 = vmatpush3.bf16.msra.mxu1 %v11090_v5  ;;  %8066 = vmatprep.mubr.msk.f32.mxu1 %vm10028_vm0, %v10029_v1 }
 0xba5   : > { %9101 = vmatprep.subr.bf16.mxu1 %v10027_v0 }
 0xba8   : > { %9103 = vmatpush3.bf16.msra.mxu1 %v11096_v27 }
 0xba9   : > { %9104 = vmatprep.subr.bf16.mxu1 %v10027_v0 }
 0xbac   : > { %9106 = vmatpush3.bf16.msra.mxu1 %v11102_v46 }
 0xbad   : > { %9107 = vmatprep.subr.bf16.mxu1 %v10027_v0 }
 0xbb0   : > { %9109 = vmatpush3.bf16.msra.mxu1 %v11108_v23 }
 0xbb1   : > { %9110 = vmatprep.subr.bf16.mxu1 %v10027_v0 }
 0xbb4   : > { %9112 = vmatpush3.bf16.msra.mxu1 %v11114_v12 }
 0xbb5   : > { %9113 = vmatprep.subr.bf16.mxu1 %v10027_v0 }
 0xbb8   : > { %9115 = vmatpush3.bf16.msra.mxu1 %v11120_v47 }
 0xbb9   : > { %9116 = vmatprep.subr.bf16.mxu1 %v10027_v0 }
 0xbbc   : > { %9118 = vmatpush3.bf16.msra.mxu1 %v11126_v16 }
 0xbbd   : > { %9119 = vmatprep.subr.bf16.mxu1 %v10027_v0 }
 0xbbf   : > { %8067 = vmatmul.mubr.f32.vlgmr.msra.gmra.mrb[32].mxu1 %v11044_v42  ;;  %v11196_v42 = vld [vmem:[#allocation9 + $0x18] sm:$0xff] }
 0xbc0   : > { %9121 = vmatpush3.bf16.msra.mxu1 %v11084_v62  ;;  %8117 = vmatprep.mubr.msk.f32.mxu1 %vm10028_vm0, %v10029_v1 }
 0xbc1   : > { %9122 = vmatprep.subr.bf16.mxu1 %v10027_v0 }
 0xbc4   : > { %9124 = vmatpush3.bf16.msra.mxu1 %v11090_v5 }
 0xbc5   : > { %9125 = vmatprep.subr.bf16.mxu1 %v10027_v0 }
 0xbc8   : > { %9127 = vmatpush3.bf16.msra.mxu1 %v11096_v27 }
 0xbc9   : > { %9128 = vmatprep.subr.bf16.mxu1 %v10027_v0 }
 0xbcc   : > { %9130 = vmatpush3.bf16.msra.mxu1 %v11102_v46 }
 0xbcd   : > { %9131 = vmatprep.subr.bf16.mxu1 %v10027_v0 }
 0xbd0   : > { %9133 = vmatpush3.bf16.msra.mxu1 %v11108_v23 }
 0xbd1   : > { %9134 = vmatprep.subr.bf16.mxu1 %v10027_v0 }
 0xbd4   : > { %9136 = vmatpush3.bf16.msra.mxu1 %v11114_v12 }
 0xbd5   : > { %9137 = vmatprep.subr.bf16.mxu1 %v10027_v0 }
 0xbd8   : > { %9139 = vmatpush3.bf16.msra.mxu1 %v11120_v47 }
 0xbd9   : > { %9140 = vmatprep.subr.bf16.mxu1 %v10027_v0 }
 0xbdc   : > { %9142 = vmatpush3.bf16.msra.mxu1 %v11126_v16 }
 0xc72   : > { %v7995_v8 = vpop.f32.mrb[28].mxu1 }
 0xc73   : > { %v3292_v32 = vadd.f32 %v11190_v29, %v7995_v8  ;;  %v3272_v52 = vpop.f32.mrb[29].mxu1 }
 0xc74   : > { %v3291_v34 = vadd.f32 %v11193_v55, %v3272_v52 }
 0xc75   : > { %v3299_v35 = vmul.f32 0.5, %v3292_v32 }
 0xc76   : > { %v3295_v36 = vmul.f32 0.5, %v3291_v34  ;;  %v7998_v37 = vpop.f32.mrb[30].mxu1 }
 0xc77   : > { %9679 = vtanh.f32 %v3299_v35  ;;  %v3282_v38 = vpop.f32.mrb[31].mxu1  ;;  %v3294_v41 = vadd.f32 %v11196_v42, %v7998_v37 }
 0xc78   : > { %9681 = vtanh.f32 %v3295_v36  ;;  %v3293_v39 = vadd.f32 %v11199_v48, %v3282_v38 }
 0xc79   : > { %9683 = vtanh.f32 %v3294_v41 }
 0xc7a   : > { %v3303_v58 = vmul.f32 0.5, %v3293_v39 }
 0xc7c   : > { %9685 = vtanh.f32 %v3303_v58 }
 0xc81   : > { %v9680_v59 = vpop.eup %9679 }
 0xc82   : > { %v9682_v40 = vpop.eup %9681  ;;  %v3301_v4 = vadd.f32 1.0, %v9680_v59 }
 0xc83   : > { %v3297_v14 = vadd.f32 1.0, %v9682_v40  ;;  %v9684_v60 = vpop.eup %9683 }
 0xc84   : > { %v3302_v51 = vmul.f32 0.5, %v3301_v4 }
 0xc85   : > { %v3298_v21 = vmul.f32 0.5, %v3297_v14 }
 0xc86   : > { %v3309_v63 = vmul.f32 %v3302_v51, %v10942_v17  ;;  %v9686_v50 = vpop.eup %9685 }
 0xc87   : > { %v3310_v33 = vmul.f32 %v9684_v60, %v3298_v21  ;;  %v3305_v53 = vadd.f32 1.0, %v9686_v50 }
 0xc89   : > { %v11203_v45 = vadd.f32 %v3310_v33, %v3309_v63  ;;  %v3306_v44 = vmul.f32 0.5, %v3305_v53  ;;  %v6494_v33 = vld [vmem:[%s10250_s20 + $0x288] sm:$0xff]  ;;  %v6495_v53 = vld [vmem:[%s10250_s20 + $0x290] sm:$0xff] }
 0xc8b   : > { %9687 = vtanh.f32 %v11203_v45 }
 0xc92   : > { %v3474_v25 = vpop.f32.mrb[32].mxu1 }
 0xc93   : > { %v8068_v56 = vpop.f32.mrb[33].mxu1  ;;  %8069 = vmatprep.subr.mxu0 %v3474_v25 }
 0xc94   : > { %8070 = vmatpush3.msra.mxu0 %v3474_v25  ;;  %v6496_v25 = vld [vmem:[%s10250_s20 + $0x298] sm:$0xff] }
 0xc95   : > { %v9688_v7 = vpop.eup %9687  ;;  %8072 = vmatmul.mubr.msk.f32.vlgmr.msra.gmra.mrb[34].mxu0 %vm658_vm1, %v10948_v24  ;;  %8077 = vmatprep.subr.mxu0 %v3403_v6  ;;  %v11271_v56 = vpack.c.bf16 %v6496_v25, %v6495_v53 }
 0xc96   : > { %v3313_v8 = vmul.f32 %v9688_v7, %v3306_v44  ;;  %8074 = vmatprep.mubr.msk.f32.mxu0 %vm658_vm1, %v10955_v26  ;;  %8078 = vmatpush3.msra.mxu0 %v3403_v6  ;;  %v6497_v44 = vld [vmem:[%s10250_s20 + $0x2a0] sm:$0xff]  ;;  %v6498_v7 = vld [vmem:[%s10250_s20 + $0x2a8] sm:$0xff] }
 0xc97   : > { %9143 = vmatprep.subr.bf16.mxu0 %v10027_v0 }
 0xc98   : > { %6458 = vst [vmem:[%s10627_s24 + $0x18] sm:$0xff] %v3313_v8 }
 0xc99   : > { %8075 = vmatmul.mubr.msk.f32.gmra.mrb[36].mxu0 %vm658_vm1, %v10964_v28 }
 0xc9a   : > { %8079 = vmatprep.mubr.msk.f32.mxu0 %vm658_vm1, %v10971_v18 }
 0xc9d   : > { %8080 = vmatmul.mubr.msk.f32.vlgmr.msra.gmra.mrb[34].mxu0 %vm658_vm1, %v10978_v31 }
 0xc9e   : > { %9145 = vmatpush3.bf16.msra.mxu0 %v11084_v62  ;;  %8082 = vmatprep.mubr.msk.f32.mxu0 %vm658_vm1, %v10986_v9 }
 0xc9f   : > { %9146 = vmatprep.subr.bf16.mxu0 %v10027_v0 }
 0xca1   : > { %8083 = vmatmul.mubr.msk.f32.gmra.mrb[36].mxu0 %vm658_vm1, %v10994_v10 }
 0xca2   : > { %9148 = vmatpush3.bf16.msra.mxu0 %v11090_v5  ;;  %8152 = vmatprep.mubr.msk.f32.mxu0 %vm10028_vm0, %v10029_v1 }
 0xca3   : > { %9149 = vmatprep.subr.bf16.mxu0 %v10027_v0 }
 0xca6   : > { %9151 = vmatpush3.bf16.msra.mxu0 %v11096_v27 }
 0xca7   : > { %9152 = vmatprep.subr.bf16.mxu0 %v10027_v0 }
 0xcaa   : > { %9154 = vmatpush3.bf16.msra.mxu0 %v11102_v46 }
 0xcab   : > { %9155 = vmatprep.subr.bf16.mxu0 %v10027_v0 }
 0xcae   : > { %9157 = vmatpush3.bf16.msra.mxu0 %v11108_v23 }
 0xcaf   : > { %9158 = vmatprep.subr.bf16.mxu0 %v10027_v0 }
 0xcb2   : > { %9160 = vmatpush3.bf16.msra.mxu0 %v11114_v12 }
 0xcb3   : > { %9161 = vmatprep.subr.bf16.mxu0 %v10027_v0 }
 0xcb6   : > { %9163 = vmatpush3.bf16.msra.mxu0 %v11120_v47 }
 0xcb7   : > { %9164 = vmatprep.subr.bf16.mxu0 %v10027_v0 }
 0xcba   : > { %9166 = vmatpush3.bf16.msra.mxu0 %v11126_v16 }
 0xcbb   : > { %9167 = vmatprep.subr.bf16.mxu0 %v10027_v0 }
 0xcbd   : > { %8153 = vmatmul.mubr.f32.vlgmr.msra.gmra.mrb[38].mxu0 %v3313_v8  ;;  %v11277_v8 = vpack.c.bf16 %v6498_v7, %v6497_v44 }
 0xcbe   : > { %8203 = vmatprep.mubr.msk.f32.mxu0 %vm10028_vm0, %v10029_v1 }
 0xd70   : > { %v8081_v17 = vpop.f32.mrb[34].mxu0 }
 0xd71   : > { %v3649_v62 = vadd.f32 %v11019_v11, %v8081_v17  ;;  %v3629_v5 = vpop.f32.mrb[35].mxu0  ;;  %v6499_v17 = vld [vmem:[%s10250_s20 + $0x2b0] sm:$0xff] }
 0xd72   : > { %v3648_v27 = vadd.f32 %v11025_v13, %v3629_v5 }
 0xd73   : > { %v3656_v46 = vmul.f32 0.5, %v3649_v62  ;;  %v6500_v62 = vld [vmem:[%s10250_s20 + $0x2b8] sm:$0xff] }
 0xd74   : > { %v3652_v23 = vmul.f32 0.5, %v3648_v27  ;;  %v8084_v12 = vpop.f32.mrb[36].mxu0  ;;  %v11283_v5 = vpack.c.bf16 %v6500_v62, %v6499_v17  ;;  %v6501_v27 = vld [vmem:[%s10250_s20 + $0x2c0] sm:$0xff] }
 0xd75   : > { %9689 = vtanh.f32 %v3656_v46  ;;  %v3639_v47 = vpop.f32.mrb[37].mxu0  ;;  %v3651_v16 = vadd.f32 %v11031_v19, %v8084_v12  ;;  %v6502_v46 = vld [vmem:[%s10250_s20 + $0x2c8] sm:$0xff]  ;;  %v6503_v12 = vld [vmem:[%s10250_s20 + $0x2d0] sm:$0xff] }
 0xd76   : > { %9691 = vtanh.f32 %v3652_v23  ;;  %v3650_v6 = vadd.f32 %v11037_v30, %v3639_v47  ;;  %v11289_v23 = vpack.c.bf16 %v6502_v46, %v6501_v27  ;;  %v6504_v47 = vld [vmem:[%s10250_s20 + $0x2d8] sm:$0xff] }
 0xd77   : > { %9693 = vtanh.f32 %v3651_v16  ;;  %v11295_v16 = vpack.c.bf16 %v6504_v47, %v6503_v12 }
 0xd78   : > { %v3660_v32 = vmul.f32 0.5, %v3650_v6  ;;  %v6505_v6 = vld [vmem:[%s10250_s20 + $0x2e0] sm:$0xff] }
 0xd7a   : > { %9695 = vtanh.f32 %v3660_v32  ;;  %v6506_v32 = vld [vmem:[%s10250_s20 + $0x2e8] sm:$0xff] }
 0xd7f   : > { %v9690_v52 = vpop.eup %9689 }
 0xd80   : > { %v9692_v34 = vpop.eup %9691  ;;  %v3658_v35 = vadd.f32 1.0, %v9690_v52  ;;  %v11301_v52 = vpack.c.bf16 %v6506_v32, %v6505_v6 }
 0xd81   : > { %v3654_v36 = vadd.f32 1.0, %v9692_v34  ;;  %v9694_v41 = vpop.eup %9693  ;;  %v6507_v34 = vld [vmem:[%s10250_s20 + $0x2f0] sm:$0xff] }
 0xd82   : > { %v3659_v37 = vmul.f32 0.5, %v3658_v35  ;;  %v6508_v35 = vld [vmem:[%s10250_s20 + $0x2f8] sm:$0xff] }
 0xd83   : > { %v3655_v38 = vmul.f32 0.5, %v3654_v36  ;;  %v11307_v36 = vpack.c.bf16 %v6508_v35, %v6507_v34 }
 0xd84   : > { %v3666_v39 = vmul.f32 %v3659_v37, %v11041_v54  ;;  %v9696_v40 = vpop.eup %9695  ;;  %v6493_v54 = vld [vmem:[%s10250_s20 + $0x280] sm:$0xff]  ;;  %v6509_v37 = vld [vmem:[%s10331_s12 + $0x28] sm:$0xff] }
 0xd85   : > { %v3667_v58 = vmul.f32 %v9694_v41, %v3655_v38  ;;  %v3662_v4 = vadd.f32 1.0, %v9696_v40  ;;  %v11265_v50 = vpack.c.bf16 %v6494_v33, %v6493_v54 }
 0xd87   : > { %v11247_v59 = vadd.f32 %v3667_v58, %v3666_v39  ;;  %v3663_v21 = vmul.f32 0.5, %v3662_v4  ;;  %9169 = vmatpush3.bf16.msra.mxu0 %v11265_v50 }
 0xd88   : > { %9170 = vmatprep.subr.bf16.mxu0 %v10027_v0 }
 0xd89   : > { %9697 = vtanh.f32 %v11247_v59 }
 0xd8b   : > { %9172 = vmatpush3.bf16.msra.mxu0 %v11271_v56 }
 0xd8c   : > { %9173 = vmatprep.subr.bf16.mxu0 %v10027_v0 }
 0xd8f   : > { %9175 = vmatpush3.bf16.msra.mxu0 %v11277_v8 }
 0xd90   : > { %v3810_v14 = vpop.f32.mrb[38].mxu0  ;;  %9176 = vmatprep.subr.bf16.mxu0 %v10027_v0 }
 0xd91   : > { %v8154_v51 = vpop.f32.mrb[39].mxu0  ;;  %8155 = vmatprep.subr.mxu1 %v3810_v14 }
 0xd93   : > { %v9698_v60 = vpop.eup %9697  ;;  %9178 = vmatpush3.bf16.msra.mxu0 %v11283_v5 }
 0xd94   : > { %v11250_v63 = vmul.f32 %v9698_v60, %v3663_v21  ;;  %9179 = vmatprep.subr.bf16.mxu0 %v10027_v0 }
 0xd96   : > { %8118 = vmatmul.mubr.f32.vlgmr.msra.gmra.mrb[34].mxu1 %v11250_v63 }
 0xd97   : > { %8156 = vmatpush3.msra.mxu1 %v3810_v14  ;;  %8157 = vmatprep.mubr.msk.f32.mxu1 %vm658_vm1, %v11050_v20 }
 0xd98   : > { %9181 = vmatpush3.bf16.msra.mxu0 %v11289_v23 }
 0xd99   : > { %9182 = vmatprep.subr.bf16.mxu0 %v10027_v0 }
 0xd9a   : > { %8158 = vmatmul.mubr.msk.f32.vlgmr.msra.gmra.mrb[36].mxu1 %vm658_vm1, %v11057_v43 }
 0xd9b   : > { %8160 = vmatprep.mubr.msk.f32.mxu1 %vm658_vm1, %v11064_v49 }
 0xd9c   : > { %9184 = vmatpush3.bf16.msra.mxu0 %v11295_v16 }
 0xd9d   : > { %9185 = vmatprep.subr.bf16.mxu0 %v10027_v0 }
 0xd9e   : > { %8161 = vmatmul.mubr.msk.f32.gmra.mrb[38].mxu1 %vm658_vm1, %v11071_v57 }
 0xd9f   : > { %8165 = vmatprep.mubr.msk.f32.mxu1 %vm658_vm1, %v11078_v22 }
 0xda0   : > { %9187 = vmatpush3.bf16.msra.mxu0 %v11301_v52 }
 0xda1   : > { %9188 = vmatprep.subr.bf16.mxu0 %v10027_v0 }
 0xda4   : > { %9190 = vmatpush3.bf16.msra.mxu0 %v11307_v36 }
 0xda7   : > { %8204 = vmatmul.mubr.f32.vlgmr.msra.gmra.mrb[40].mxu0 %v6509_v37 }
 0xda8   : > { %8243 = vmatprep.mubr.msk.f32.mxu0 %vm658_vm1, %v10890_v15 }
 0xe69   : > { %v3739_v38 = vpop.f32.mrb[34].mxu1 }
 0xe6a   : > { %v8119_v41 = vpop.f32.mrb[35].mxu1  ;;  %8163 = vmatprep.subr.mxu1 %v3739_v38 }
 0xe6b   : > { %8164 = vmatpush3.msra.mxu1 %v3739_v38 }
 0xe6c   : > { %8166 = vmatmul.mubr.msk.f32.vlgmr.msra.gmra.mrb[36].mxu1 %vm658_vm1, %v11135_v61  ;;  %9191 = vmatprep.subr.bf16.mxu1 %v10027_v0 }
 0xe6d   : > { %9193 = vmatpush3.bf16.msra.mxu1 %v11265_v50  ;;  %8168 = vmatprep.mubr.msk.f32.mxu1 %vm658_vm1, %v11144_v2 }
 0xe6e   : > { %9194 = vmatprep.subr.bf16.mxu1 %v10027_v0 }
 0xe70   : > { %8169 = vmatmul.mubr.msk.f32.gmra.mrb[38].mxu1 %vm658_vm1, %v11152_v3 }
 0xe71   : > { %9196 = vmatpush3.bf16.msra.mxu1 %v11271_v56  ;;  %8238 = vmatprep.mubr.msk.f32.mxu1 %vm10028_vm0, %v10029_v1 }
 0xe72   : > { %9197 = vmatprep.subr.bf16.mxu1 %v10027_v0 }
 0xe75   : > { %9199 = vmatpush3.bf16.msra.mxu1 %v11277_v8 }
 0xe76   : > { %9200 = vmatprep.subr.bf16.mxu1 %v10027_v0 }
 0xe79   : > { %9202 = vmatpush3.bf16.msra.mxu1 %v11283_v5 }
 0xe7a   : > { %9203 = vmatprep.subr.bf16.mxu1 %v10027_v0  ;;  %v4096_v15 = vpop.f32.mrb[40].mxu0 }
 0xe7b   : > { %v8205_v39 = vpop.f32.mrb[41].mxu0 }
 0xe7d   : > { %9205 = vmatpush3.bf16.msra.mxu1 %v11289_v23 }
 0xe7e   : > { %9206 = vmatprep.subr.bf16.mxu1 %v10027_v0 }
 0xe81   : > { %9208 = vmatpush3.bf16.msra.mxu1 %v11295_v16 }
 0xe82   : > { %9209 = vmatprep.subr.bf16.mxu1 %v10027_v0 }
 0xe85   : > { %9211 = vmatpush3.bf16.msra.mxu1 %v11301_v52 }
 0xe86   : > { %9212 = vmatprep.subr.bf16.mxu1 %v10027_v0 }
 0xe89   : > { %9214 = vmatpush3.bf16.msra.mxu1 %v11307_v36 }
 0xe8a   : > { %9215 = vmatprep.subr.bf16.mxu1 %v10027_v0 }
 0xe8c   : > { %8239 = vmatmul.mubr.f32.vlgmr.msra.gmra.mrb[40].mxu1 %v11250_v63 }
 0xe8d   : > { %9217 = vmatpush3.bf16.msra.mxu1 %v11265_v50  ;;  %8289 = vmatprep.mubr.msk.f32.mxu1 %vm10028_vm0, %v10029_v1 }
 0xe8e   : > { %9218 = vmatprep.subr.bf16.mxu1 %v10027_v0 }
 0xe91   : > { %9220 = vmatpush3.bf16.msra.mxu1 %v11271_v56 }
 0xe92   : > { %9221 = vmatprep.subr.bf16.mxu1 %v10027_v0 }
 0xe95   : > { %9223 = vmatpush3.bf16.msra.mxu1 %v11277_v8 }
 0xe96   : > { %9224 = vmatprep.subr.bf16.mxu1 %v10027_v0 }
 0xe99   : > { %9226 = vmatpush3.bf16.msra.mxu1 %v11283_v5 }
 0xe9a   : > { %9227 = vmatprep.subr.bf16.mxu1 %v10027_v0 }
 0xe9d   : > { %9229 = vmatpush3.bf16.msra.mxu1 %v11289_v23 }
 0xe9e   : > { %9230 = vmatprep.subr.bf16.mxu1 %v10027_v0 }
 0xea1   : > { %9232 = vmatpush3.bf16.msra.mxu1 %v11295_v16 }
 0xea2   : > { %9233 = vmatprep.subr.bf16.mxu1 %v10027_v0 }
 0xea5   : > { %9235 = vmatpush3.bf16.msra.mxu1 %v11301_v52 }
 0xea6   : > { %9236 = vmatprep.subr.bf16.mxu1 %v10027_v0 }
 0xea9   : > { %9238 = vmatpush3.bf16.msra.mxu1 %v11307_v36 }
 0xf3f   : > { %v8167_v58 = vpop.f32.mrb[36].mxu1 }
 0xf40   : > { %v3985_v40 = vadd.f32 %v11190_v29, %v8167_v58  ;;  %v3965_v4 = vpop.f32.mrb[37].mxu1 }
 0xf41   : > { %v3984_v14 = vadd.f32 %v11193_v55, %v3965_v4 }
 0xf42   : > { %v3992_v51 = vmul.f32 0.5, %v3985_v40 }
 0xf43   : > { %v3988_v21 = vmul.f32 0.5, %v3984_v14  ;;  %v8170_v60 = vpop.f32.mrb[38].mxu1 }
 0xf44   : > { %9699 = vtanh.f32 %v3992_v51  ;;  %v3975_v63 = vpop.f32.mrb[39].mxu1  ;;  %v3987_v54 = vadd.f32 %v11196_v42, %v8170_v60 }
 0xf45   : > { %9701 = vtanh.f32 %v3988_v21  ;;  %v3986_v33 = vadd.f32 %v11199_v48, %v3975_v63  ;;  %v6528_v63 = vld [vmem:[%s10250_s20 + $0x308] sm:$0xff] }
 0xf46   : > { %9703 = vtanh.f32 %v3987_v54 }
 0xf47   : > { %v3996_v53 = vmul.f32 0.5, %v3986_v33  ;;  %v6532_v33 = vld [vmem:[%s10250_s20 + $0x328] sm:$0xff] }
 0xf49   : > { %9705 = vtanh.f32 %v3996_v53  ;;  %v6533_v53 = vld [vmem:[%s10250_s20 + $0x330] sm:$0xff] }
 0xf4e   : > { %v9700_v25 = vpop.eup %9699 }
 0xf4f   : > { %v9702_v44 = vpop.eup %9701  ;;  %v3994_v7 = vadd.f32 1.0, %v9700_v25  ;;  %v6534_v25 = vld [vmem:[%s10250_s20 + $0x338] sm:$0xff] }
 0xf50   : > { %v3990_v17 = vadd.f32 1.0, %v9702_v44  ;;  %v9704_v46 = vpop.eup %9703  ;;  %v11441_v44 = vpack.c.bf16 %v6534_v25, %v6533_v53 }
 0xf51   : > { %v3995_v62 = vmul.f32 0.5, %v3994_v7  ;;  %v6535_v7 = vld [vmem:[%s10250_s20 + $0x340] sm:$0xff] }
 0xf52   : > { %v3991_v27 = vmul.f32 0.5, %v3990_v17  ;;  %v6536_v17 = vld [vmem:[%s10250_s20 + $0x348] sm:$0xff] }
 0xf53   : > { %v4002_v12 = vmul.f32 %v3995_v62, %v11203_v45  ;;  %v9706_v32 = vpop.eup %9705  ;;  %v11447_v62 = vpack.c.bf16 %v6536_v17, %v6535_v7 }
 0xf54   : > { %v4003_v47 = vmul.f32 %v9704_v46, %v3991_v27  ;;  %v3998_v34 = vadd.f32 1.0, %v9706_v32  ;;  %v6537_v27 = vld [vmem:[%s10250_s20 + $0x350] sm:$0xff]  ;;  %v6538_v46 = vld [vmem:[%s10250_s20 + $0x358] sm:$0xff]  ;;  %v6540_v32 = vld [vmem:[%s10250_s20 + $0x368] sm:$0xff] }
 0xf56   : > { %v11361_v6 = vadd.f32 %v4003_v47, %v4002_v12  ;;  %v3999_v38 = vmul.f32 0.5, %v3998_v34  ;;  %v11453_v12 = vpack.c.bf16 %v6538_v46, %v6537_v27  ;;  %v6539_v47 = vld [vmem:[%s10250_s20 + $0x360] sm:$0xff]  ;;  %v11619_v46 = vld [vmem:[%s11973_s4 + $0x10] sm:$0xff] }
 0xf57   : > { %v11459_v34 = vpack.c.bf16 %v6540_v32, %v6539_v47 }
 0xf58   : > { %9707 = vtanh.f32 %v11361_v6 }
 0xf5f   : > { %v4167_v35 = vpop.f32.mrb[40].mxu1 }
 0xf60   : > { %v8240_v37 = vpop.f32.mrb[41].mxu1  ;;  %8241 = vmatprep.subr.mxu0 %v4167_v35 }
 0xf61   : > { %8242 = vmatpush3.msra.mxu0 %v4167_v35  ;;  %v6541_v35 = vld [vmem:[%s10250_s20 + $0x370] sm:$0xff]  ;;  %v6542_v37 = vld [vmem:[%s10250_s20 + $0x378] sm:$0xff] }
 0xf62   : > { %v9708_v41 = vpop.eup %9707  ;;  %8244 = vmatmul.mubr.msk.f32.vlgmr.msra.gmra.mrb[42].mxu0 %vm658_vm1, %v10948_v24  ;;  %8249 = vmatprep.subr.mxu0 %v4096_v15 }
 0xf63   : > { %v4006_v39 = vmul.f32 %v9708_v41, %v3999_v38  ;;  %8246 = vmatprep.mubr.msk.f32.mxu0 %vm658_vm1, %v10955_v26  ;;  %8250 = vmatpush3.msra.mxu0 %v4096_v15  ;;  %v11465_v38 = vpack.c.bf16 %v6542_v37, %v6541_v35  ;;  %v6543_v41 = vld [vmem:[%s10331_s12 + $0x30] sm:$0xff] }
 0xf64   : > { %9239 = vmatprep.subr.bf16.mxu0 %v10027_v0 }
 0xf65   : > { %6492 = vst [vmem:[%s10627_s24 + $0x20] sm:$0xff] %v4006_v39 }
 0xf66   : > { %8247 = vmatmul.mubr.msk.f32.gmra.mrb[44].mxu0 %vm658_vm1, %v10964_v28 }
 0xf67   : > { %8251 = vmatprep.mubr.msk.f32.mxu0 %vm658_vm1, %v10971_v18 }
 0xf6a   : > { %8252 = vmatmul.mubr.msk.f32.vlgmr.msra.gmra.mrb[42].mxu0 %vm658_vm1, %v10978_v31 }
 0xf6b   : > { %9241 = vmatpush3.bf16.msra.mxu0 %v11265_v50  ;;  %8254 = vmatprep.mubr.msk.f32.mxu0 %vm658_vm1, %v10986_v9 }
 0xf6c   : > { %9242 = vmatprep.subr.bf16.mxu0 %v10027_v0 }
 0xf6e   : > { %8255 = vmatmul.mubr.msk.f32.gmra.mrb[44].mxu0 %vm658_vm1, %v10994_v10 }
 0xf6f   : > { %9244 = vmatpush3.bf16.msra.mxu0 %v11271_v56  ;;  %8324 = vmatprep.mubr.msk.f32.mxu0 %vm10028_vm0, %v10029_v1 }
 0xf70   : > { %9245 = vmatprep.subr.bf16.mxu0 %v10027_v0 }
 0xf73   : > { %9247 = vmatpush3.bf16.msra.mxu0 %v11277_v8 }
 0xf74   : > { %9248 = vmatprep.subr.bf16.mxu0 %v10027_v0 }
 0xf77   : > { %9250 = vmatpush3.bf16.msra.mxu0 %v11283_v5 }
 0xf78   : > { %9251 = vmatprep.subr.bf16.mxu0 %v10027_v0 }
 0xf7b   : > { %9253 = vmatpush3.bf16.msra.mxu0 %v11289_v23 }
 0xf7c   : > { %9254 = vmatprep.subr.bf16.mxu0 %v10027_v0 }
 0xf7f   : > { %9256 = vmatpush3.bf16.msra.mxu0 %v11295_v16 }
 0xf80   : > { %9257 = vmatprep.subr.bf16.mxu0 %v10027_v0 }
 0xf83   : > { %9259 = vmatpush3.bf16.msra.mxu0 %v11301_v52 }
 0xf84   : > { %9260 = vmatprep.subr.bf16.mxu0 %v10027_v0 }
 0xf87   : > { %9262 = vmatpush3.bf16.msra.mxu0 %v11307_v36 }
 0xf88   : > { %9263 = vmatprep.subr.bf16.mxu0 %v10027_v0 }
 0xf8a   : > { %8325 = vmatmul.mubr.f32.vlgmr.msra.gmra.mrb[46].mxu0 %v4006_v39  ;;  %v11472_v39 = vld [vmem:[%s12014_s3] sm:$0xff] }
 0xf8b   : > { %8375 = vmatprep.mubr.msk.f32.mxu0 %vm10028_vm0, %v10029_v1 }
0x103d   : > { %v8253_v24 = vpop.f32.mrb[42].mxu0 }
0x103e   : > { %v4342_v26 = vadd.f32 %v11019_v11, %v8253_v24  ;;  %v4322_v28 = vpop.f32.mrb[43].mxu0 }
0x103f   : > { %v4341_v18 = vadd.f32 %v11025_v13, %v4322_v28 }
0x1040   : > { %v4349_v31 = vmul.f32 0.5, %v4342_v26 }
0x1041   : > { %v4345_v9 = vmul.f32 0.5, %v4341_v18  ;;  %v8256_v10 = vpop.f32.mrb[44].mxu0 }
0x1042   : > { %9709 = vtanh.f32 %v4349_v31  ;;  %v4332_v45 = vpop.f32.mrb[45].mxu0  ;;  %v4344_v50 = vadd.f32 %v11031_v19, %v8256_v10 }
0x1043   : > { %9711 = vtanh.f32 %v4345_v9  ;;  %v4343_v56 = vadd.f32 %v11037_v30, %v4332_v45 }
0x1044   : > { %9713 = vtanh.f32 %v4344_v50 }
0x1045   : > { %v4353_v8 = vmul.f32 0.5, %v4343_v56 }
0x1047   : > { %9715 = vtanh.f32 %v4353_v8 }
0x104c   : > { %v9710_v5 = vpop.eup %9709 }
0x104d   : > { %v9712_v23 = vpop.eup %9711  ;;  %v4351_v16 = vadd.f32 1.0, %v9710_v5 }
0x104e   : > { %v4347_v52 = vadd.f32 1.0, %v9712_v23  ;;  %v9714_v13 = vpop.eup %9713 }
0x104f   : > { %v4352_v11 = vmul.f32 0.5, %v4351_v16 }
0x1050   : > { %v4348_v36 = vmul.f32 0.5, %v4347_v52 }
0x1051   : > { %v4359_v15 = vmul.f32 %v4352_v11, %v11247_v59  ;;  %v9716_v19 = vpop.eup %9715  ;;  %v6527_v59 = vld [vmem:[%s10250_s20 + $0x300] sm:$0xff] }
0x1052   : > { %v4360_v58 = vmul.f32 %v9714_v13, %v4348_v36  ;;  %v4355_v30 = vadd.f32 1.0, %v9716_v19  ;;  %v11423_v54 = vpack.c.bf16 %v6528_v63, %v6527_v59  ;;  %v11553_v59 = vld [vmem:[%s12015_s2] sm:$0xff]  ;;  %v11560_v63 = vld [vmem:[%s12015_s2 + $0x8] sm:$0xff] }
0x1054   : > { %v11405_v40 = vadd.f32 %v4360_v58, %v4359_v15  ;;  %v4356_v51 = vmul.f32 0.5, %v4355_v30  ;;  %9265 = vmatpush3.bf16.msra.mxu0 %v11423_v54 }
0x1055   : > { %9266 = vmatprep.subr.bf16.mxu0 %v10027_v0 }
0x1056   : > { %9717 = vtanh.f32 %v11405_v40 }
0x105d   : > { %v4503_v4 = vpop.f32.mrb[46].mxu0 }
0x105e   : > { %v8326_v14 = vpop.f32.mrb[47].mxu0  ;;  %8327 = vmatprep.subr.mxu1 %v4503_v4 }
0x1060   : > { %v9718_v21 = vpop.eup %9717 }
0x1061   : > { %v11408_v60 = vmul.f32 %v9718_v21, %v4356_v51  ;;  %v11530_v51 = vld [vmem:[%s12014_s3 + $0x8] sm:$0xff]  ;;  %v11537_v21 = vld [vmem:[%s12014_s3 + $0x10] sm:$0xff] }
0x1063   : > { %8290 = vmatmul.mubr.f32.vlgmr.msra.gmra.mrb[42].mxu1 %v11408_v60 }
0x1064   : > { %8328 = vmatpush3.msra.mxu1 %v4503_v4  ;;  %8329 = vmatprep.mubr.msk.f32.mxu1 %vm658_vm1, %v11050_v20  ;;  %v6529_v20 = vld [vmem:[%s10250_s20 + $0x310] sm:$0xff] }
0x1067   : > { %8330 = vmatmul.mubr.msk.f32.vlgmr.msra.gmra.mrb[44].mxu1 %vm658_vm1, %v11057_v43  ;;  %v6530_v43 = vld [vmem:[%s10250_s20 + $0x318] sm:$0xff] }
0x1068   : > { %8332 = vmatprep.mubr.msk.f32.mxu1 %vm658_vm1, %v11064_v49  ;;  %v11429_v49 = vpack.c.bf16 %v6530_v43, %v6529_v20  ;;  %v11568_v20 = vld [vmem:[%s12015_s2 + $0x10] sm:$0xff]  ;;  %v11576_v43 = vld [vmem:[%s12015_s2 + $0x18] sm:$0xff]  ;;  %s11870_s2 = scalar_lea.hbm %s12016_s7, %s6600_s28 }
0x106a   : > { %9268 = vmatpush3.bf16.msra.mxu0 %v11429_v49 }
0x106b   : > { %8333 = vmatmul.mubr.msk.f32.gmra.mrb[46].mxu1 %vm658_vm1, %v11071_v57  ;;  %v6531_v57 = vld [vmem:[%s10250_s20 + $0x320] sm:$0xff]  ;;  %9269 = vmatprep.subr.bf16.mxu0 %v10027_v0 }
0x106c   : > { %8337 = vmatprep.mubr.msk.f32.mxu1 %vm658_vm1, %v11078_v22  ;;  %v11435_v22 = vpack.c.bf16 %v6532_v33, %v6531_v57 }
0x106e   : > { %9271 = vmatpush3.bf16.msra.mxu0 %v11435_v22 }
0x106f   : > { %9272 = vmatprep.subr.bf16.mxu0 %v10027_v0 }
0x1072   : > { %9274 = vmatpush3.bf16.msra.mxu0 %v11441_v44 }
0x1073   : > { %9275 = vmatprep.subr.bf16.mxu0 %v10027_v0 }
0x1076   : > { %9277 = vmatpush3.bf16.msra.mxu0 %v11447_v62 }
0x1077   : > { %9278 = vmatprep.subr.bf16.mxu0 %v10027_v0 }
0x107a   : > { %9280 = vmatpush3.bf16.msra.mxu0 %v11453_v12 }
0x107b   : > { %9281 = vmatprep.subr.bf16.mxu0 %v10027_v0 }
0x107e   : > { %9283 = vmatpush3.bf16.msra.mxu0 %v11459_v34 }
0x107f   : > { %9284 = vmatprep.subr.bf16.mxu0 %v10027_v0 }
0x1082   : > { %9286 = vmatpush3.bf16.msra.mxu0 %v11465_v38 }
0x1085   : > { %8376 = vmatmul.mubr.f32.vlgmr.msra.gmra.mrb[48].mxu0 %v6543_v41 }
0x1086   : > { %8415 = vmatprep.mubr.msk.f32.mxu0 %vm658_vm1, %v11472_v39 }
0x1136   : > { %v4432_v24 = vpop.f32.mrb[42].mxu1 }
0x1137   : > { %v8291_v26 = vpop.f32.mrb[43].mxu1  ;;  %8335 = vmatprep.subr.mxu1 %v4432_v24 }
0x1138   : > { %8336 = vmatpush3.msra.mxu1 %v4432_v24 }
0x1139   : > { %8338 = vmatmul.mubr.msk.f32.vlgmr.msra.gmra.mrb[44].mxu1 %vm658_vm1, %v11135_v61  ;;  %9287 = vmatprep.subr.bf16.mxu1 %v10027_v0 }
0x113a   : > { %9289 = vmatpush3.bf16.msra.mxu1 %v11423_v54  ;;  %8340 = vmatprep.mubr.msk.f32.mxu1 %vm658_vm1, %v11144_v2 }
0x113b   : > { %9290 = vmatprep.subr.bf16.mxu1 %v10027_v0 }
0x113d   : > { %8341 = vmatmul.mubr.msk.f32.gmra.mrb[46].mxu1 %vm658_vm1, %v11152_v3 }
0x113e   : > { %9292 = vmatpush3.bf16.msra.mxu1 %v11429_v49  ;;  %8410 = vmatprep.mubr.msk.f32.mxu1 %vm10028_vm0, %v10029_v1 }
0x113f   : > { %9293 = vmatprep.subr.bf16.mxu1 %v10027_v0 }
0x1142   : > { %9295 = vmatpush3.bf16.msra.mxu1 %v11435_v22 }
0x1143   : > { %9296 = vmatprep.subr.bf16.mxu1 %v10027_v0 }
0x1146   : > { %9298 = vmatpush3.bf16.msra.mxu1 %v11441_v44 }
0x1147   : > { %9299 = vmatprep.subr.bf16.mxu1 %v10027_v0 }
0x114a   : > { %9301 = vmatpush3.bf16.msra.mxu1 %v11447_v62 }
0x114b   : > { %9302 = vmatprep.subr.bf16.mxu1 %v10027_v0 }
0x114e   : > { %9304 = vmatpush3.bf16.msra.mxu1 %v11453_v12 }
0x114f   : > { %9305 = vmatprep.subr.bf16.mxu1 %v10027_v0 }
0x1152   : > { %9307 = vmatpush3.bf16.msra.mxu1 %v11459_v34 }
0x1153   : > { %9308 = vmatprep.subr.bf16.mxu1 %v10027_v0 }
0x1156   : > { %9310 = vmatpush3.bf16.msra.mxu1 %v11465_v38 }
0x1157   : > { %9311 = vmatprep.subr.bf16.mxu1 %v10027_v0 }
0x1158   : > { %v4789_v61 = vpop.f32.mrb[48].mxu0 }
0x1159   : > { %8411 = vmatmul.mubr.f32.vlgmr.msra.gmra.mrb[48].mxu1 %v11408_v60  ;;  %v8377_v2 = vpop.f32.mrb[49].mxu0  ;;  %v11546_v60 = vld [vmem:[%s12014_s3 + $0x18] sm:$0xff]  ;;  %s11874_s3 = scalar_lea.sflag [#allocation13], %s6102_s30 }
0x115a   : > { %9313 = vmatpush3.bf16.msra.mxu1 %v11423_v54  ;;  %8461 = vmatprep.mubr.msk.f32.mxu1 %vm10028_vm0, %v10029_v1 }
0x115b   : > { %9314 = vmatprep.subr.bf16.mxu1 %v10027_v0 }
0x115e   : > { %9316 = vmatpush3.bf16.msra.mxu1 %v11429_v49 }
0x115f   : > { %9317 = vmatprep.subr.bf16.mxu1 %v10027_v0 }
0x1162   : > { %9319 = vmatpush3.bf16.msra.mxu1 %v11435_v22 }
0x1163   : > { %9320 = vmatprep.subr.bf16.mxu1 %v10027_v0 }
0x1166   : > { %9322 = vmatpush3.bf16.msra.mxu1 %v11441_v44 }
0x1167   : > { %9323 = vmatprep.subr.bf16.mxu1 %v10027_v0 }
0x116a   : > { %9325 = vmatpush3.bf16.msra.mxu1 %v11447_v62 }
0x116b   : > { %9326 = vmatprep.subr.bf16.mxu1 %v10027_v0 }
0x116e   : > { %9328 = vmatpush3.bf16.msra.mxu1 %v11453_v12 }
0x116f   : > { %9329 = vmatprep.subr.bf16.mxu1 %v10027_v0 }
0x1172   : > { %9331 = vmatpush3.bf16.msra.mxu1 %v11459_v34 }
0x1173   : > { %9332 = vmatprep.subr.bf16.mxu1 %v10027_v0 }
0x1176   : > { %9334 = vmatpush3.bf16.msra.mxu1 %v11465_v38 }
0x120c   : > { %v8339_v3 = vpop.f32.mrb[44].mxu1 }
0x120d   : > { %v4678_v28 = vadd.f32 %v11190_v29, %v8339_v3  ;;  %v4658_v18 = vpop.f32.mrb[45].mxu1 }
0x120e   : > { %v4677_v31 = vadd.f32 %v11193_v55, %v4658_v18 }
0x120f   : > { %v4685_v9 = vmul.f32 0.5, %v4678_v28 }
0x1210   : > { %v4681_v10 = vmul.f32 0.5, %v4677_v31  ;;  %v8342_v45 = vpop.f32.mrb[46].mxu1 }
0x1211   : > { %9719 = vtanh.f32 %v4685_v9  ;;  %v4668_v50 = vpop.f32.mrb[47].mxu1  ;;  %v4680_v56 = vadd.f32 %v11196_v42, %v8342_v45 }
0x1212   : > { %9721 = vtanh.f32 %v4681_v10  ;;  %v4679_v8 = vadd.f32 %v11199_v48, %v4668_v50  ;;  %v11639_v50 = vld [vmem:[%s11975_s6 + $0x8] sm:$0xff] }
0x1213   : > { %9723 = vtanh.f32 %v4680_v56  ;;  %v11646_v56 = vld [vmem:[%s11975_s6 + $0x10] sm:$0xff] }
0x1214   : > { %v4689_v5 = vmul.f32 0.5, %v4679_v8  ;;  %v11653_v8 = vld [vmem:[%s11975_s6 + $0x18] sm:$0xff] }
0x1216   : > { %9725 = vtanh.f32 %v4689_v5  ;;  %v11660_v5 = vld [vmem:[%s11974_s5] sm:$0xff] }
0x121b   : > { %v9720_v23 = vpop.eup %9719 }
0x121c   : > { %v9722_v16 = vpop.eup %9721  ;;  %v4687_v52 = vadd.f32 1.0, %v9720_v23  ;;  %v6561_v23 = vld [vmem:[%s10250_s20 + $0x380] sm:$0xff] }
0x121d   : > { %v4683_v11 = vadd.f32 1.0, %v9722_v16  ;;  %v9724_v55 = vpop.eup %9723  ;;  %v6562_v16 = vld [vmem:[%s10250_s20 + $0x388] sm:$0xff] }
0x121e   : > { %v4688_v29 = vmul.f32 0.5, %v4687_v52  ;;  %v11666_v52 = vpack.c.bf16 %v6562_v16, %v6561_v23  ;;  %v11781_v23 = vld [vmem:[#allocation9 + $0x10] sm:$0xff] }
0x121f   : > { %v4684_v36 = vmul.f32 0.5, %v4683_v11  ;;  %v6563_v11 = vld [vmem:[%s10250_s20 + $0x390] sm:$0xff] }
0x1220   : > { %v4695_v13 = vmul.f32 %v4688_v29, %v11361_v6  ;;  %v9726_v42 = vpop.eup %9725  ;;  %v6564_v29 = vld [vmem:[%s10250_s20 + $0x398] sm:$0xff] }
0x1221   : > { %v4696_v15 = vmul.f32 %v9724_v55, %v4684_v36  ;;  %v4691_v48 = vadd.f32 1.0, %v9726_v42  ;;  %v11672_v36 = vpack.c.bf16 %v6564_v29, %v6563_v11  ;;  %v6565_v55 = vld [vmem:[%s10250_s20 + $0x3a0] sm:$0xff]  ;;  %v6567_v42 = vld [vmem:[%s10250_s20 + $0x3b0] sm:$0xff] }
0x1223   : > { %v11524_v58 = vadd.f32 %v4696_v15, %v4695_v13  ;;  %v4692_v4 = vmul.f32 0.5, %v4691_v48  ;;  %v6566_v13 = vld [vmem:[%s10250_s20 + $0x3a8] sm:$0xff]  ;;  %v6568_v48 = vld [vmem:[%s10250_s20 + $0x3b8] sm:$0xff] }
0x1224   : > { %v11678_v15 = vpack.c.bf16 %v6566_v13, %v6565_v55 }
0x1225   : > { %9727 = vtanh.f32 %v11524_v58 }
0x122c   : > { %v4860_v19 = vpop.f32.mrb[48].mxu1 }
0x122d   : > { %v8412_v30 = vpop.f32.mrb[49].mxu1  ;;  %8413 = vmatprep.subr.mxu0 %v4860_v19 }
0x122e   : > { %8414 = vmatpush3.msra.mxu0 %v4860_v19  ;;  %v11684_v19 = vpack.c.bf16 %v6568_v48, %v6567_v42  ;;  %v6569_v30 = vld [vmem:[%s10250_s20 + $0x3c0] sm:$0xff] }
0x122f   : > { %v9728_v14 = vpop.eup %9727  ;;  %8416 = vmatmul.mubr.msk.f32.vlgmr.msra.gmra.mrb[50].mxu0 %vm658_vm1, %v11530_v51  ;;  %8421 = vmatprep.subr.mxu0 %v4789_v61 }
0x1230   : > { %v4699_v6 = vmul.f32 %v9728_v14, %v4692_v4  ;;  %8418 = vmatprep.mubr.msk.f32.mxu0 %vm658_vm1, %v11537_v21  ;;  %8422 = vmatpush3.msra.mxu0 %v4789_v61  ;;  %v6570_v4 = vld [vmem:[%s10250_s20 + $0x3c8] sm:$0xff] }
0x1231   : > { %9335 = vmatprep.subr.bf16.mxu0 %v10027_v0  ;;  %v11690_v14 = vpack.c.bf16 %v6570_v4, %v6569_v30 }
0x1232   : > { %6526 = vst [vmem:[%s10627_s24 + $0x28] sm:$0xff] %v4699_v6 }
0x1233   : > { %8419 = vmatmul.mubr.msk.f32.gmra.mrb[52].mxu0 %vm658_vm1, %v11546_v60 }
0x1234   : > { %8423 = vmatprep.mubr.msk.f32.mxu0 %vm658_vm1, %v11553_v59 }
0x1237   : > { %8424 = vmatmul.mubr.msk.f32.vlgmr.msra.gmra.mrb[50].mxu0 %vm658_vm1, %v11560_v63 }
0x1238   : > { %9337 = vmatpush3.bf16.msra.mxu0 %v11423_v54  ;;  %8426 = vmatprep.mubr.msk.f32.mxu0 %vm658_vm1, %v11568_v20 }
0x1239   : > { %9338 = vmatprep.subr.bf16.mxu0 %v10027_v0 }
0x123b   : > { %8427 = vmatmul.mubr.msk.f32.gmra.mrb[52].mxu0 %vm658_vm1, %v11576_v43 }
0x123c   : > { %9340 = vmatpush3.bf16.msra.mxu0 %v11429_v49  ;;  %8496 = vmatprep.mubr.msk.f32.mxu0 %vm10028_vm0, %v10029_v1  ;;  %v11601_v49 = vld [vmem:[%s11973_s4 + $0x8] sm:$0xff] }
0x123d   : > { %9341 = vmatprep.subr.bf16.mxu0 %v10027_v0 }
0x1240   : > { %9343 = vmatpush3.bf16.msra.mxu0 %v11435_v22  ;;  %v11607_v22 = vld [vmem:[%s11973_s4] sm:$0xff] }
0x1241   : > { %9344 = vmatprep.subr.bf16.mxu0 %v10027_v0 }
0x1244   : > { %9346 = vmatpush3.bf16.msra.mxu0 %v11441_v44 }
0x1245   : > { %9347 = vmatprep.subr.bf16.mxu0 %v10027_v0 }
0x1248   : > { %9349 = vmatpush3.bf16.msra.mxu0 %v11447_v62  ;;  %v11613_v62 = vld [vmem:[%s11973_s4 + $0x18] sm:$0xff] }
0x1249   : > { %9350 = vmatprep.subr.bf16.mxu0 %v10027_v0 }
0x124c   : > { %9352 = vmatpush3.bf16.msra.mxu0 %v11453_v12 }
0x124d   : > { %9353 = vmatprep.subr.bf16.mxu0 %v10027_v0 }
0x1250   : > { %9355 = vmatpush3.bf16.msra.mxu0 %v11459_v34 }
0x1251   : > { %9356 = vmatprep.subr.bf16.mxu0 %v10027_v0 }
0x1254   : > { %9358 = vmatpush3.bf16.msra.mxu0 %v11465_v38 }
0x1255   : > { %9359 = vmatprep.subr.bf16.mxu0 %v10027_v0 }
0x1257   : > { %8497 = vmatmul.mubr.f32.vlgmr.msra.gmra.mrb[54].mxu0 %v4699_v6  ;;  %v6571_v6 = vld [vmem:[%s10250_s20 + $0x3d0] sm:$0xff] }
0x1258   : > { %8547 = vmatprep.mubr.msk.f32.mxu0 %vm10028_vm0, %v10029_v1  ;;  %9361 = vmatpush3.bf16.msra.mxu0 %v11666_v52 }
0x1259   : > { %9362 = vmatprep.subr.bf16.mxu0 %v10027_v0 }
0x125c   : > { %9364 = vmatpush3.bf16.msra.mxu0 %v11672_v36 }
0x125d   : > { %9365 = vmatprep.subr.bf16.mxu0 %v10027_v0 }
0x1260   : > { %9367 = vmatpush3.bf16.msra.mxu0 %v11678_v15 }
0x1261   : > { %9368 = vmatprep.subr.bf16.mxu0 %v10027_v0 }
0x1264   : > { %9370 = vmatpush3.bf16.msra.mxu0 %v11684_v19 }
0x1265   : > { %9371 = vmatprep.subr.bf16.mxu0 %v10027_v0 }
0x1268   : > { %9373 = vmatpush3.bf16.msra.mxu0 %v11690_v14 }
0x1269   : > { %9374 = vmatprep.subr.bf16.mxu0 %v10027_v0 }
0x130a   : > { %v8425_v54 = vpop.f32.mrb[50].mxu0 }
0x130b   : > { %v5035_v57 = vadd.f32 %v11601_v49, %v8425_v54  ;;  %v5015_v33 = vpop.f32.mrb[51].mxu0  ;;  %v6572_v54 = vld [vmem:[%s10250_s20 + $0x3d8] sm:$0xff] }
0x130c   : > { %v5034_v53 = vadd.f32 %v11607_v22, %v5015_v33  ;;  %v6573_v33 = vld [vmem:[%s10250_s20 + $0x3e0] sm:$0xff] }
0x130d   : > { %v5042_v25 = vmul.f32 0.5, %v5035_v57  ;;  %v11696_v57 = vpack.c.bf16 %v6572_v54, %v6571_v6 }
0x130e   : > { %v5038_v44 = vmul.f32 0.5, %v5034_v53  ;;  %v8428_v7 = vpop.f32.mrb[52].mxu0  ;;  %v6574_v53 = vld [vmem:[%s10250_s20 + $0x3e8] sm:$0xff] }
0x130f   : > { %9729 = vtanh.f32 %v5042_v25  ;;  %v5025_v17 = vpop.f32.mrb[53].mxu0  ;;  %v5037_v27 = vadd.f32 %v11613_v62, %v8428_v7  ;;  %9376 = vmatpush3.bf16.msra.mxu0 %v11696_v57  ;;  %v11702_v25 = vpack.c.bf16 %v6574_v53, %v6573_v33  ;;  %v6576_v7 = vld [vmem:[%s10250_s20 + $0x3f8] sm:$0xff] }
0x1310   : > { %9731 = vtanh.f32 %v5038_v44  ;;  %v5036_v12 = vadd.f32 %v11619_v46, %v5025_v17  ;;  %9377 = vmatprep.subr.bf16.mxu0 %v10027_v0  ;;  %v6575_v44 = vld [vmem:[%s10250_s20 + $0x3f0] sm:$0xff]  ;;  %s6123_s20 = sshll.u32 %s10627_s24, 4  ;;  %s11864_s20 = int_to_ptr.vmem [resolvable:$true] %s6123_s20 }
0x1311   : > { %9733 = vtanh.f32 %v5037_v27  ;;  %v11708_v17 = vpack.c.bf16 %v6576_v7, %v6575_v44  ;;  %v6577_v27 = vld [vmem:[%s10331_s12 + $0x38] sm:$0xff] }
0x1312   : > { %v5046_v47 = vmul.f32 0.5, %v5036_v12 }
0x1313   : > { %9379 = vmatpush3.bf16.msra.mxu0 %v11702_v25 }
0x1314   : > { %9735 = vtanh.f32 %v5046_v47  ;;  %9380 = vmatprep.subr.bf16.mxu0 %v10027_v0 }
0x1317   : > { %9382 = vmatpush3.bf16.msra.mxu0 %v11708_v17 }
0x1319   : > { %v9730_v32 = vpop.eup %9729 }
0x131a   : > { %v9732_v34 = vpop.eup %9731  ;;  %v5044_v35 = vadd.f32 1.0, %v9730_v32  ;;  %8548 = vmatmul.mubr.f32.vlgmr.msra.gmra.mrb[56].mxu0 %v6577_v27  ;;  %v11717_v32 = vld [vmem:[%s11974_s5 + $0x8] sm:$0xff] }
0x131b   : > { %v5040_v37 = vadd.f32 1.0, %v9732_v34  ;;  %v9734_v24 = vpop.eup %9733  ;;  %8587 = vmatprep.mubr.msk.f32.mxu0 %vm658_vm1, %v11472_v39  ;;  %v11726_v39 = vld [vmem:[%s11974_s5 + $0x10] sm:$0xff]  ;;  %v11734_v34 = vld [vmem:[%s11974_s5 + $0x18] sm:$0xff] }
0x131c   : > { %v5045_v38 = vmul.f32 0.5, %v5044_v35 }
0x131d   : > { %v5041_v41 = vmul.f32 0.5, %v5040_v37 }
0x131e   : > { %v5052_v26 = vmul.f32 %v5045_v38, %v11405_v40  ;;  %v9736_v3 = vpop.eup %9735  ;;  %v11632_v40 = vld [vmem:[%s11975_s6] sm:$0xff] }
0x131f   : > { %v5053_v61 = vmul.f32 %v9734_v24, %v5041_v41  ;;  %v5048_v28 = vadd.f32 1.0, %v9736_v3  ;;  %v11772_v41 = vld [vmem:[#allocation9 + $0x8] sm:$0xff] }
0x1321   : > { %v11623_v2 = vadd.f32 %v5053_v61, %v5052_v26  ;;  %v5049_v9 = vmul.f32 0.5, %v5048_v28  ;;  %v11775_v61 = vld [vmem:[#allocation9] sm:$0xff] }
0x1323   : > { %9737 = vtanh.f32 %v11623_v2 }
0x132a   : > { %v5196_v18 = vpop.f32.mrb[54].mxu0 }
0x132b   : > { %v8498_v31 = vpop.f32.mrb[55].mxu0  ;;  %8499 = vmatprep.subr.mxu1 %v5196_v18 }
0x132d   : > { %v9738_v10 = vpop.eup %9737 }
0x132e   : > { %v11626_v45 = vmul.f32 %v9738_v10, %v5049_v9  ;;  %v11778_v10 = vld [vmem:[#allocation9 + $0x18] sm:$0xff] }
0x1330   : > { %8462 = vmatmul.mubr.f32.vlgmr.msra.gmra.mrb[50].mxu1 %v11626_v45 }
0x1331   : > { %8500 = vmatpush3.msra.mxu1 %v5196_v18  ;;  %8501 = vmatprep.mubr.msk.f32.mxu1 %vm658_vm1, %v11632_v40 }
0x1334   : > { %8502 = vmatmul.mubr.msk.f32.vlgmr.msra.gmra.mrb[52].mxu1 %vm658_vm1, %v11639_v50 }
0x1335   : > { %8504 = vmatprep.mubr.msk.f32.mxu1 %vm658_vm1, %v11646_v56 }
0x1338   : > { %8505 = vmatmul.mubr.msk.f32.gmra.mrb[54].mxu1 %vm658_vm1, %v11653_v8 }
0x1339   : > { %8509 = vmatprep.mubr.msk.f32.mxu1 %vm658_vm1, %v11660_v5 }
0x13ed   : > { %v5482_v35 = vpop.f32.mrb[56].mxu0 }
0x13ee   : > { %v8549_v37 = vpop.f32.mrb[57].mxu0 }
0x1403   : > { %v5125_v12 = vpop.f32.mrb[50].mxu1 }
0x1404   : > { %v8463_v47 = vpop.f32.mrb[51].mxu1  ;;  %8507 = vmatprep.subr.mxu1 %v5125_v12 }
0x1405   : > { %8508 = vmatpush3.msra.mxu1 %v5125_v12 }
0x1406   : > { %8510 = vmatmul.mubr.msk.f32.vlgmr.msra.gmra.mrb[52].mxu1 %vm658_vm1, %v11717_v32  ;;  %9383 = vmatprep.subr.bf16.mxu1 %v10027_v0 }
0x1407   : > { %9385 = vmatpush3.bf16.msra.mxu1 %v11666_v52  ;;  %8512 = vmatprep.mubr.msk.f32.mxu1 %vm658_vm1, %v11726_v39 }
0x1408   : > { %9386 = vmatprep.subr.bf16.mxu1 %v10027_v0 }
0x140a   : > { %8513 = vmatmul.mubr.msk.f32.gmra.mrb[54].mxu1 %vm658_vm1, %v11734_v34 }
0x140b   : > { %9388 = vmatpush3.bf16.msra.mxu1 %v11672_v36  ;;  %8582 = vmatprep.mubr.msk.f32.mxu1 %vm10028_vm0, %v10029_v1 }
0x140c   : > { %9389 = vmatprep.subr.bf16.mxu1 %v10027_v0 }
0x140f   : > { %9391 = vmatpush3.bf16.msra.mxu1 %v11678_v15 }
0x1410   : > { %9392 = vmatprep.subr.bf16.mxu1 %v10027_v0 }
0x1413   : > { %9394 = vmatpush3.bf16.msra.mxu1 %v11684_v19 }
0x1414   : > { %9395 = vmatprep.subr.bf16.mxu1 %v10027_v0 }
0x1417   : > { %9397 = vmatpush3.bf16.msra.mxu1 %v11690_v14 }
0x1418   : > { %9398 = vmatprep.subr.bf16.mxu1 %v10027_v0 }
0x141b   : > { %9400 = vmatpush3.bf16.msra.mxu1 %v11696_v57 }
0x141c   : > { %9401 = vmatprep.subr.bf16.mxu1 %v10027_v0 }
0x141f   : > { %9403 = vmatpush3.bf16.msra.mxu1 %v11702_v25 }
0x1420   : > { %9404 = vmatprep.subr.bf16.mxu1 %v10027_v0 }
0x1423   : > { %9406 = vmatpush3.bf16.msra.mxu1 %v11708_v17 }
0x1424   : > { %9407 = vmatprep.subr.bf16.mxu1 %v10027_v0 }
0x1426   : > { %8583 = vmatmul.mubr.f32.vlgmr.msra.gmra.mrb[56].mxu1 %v11626_v45 }
0x1427   : > { %9409 = vmatpush3.bf16.msra.mxu1 %v11666_v52  ;;  %8633 = vmatprep.mubr.msk.f32.mxu1 %vm10028_vm0, %v10029_v1 }
0x1428   : > { %9410 = vmatprep.subr.bf16.mxu1 %v10027_v0 }
0x142b   : > { %9412 = vmatpush3.bf16.msra.mxu1 %v11672_v36 }
0x142c   : > { %9413 = vmatprep.subr.bf16.mxu1 %v10027_v0 }
0x142f   : > { %9415 = vmatpush3.bf16.msra.mxu1 %v11678_v15 }
0x1430   : > { %9416 = vmatprep.subr.bf16.mxu1 %v10027_v0 }
0x1433   : > { %9418 = vmatpush3.bf16.msra.mxu1 %v11684_v19 }
0x1434   : > { %9419 = vmatprep.subr.bf16.mxu1 %v10027_v0 }
0x1437   : > { %9421 = vmatpush3.bf16.msra.mxu1 %v11690_v14 }
0x1438   : > { %9422 = vmatprep.subr.bf16.mxu1 %v10027_v0 }
0x143b   : > { %9424 = vmatpush3.bf16.msra.mxu1 %v11696_v57 }
0x143c   : > { %9425 = vmatprep.subr.bf16.mxu1 %v10027_v0 }
0x143f   : > { %9427 = vmatpush3.bf16.msra.mxu1 %v11702_v25 }
0x1440   : > { %9428 = vmatprep.subr.bf16.mxu1 %v10027_v0 }
0x1443   : > { %9430 = vmatpush3.bf16.msra.mxu1 %v11708_v17 }
0x14d9   : > { %v8511_v38 = vpop.f32.mrb[52].mxu1 }
0x14da   : > { %v5371_v24 = vadd.f32 %v11772_v41, %v8511_v38  ;;  %v5351_v26 = vpop.f32.mrb[53].mxu1 }
0x14db   : > { %v5370_v3 = vadd.f32 %v11775_v61, %v5351_v26 }
0x14dc   : > { %v5378_v28 = vmul.f32 0.5, %v5371_v24 }
0x14dd   : > { %v5374_v18 = vmul.f32 0.5, %v5370_v3  ;;  %v8514_v31 = vpop.f32.mrb[54].mxu1 }
0x14de   : > { %9739 = vtanh.f32 %v5378_v28  ;;  %v5361_v9 = vpop.f32.mrb[55].mxu1  ;;  %v5373_v45 = vadd.f32 %v11778_v10, %v8514_v31 }
0x14df   : > { %9741 = vtanh.f32 %v5374_v18  ;;  %v5372_v16 = vadd.f32 %v11781_v23, %v5361_v9 }
0x14e0   : > { %9743 = vtanh.f32 %v5373_v45 }
0x14e1   : > { %v5382_v11 = vmul.f32 0.5, %v5372_v16 }
0x14e3   : > { %9745 = vtanh.f32 %v5382_v11 }
0x14e8   : > { %v9740_v29 = vpop.eup %9739 }
0x14e9   : > { %v9742_v55 = vpop.eup %9741  ;;  %v5380_v13 = vadd.f32 1.0, %v9740_v29 }
0x14ea   : > { %v5376_v42 = vadd.f32 1.0, %v9742_v55  ;;  %v9744_v4 = vpop.eup %9743 }
0x14eb   : > { %v5381_v48 = vmul.f32 0.5, %v5380_v13 }
0x14ec   : > { %v5377_v30 = vmul.f32 0.5, %v5376_v42 }
0x14ed   : > { %v5388_v6 = vmul.f32 %v5381_v48, %v11524_v58  ;;  %v9746_v53 = vpop.eup %9745 }
0x14ee   : > { %v5389_v54 = vmul.f32 %v9744_v4, %v5377_v30  ;;  %v5384_v44 = vadd.f32 1.0, %v9746_v53 }
0x14f0   : > { %v11785_v33 = vadd.f32 %v5389_v54, %v5388_v6  ;;  %v5385_v12 = vmul.f32 0.5, %v5384_v44 }
0x14f2   : > { %9747 = vtanh.f32 %v11785_v33 }
0x14f9   : > { %v5553_v7 = vpop.f32.mrb[56].mxu1 }
0x14fa   : > { %v8584_v27 = vpop.f32.mrb[57].mxu1  ;;  %8585 = vmatprep.subr.mxu0 %v5553_v7 }
0x14fb   : > { %8586 = vmatpush3.msra.mxu0 %v5553_v7 }
0x14fc   : > { %v9748_v47 = vpop.eup %9747  ;;  %8588 = vmatmul.mubr.msk.f32.vlgmr.msra.gmra.mrb[58].mxu0 %vm658_vm1, %v11530_v51  ;;  %8593 = vmatprep.subr.mxu0 %v5482_v35 }
0x14fd   : > { %v5392_v37 = vmul.f32 %v9748_v47, %v5385_v12  ;;  %8590 = vmatprep.mubr.msk.f32.mxu0 %vm658_vm1, %v11537_v21  ;;  %8594 = vmatpush3.msra.mxu0 %v5482_v35 }
0x14fe   : > { %9431 = vmatprep.subr.bf16.mxu0 %v10027_v0 }
0x14ff   : > { %6560 = vst [vmem:[%s10627_s24 + $0x30] sm:$0xff] %v5392_v37 }
0x1500   : > { %8591 = vmatmul.mubr.msk.f32.gmra.mrb[60].mxu0 %vm658_vm1, %v11546_v60 }
0x1501   : > { %8595 = vmatprep.mubr.msk.f32.mxu0 %vm658_vm1, %v11553_v59 }
0x1504   : > { %8596 = vmatmul.mubr.msk.f32.vlgmr.msra.gmra.mrb[58].mxu0 %vm658_vm1, %v11560_v63 }
0x1505   : > { %9433 = vmatpush3.bf16.msra.mxu0 %v11666_v52  ;;  %8598 = vmatprep.mubr.msk.f32.mxu0 %vm658_vm1, %v11568_v20 }
0x1506   : > { %9434 = vmatprep.subr.bf16.mxu0 %v10027_v0 }
0x1508   : > { %8599 = vmatmul.mubr.msk.f32.gmra.mrb[60].mxu0 %vm658_vm1, %v11576_v43 }
0x1509   : > { %9436 = vmatpush3.bf16.msra.mxu0 %v11672_v36  ;;  %8668 = vmatprep.mubr.msk.f32.mxu0 %vm10028_vm0, %v10029_v1 }
0x150a   : > { %9437 = vmatprep.subr.bf16.mxu0 %v10027_v0 }
0x150d   : > { %9439 = vmatpush3.bf16.msra.mxu0 %v11678_v15 }
0x150e   : > { %9440 = vmatprep.subr.bf16.mxu0 %v10027_v0 }
0x1511   : > { %9442 = vmatpush3.bf16.msra.mxu0 %v11684_v19 }
0x1512   : > { %9443 = vmatprep.subr.bf16.mxu0 %v10027_v0 }
0x1515   : > { %9445 = vmatpush3.bf16.msra.mxu0 %v11690_v14 }
0x1516   : > { %9446 = vmatprep.subr.bf16.mxu0 %v10027_v0 }
0x1519   : > { %9448 = vmatpush3.bf16.msra.mxu0 %v11696_v57 }
0x151a   : > { %9449 = vmatprep.subr.bf16.mxu0 %v10027_v0 }
0x151d   : > { %9451 = vmatpush3.bf16.msra.mxu0 %v11702_v25 }
0x151e   : > { %9452 = vmatprep.subr.bf16.mxu0 %v10027_v0 }
0x1521   : > { %9454 = vmatpush3.bf16.msra.mxu0 %v11708_v17 }
0x1524   : > { %8669 = vmatmul.mubr.f32.vlgmr.msra.gmra.mrb[62].mxu0 %v5392_v37 }
0x15d7   : > { %v8597_v1 = vpop.f32.mrb[58].mxu0 }
0x15d8   : > { %v5728_v58 = vadd.f32 %v11601_v49, %v8597_v1  ;;  %v5708_v51 = vpop.f32.mrb[59].mxu0 }
0x15d9   : > { %v5727_v21 = vadd.f32 %v11607_v22, %v5708_v51 }
0x15da   : > { %v5735_v60 = vmul.f32 0.5, %v5728_v58 }
0x15db   : > { %v5731_v59 = vmul.f32 0.5, %v5727_v21  ;;  %v8600_v63 = vpop.f32.mrb[60].mxu0 }
0x15dc   : > { %9749 = vtanh.f32 %v5735_v60  ;;  %v5718_v20 = vpop.f32.mrb[61].mxu0  ;;  %v5730_v43 = vadd.f32 %v11613_v62, %v8600_v63 }
0x15dd   : > { %9751 = vtanh.f32 %v5731_v59  ;;  %v5729_v52 = vadd.f32 %v11619_v46, %v5718_v20 }
0x15de   : > { %9753 = vtanh.f32 %v5730_v43 }
0x15df   : > { %v5739_v0 = vmul.f32 0.5, %v5729_v52 }
0x15e1   : > { %9755 = vtanh.f32 %v5739_v0 }
0x15e6   : > { %v9750_v36 = vpop.eup %9749 }
0x15e7   : > { %v9752_v15 = vpop.eup %9751  ;;  %v5737_v19 = vadd.f32 1.0, %v9750_v36 }
0x15e8   : > { %v5733_v14 = vadd.f32 1.0, %v9752_v15  ;;  %v9754_v22 = vpop.eup %9753 }
0x15e9   : > { %v5738_v49 = vmul.f32 0.5, %v5737_v19 }
0x15ea   : > { %v5734_v57 = vmul.f32 0.5, %v5733_v14 }
0x15eb   : > { %v5745_v25 = vmul.f32 %v5738_v49, %v11623_v2  ;;  %v9756_v38 = vpop.eup %9755 }
0x15ec   : > { %v5746_v17 = vmul.f32 %v9754_v22, %v5734_v57  ;;  %v5741_v24 = vadd.f32 1.0, %v9756_v38 }
0x15ee   : > { %v5747_v35 = vadd.f32 %v5746_v17, %v5745_v25  ;;  %v5742_v46 = vmul.f32 0.5, %v5741_v24 }
0x15f0   : > { %9757 = vtanh.f32 %v5747_v35 }
0x15f7   : > { %v5889_v62 = vpop.f32.mrb[62].mxu0 }
0x15f8   : > { %v8670_v26 = vpop.f32.mrb[63].mxu0  ;;  %8671 = vmatprep.subr.mxu1 %v5889_v62 }
0x15fa   : > { %v9758_v3 = vpop.eup %9757 }
0x15fb   : > { %v5749_v28 = vmul.f32 %v9758_v3, %v5742_v46 }
0x15fd   : > { %8634 = vmatmul.mubr.f32.vlgmr.msra.gmra.mrb[58].mxu1 %v5749_v28 }
0x15fe   : > { %8672 = vmatpush3.msra.mxu1 %v5889_v62  ;;  %8673 = vmatprep.mubr.msk.f32.mxu1 %vm658_vm1, %v11632_v40 }
0x1601   : > { %8674 = vmatmul.mubr.msk.f32.vlgmr.msra.gmra.mrb[60].mxu1 %vm658_vm1, %v11639_v50 }
0x1602   : > { %8676 = vmatprep.mubr.msk.f32.mxu1 %vm658_vm1, %v11646_v56 }
0x1605   : > { %8677 = vmatmul.mubr.msk.f32.gmra.mrb[62].mxu1 %vm658_vm1, %v11653_v8 }
0x1606   : > { %8681 = vmatprep.mubr.msk.f32.mxu1 %vm658_vm1, %v11660_v5 }
0x16d0   : > { %v5818_v2 = vpop.f32.mrb[58].mxu1 }
0x16d1   : > { %v8635_v18 = vpop.f32.mrb[59].mxu1  ;;  %8679 = vmatprep.subr.mxu1 %v5818_v2 }
0x16d2   : > { %8680 = vmatpush3.msra.mxu1 %v5818_v2 }
0x16d3   : > { %8682 = vmatmul.mubr.msk.f32.vlgmr.msra.gmra.mrb[60].mxu1 %vm658_vm1, %v11717_v32 }
0x16d4   : > { %8684 = vmatprep.mubr.msk.f32.mxu1 %vm658_vm1, %v11726_v39 }
0x16d7   : > { %8685 = vmatmul.mubr.msk.f32.gmra.mrb[62].mxu1 %vm658_vm1, %v11734_v34 }
0x17a6   : > { %v8683_v40 = vpop.f32.mrb[60].mxu1 }
0x17a7   : > { %v6064_v50 = vadd.f32 %v11772_v41, %v8683_v40  ;;  %v6044_v56 = vpop.f32.mrb[61].mxu1 }
0x17a8   : > { %v6063_v8 = vadd.f32 %v11775_v61, %v6044_v56 }
0x17a9   : > { %v6071_v5 = vmul.f32 0.5, %v6064_v50 }
0x17aa   : > { %v6067_v31 = vmul.f32 0.5, %v6063_v8  ;;  %v8686_v9 = vpop.f32.mrb[62].mxu1 }
0x17ab   : > { %9759 = vtanh.f32 %v6071_v5  ;;  %v6054_v45 = vpop.f32.mrb[63].mxu1  ;;  %v6066_v32 = vadd.f32 %v11778_v10, %v8686_v9 }
0x17ac   : > { %9761 = vtanh.f32 %v6067_v31  ;;  %v6065_v39 = vadd.f32 %v11781_v23, %v6054_v45 }
0x17ad   : > { %9763 = vtanh.f32 %v6066_v32 }
0x17ae   : > { %v6075_v16 = vmul.f32 0.5, %v6065_v39 }
0x17b0   : > { %9765 = vtanh.f32 %v6075_v16 }
0x17b5   : > { %v9760_v34 = vpop.eup %9759 }
0x17b6   : > { %v9762_v11 = vpop.eup %9761  ;;  %v6073_v41 = vadd.f32 1.0, %v9760_v34 }
0x17b7   : > { %v6069_v29 = vadd.f32 1.0, %v9762_v11  ;;  %v9764_v13 = vpop.eup %9763 }
0x17b8   : > { %v6074_v61 = vmul.f32 0.5, %v6073_v41 }
0x17b9   : > { %v6070_v55 = vmul.f32 0.5, %v6069_v29 }
0x17ba   : > { %v6081_v42 = vmul.f32 %v6074_v61, %v11785_v33  ;;  %v9766_v23 = vpop.eup %9765 }
0x17bb   : > { %v6082_v10 = vmul.f32 %v9764_v13, %v6070_v55  ;;  %v6077_v30 = vadd.f32 1.0, %v9766_v23 }
0x17bd   : > { %v6083_v48 = vadd.f32 %v6082_v10, %v6081_v42  ;;  %v6078_v4 = vmul.f32 0.5, %v6077_v30 }
0x17bf   : > { %9767 = vtanh.f32 %v6083_v48  ;;  %6096 = vst [vmem:[%s455_s23] sm:$0xff] %v6083_v48  ;;  %s9875_s23 = scalar_lea.vmem %s11857_s25, 128 }
0x17c0   : > { %p9876_p8 = scmp.ne.s32.totalorder %s11857_s25, %s9875_s23  ;;  %p9883_p5 = scmp.lt.s32.totalorder %s9881_s19, %s9875_s23 }
0x17c2   : > { %p9877_p12 = pnand %p9876_p8, %p10187_p10  ;;  %p9884_p9 = por %p9883_p5, %p9882_p0 }
0x17c4   : > { %p9878_p11 = pneg %p9877_p12 }
0x17c6   : > { %p9885_p1 = pnand %p9884_p9, %p9878_p11 }
0x17c9   : > { %v9768_v6 = vpop.eup %9767 }
0x17ca   : > { %v6085_v54 = vmul.f32 %v9768_v6, %v6078_v4 }
0x17cc   : > { %6594 = vst [vmem:[%s10627_s24 + $0x38] sm:$0xff] %v6085_v54  ;;  %6094 = vst [vmem:[%s448_s11] sm:$0xff] %v6085_v54 }
0x17cd   : > { %9888 = shalt.err (!%p9885_p1)
}
0x17ce   : > { %s9889_s24 = scalar_lea.hbm %s11855_s10, 128  ;;  %s9893_s11 = scalar_lea.hbm %s11978_s9, 256 }
0x17cf   : > { %p9890_p2 = scmp.ne.s32.totalorder %s11855_s10, %s9889_s24  ;;  %p9894_p13 = scmp.lt.u32.totalorder %s11855_s10, %s11978_s9 }
0x17d0   : > { %p9895_p4 = scmp.lt.u32.totalorder %s9893_s11, %s9889_s24  ;;  %p9897_p8 = scmp.lt.u32.totalorder %s9889_s24, %s11855_s10 }
0x17d1   : > { %p9891_p3 = pnand %p9890_p2, %p10187_p10 }
0x17d2   : > { %p9896_p6 = por %p9895_p4, %p9894_p13 }
0x17d3   : > { %p9892_p7 = pneg %p9891_p3 }
0x17d4   : > { %p9898_p12 = por %p9897_p8, %p9896_p6 }
0x17d6   : > { %p9899_p11 = pnand %p9898_p12, %p9892_p7 }
0x17d8   : > { %9902 = shalt.err (!%p9899_p11)
}
0x17d9   : > { %9526 = dma.vmem_to_hbm [thread:$0]  (%p10187_p10), %s11857_s25, 128, %s11855_s10, %s11874_s3  }
0x17da   : > { %s6098_s23 = scalar_lea.sflag [#allocation8], %s10246_s29  ;;  %s9903_s1 = scalar_lea.vmem %s11864_s20, 1024 }
0x17db   : > { %p9904_p0 = scmp.ne.s32.totalorder %s11864_s20, %s9903_s1  ;;  %s10031_s13 = smov [#allocation11]  }
0x17dc   : > { %s9907_s19 = sshll.u32 %s10031_s13, 4  ;;  %s9908_s19 = int_to_ptr.vmem [resolvable:$false] %s9907_s19 }
0x17dd   : > { %p9905_p5 = pnand %p9904_p0, %p10187_p10  ;;  %s9909_s24 = scalar_lea.vmem %s9908_s19, 2048 }
0x17de   : > { %p9910_p1 = scmp.lt.s32.totalorder %s11864_s20, %s9908_s19  ;;  %p9911_p2 = scmp.lt.s32.totalorder %s9909_s24, %s9903_s1 }
0x17df   : > { %p9906_p9 = pneg %p9905_p5 }
0x17e0   : > { %p9912_p3 = por %p9911_p2, %p9910_p1 }
0x17e2   : > { %p9913_p7 = pnand %p9912_p3, %p9906_p9 }
0x17e4   : > { %9916 = shalt.err (!%p9913_p7)
}
0x17e5   : > { %s9917_s25 = scalar_lea.hbm %s11862_s16, 1024  ;;  %s9921_s28 = scalar_lea.hbm %s11977_s8, 2048 }
0x17e6   : > { %p9918_p13 = scmp.ne.s32.totalorder %s11862_s16, %s9917_s25  ;;  %p9922_p8 = scmp.lt.u32.totalorder %s11862_s16, %s11977_s8 }
0x17e7   : > { %p9923_p12 = scmp.lt.u32.totalorder %s9921_s28, %s9917_s25  ;;  %p9925_p0 = scmp.lt.u32.totalorder %s9917_s25, %s11862_s16 }
0x17e8   : > { %p9919_p4 = pnand %p9918_p13, %p10187_p10 }
0x17e9   : > { %p9924_p11 = por %p9923_p12, %p9922_p8 }
0x17ea   : > { %p9920_p6 = pneg %p9919_p4 }
0x17eb   : > { %p9926_p5 = por %p9925_p0, %p9924_p11 }
0x17ed   : > { %p9927_p9 = pnand %p9926_p5, %p9920_p6 }
0x17ef   : > { %9930 = shalt.err (!%p9927_p9)
}
0x17f0   : > { %s10032_s12 = smov 128   ;;  %s10033_s1 = smov 8  }
0x17f1   : > { %9525 = dma.vmem_to_hbm [thread:$0]  (%p10187_p10), %s11864_s20, 1024, %s11862_s16, %s6098_s23, %s10032_s12, %s10032_s12, %s10033_s1  }
0x17f2   : > { %s9931_s13 = scalar_lea.vmem %s11872_s0, 128  ;;  %s10034_s19 = smov [#allocation14]  }
0x17f3   : > { %p9932_p1 = scmp.ne.s32.totalorder %s11872_s0, %s9931_s13  ;;  %s9935_s24 = sshll.u32 %s10034_s19, 4  ;;  %s9936_s24 = int_to_ptr.vmem [resolvable:$false] %s9935_s24 }
0x17f4   : > { %s9937_s25 = scalar_lea.vmem %s9936_s24, 256  ;;  %p9938_p7 = scmp.lt.s32.totalorder %s11872_s0, %s9936_s24 }
0x17f5   : > { %p9933_p2 = pnand %p9932_p1, %p10187_p10  ;;  %p9939_p13 = scmp.lt.s32.totalorder %s9937_s25, %s9931_s13 }
0x17f7   : > { %p9934_p3 = pneg %p9933_p2  ;;  %p9940_p4 = por %p9939_p13, %p9938_p7 }
0x17f9   : > { %p9941_p6 = pnand %p9940_p4, %p9934_p3 }
0x17fb   : > { %9944 = shalt.err (!%p9941_p6)
}
0x17fc   : > { %s9945_s29 = scalar_lea.hbm %s11870_s2, 128  ;;  %s9949_s23 = scalar_lea.hbm %s12016_s7, 256 }
0x17fd   : > { %p9946_p8 = scmp.ne.s32.totalorder %s11870_s2, %s9945_s29  ;;  %p9950_p0 = scmp.lt.u32.totalorder %s11870_s2, %s12016_s7 }
0x17fe   : > { %p9951_p5 = scmp.lt.u32.totalorder %s9949_s23, %s9945_s29  ;;  %p9953_p1 = scmp.lt.u32.totalorder %s9945_s29, %s11870_s2 }
0x17ff   : > { %p9947_p12 = pnand %p9946_p8, %p10187_p10 }
0x1800   : > { %p9952_p9 = por %p9951_p5, %p9950_p0 }
0x1801   : > { %p9948_p11 = pneg %p9947_p12 }
0x1802   : > { %p9954_p2 = por %p9953_p1, %p9952_p9 }
0x1804   : > { %p9955_p3 = pnand %p9954_p2, %p9948_p11 }
0x1806   : > { %9958 = shalt.err (!%p9955_p3)
}
0x1807   : > { %9527 = dma.vmem_to_hbm [thread:$0]  (%p10187_p10), %s11872_s0, 128, %s11870_s2, %s11874_s3  }
0x1808 PF: > { %s12017_s28 = sld [smem:[#allocation19_spill]]  ;;  %s12018_s11 = sld [smem:[#allocation20_spill]] }
0x1809   : > { %p12020_p13 = scmp.ge.s32.totalorder %s10021_s18, 2 }
0x180e   : > { %s6164_s21 = sand.u32 1, %s12017_s28   ;;  %p12019_p7 = scmp.ne.s32.totalorder %s12018_s11, 0 }
0x180f   : > { %s6165_s12 = scalar_lea.sflag [#allocation8], %s6164_s21 }
0x1810   : > { %p9540_p4 = pnand %p12020_p13, %p12019_p7 }
0x1812   : > { %9992 = dma.done.wait (!%p9540_p4), %s6165_s12, 1024  }
0x1813   : > { %9994 = vsyncadd (!%p9540_p4), %s6165_s12, 4294966272  ;;  %s12021_s1 = sadd.s32 4294967294, %s10021_s18  }
0x1814   : > { %s6173_s13 = sand.u32 1, %s12021_s1  }
0x1815   : > { %s6174_s19 = scalar_lea.sflag [#allocation13], %s6173_s13 }
0x1816   : > { %9996 = dma.done.wait (!%p9540_p4), %s6174_s19, 256  }
0x1817   : > { %9998 = vsyncadd (!%p9540_p4), %s6174_s19, 4294967040  ;;  %s31_s18 = sadd.s32 1, %s10021_s18   ;;  %s12022_s13 = smov %s10005_s14 }
0x1818   : > { %p28_p10 = scmp.ge.s32.totalorder %s31_s18, 4   ;;  %s12023_s14 = smov %s10009_s15 }
0x1819   : > { %s12024_s15 = smov %s10196_s22  ;;  %s12025_s16 = smov %s10017_s17 }
0x181a   : > { %s12026_s17 = smov %s12028_s27  ;;  %30 = sbr.rel (!%p28_p10) target bundleno = 16 (0x10), region = 165 }
0x1821   :  { %6188 = vsyncpa [#allocation7], 1 }
0x1822   :  { %6190 = vsyncpa [#allocation7 + $0x1], 1 }
0x1823   :  { %6191 = vsyncpa [#allocation10], 1 }
0x1824   :  { %6192 = vsyncpa [#allocation8], 1 }
0x1825   :  { %6194 = vsyncpa [#allocation8 + $0x1], 1 }
0x1826   :  { %6195 = vsyncpa [#allocation13], 1 }
0x1827   :  { %6197 = vsyncpa [#allocation13 + $0x1], 1 }

</bundles_post_ra>
